<compile_context>
chip_gen: v5e
topology: v5e:2x2
jax: 0.10.0
libtpu: 0.0.40
codegen_flags: <defaults>
</compile_context>

<pallas_src>
import functools

import jax
import jax.numpy as jnp
from jax.experimental import pallas as pl
from jax.experimental.pallas import tpu as pltpu

LANES = 128  # channel padding target (TPU lane width)


def _round_up(x, m):
    return (x + m - 1) // m * m


# ---------------------------------------------------------------------------
# Kernel 1: conv (kxk, stride via phase slabs) + train-mode BN + ReLU, bf16 out
# ---------------------------------------------------------------------------
def _conv_bn_relu_kernel(*refs, n_phases, taps, n, ho, wo, eps, inv_count):
    phase_refs = refs[:n_phases]
    w_ref, g_ref, b_ref, out_ref, acc_ref = refs[n_phases:]
    cin = phase_refs[0].shape[-1]
    m = n * ho * wo

    # Per-tap MXU GEMMs accumulated into a VMEM scratch ref (no SSA spills).
    acc_ref[...] = jnp.zeros_like(acc_ref)
    for t, (ph, oi, oj) in enumerate(taps):          # static unrolled loop
        a = phase_refs[ph][:, oi:oi + ho, oj:oj + wo, :].reshape(m, cin)
        acc_ref[...] += jnp.dot(a, w_ref[t], preferred_element_type=jnp.float32)

    # Fused train-mode BN (centered second moment) + ReLU epilogue.
    acc = acc_ref[...]
    mean = jnp.sum(acc, axis=0, keepdims=True) * inv_count
    ctr = acc - mean
    var = jnp.sum(ctr * ctr, axis=0, keepdims=True) * inv_count
    scale = g_ref[...] * jax.lax.rsqrt(var + eps)
    y = jnp.maximum(ctr * scale + b_ref[...], 0.0)
    out_ref[...] = y.reshape(n, ho, wo, -1).astype(out_ref.dtype)


# ---------------------------------------------------------------------------
# Kernel 2a: conv2 + bn2 + identity residual (sliced in-kernel) + ReLU
# ---------------------------------------------------------------------------
def _tail_identity_kernel(h_ref, xp_ref, w_ref, g_ref, b_ref, out_ref, acc_ref,
                          *, taps, n, ho, wo, pad, eps, inv_count):
    cin = h_ref.shape[-1]
    m = n * ho * wo

    acc_ref[...] = jnp.zeros_like(acc_ref)
    for t, (_, oi, oj) in enumerate(taps):
        a = h_ref[:, oi:oi + ho, oj:oj + wo, :].reshape(m, cin)
        acc_ref[...] += jnp.dot(a, w_ref[t], preferred_element_type=jnp.float32)

    acc = acc_ref[...]
    mean = jnp.sum(acc, axis=0, keepdims=True) * inv_count
    ctr = acc - mean
    var = jnp.sum(ctr * ctr, axis=0, keepdims=True) * inv_count
    y = ctr * (g_ref[...] * jax.lax.rsqrt(var + eps)) + b_ref[...]

    # identity residual = interior of the (padded) conv1 input, sliced in VMEM
    r = xp_ref[:, pad:pad + ho, pad:pad + wo, :].reshape(m, cin)
    y = jnp.maximum(y + r.astype(jnp.float32), 0.0)
    out_ref[...] = y.reshape(n, ho, wo, -1).astype(out_ref.dtype)


# ---------------------------------------------------------------------------
# Kernel 2b: conv2 + bn2 + (1x1 downsample conv + bn) + add + ReLU
# ---------------------------------------------------------------------------
def _tail_downsample_kernel(h_ref, xs_ref, w_ref, g_ref, b_ref,
                            wd_ref, gd_ref, bd_ref, out_ref, acc_ref, accd_ref,
                            *, taps, n, ho, wo, eps, inv_count):
    cin = h_ref.shape[-1]
    m = n * ho * wo

    # main path: conv2
    acc_ref[...] = jnp.zeros_like(acc_ref)
    for t, (_, oi, oj) in enumerate(taps):
        a = h_ref[:, oi:oi + ho, oj:oj + wo, :].reshape(m, cin)
        acc_ref[...] += jnp.dot(a, w_ref[t], preferred_element_type=jnp.float32)

    # downsample path: 1x1 conv on the pre-subsampled input (single GEMM)
    xs = xs_ref[...].reshape(m, xs_ref.shape[-1])
    accd_ref[...] = jnp.dot(xs, wd_ref[0], preferred_element_type=jnp.float32)

    def _bn(acc, g, b):
        mean = jnp.sum(acc, axis=0, keepdims=True) * inv_count
        ctr = acc - mean
        var = jnp.sum(ctr * ctr, axis=0, keepdims=True) * inv_count
        return ctr * (g * jax.lax.rsqrt(var + eps)) + b

    y = _bn(acc_ref[...], g_ref[...], b_ref[...]) \
        + _bn(accd_ref[...], gd_ref[...], bd_ref[...])
    out_ref[...] = jnp.maximum(y, 0.0).reshape(n, ho, wo, -1).astype(out_ref.dtype)


# ---------------------------------------------------------------------------
# Wrappers
# ---------------------------------------------------------------------------
def _make_phases(xp, kh, kw, stride, ho, wo):
    """Stride-phase decomposition. stride==1: no copies (xp passed through).
    Taps are (phase_idx, row_off, col_off) with static offsets."""
    s = stride
    if s == 1:
        return [xp], [(0, i, j) for i in range(kh) for j in range(kw)]
    keys, taps = [], []
    for i in range(kh):
        for j in range(kw):
            key = (i % s, j % s)
            if key not in keys:
                keys.append(key)
            taps.append((keys.index(key), i // s, j // s))
    hc = ho + (kh - 1) // s
    wc = wo + (kw - 1) // s
    slabs = []
    for (pi, pj) in keys:
        sl = xp[:, pi::s, pj::s, :][:, :hc, :wc, :]
        ph, pw = hc - sl.shape[1], wc - sl.shape[2]
        if ph or pw:
            sl = jnp.pad(sl, ((0, 0), (0, ph), (0, pw), (0, 0)))
        slabs.append(sl)
    return slabs, taps


def _bytes_of(arrs):
    return int(sum(int(a.size) * a.dtype.itemsize for a in arrs))


def conv_bn_relu(xp, w_packed, gamma, beta, *, kh, kw, stride, n, ho, wo, eps):
    slabs, taps = _make_phases(xp, kh, kw, stride, ho, wo)
    m = n * ho * wo
    cin, cout = w_packed.shape[1], w_packed.shape[2]
    kern = functools.partial(_conv_bn_relu_kernel, n_phases=len(slabs),
                             taps=taps, n=n, ho=ho, wo=wo, eps=eps,
                             inv_count=1.0 / m)
    cost = pl.CostEstimate(flops=2 * m * cin * cout * len(taps),
                           transcendentals=0,
                           bytes_accessed=_bytes_of(slabs) + _bytes_of(
                               [w_packed, gamma, beta]) + m * cout * 2)
    return pl.pallas_call(
        kern,
        out_shape=jax.ShapeDtypeStruct((n, ho, wo, cout), jnp.bfloat16),
        scratch_shapes=[pltpu.VMEM((m, cout), jnp.float32)],
        cost_estimate=cost,
    )(*slabs, w_packed, gamma, beta)


def tail_identity(h1p, xp, w_packed, gamma, beta, *, kh, kw, pad, n, ho, wo, eps):
    taps = [(0, i, j) for i in range(kh) for j in range(kw)]
    m = n * ho * wo
    cin, cout = w_packed.shape[1], w_packed.shape[2]
    kern = functools.partial(_tail_identity_kernel, taps=taps, n=n, ho=ho,
                             wo=wo, pad=pad, eps=eps, inv_count=1.0 / m)
    cost = pl.CostEstimate(flops=2 * m * cin * cout * len(taps),
                           transcendentals=0,
                           bytes_accessed=_bytes_of([h1p, xp, w_packed, gamma,
                                                     beta]) + m * cout * 4)
    return pl.pallas_call(
        kern,
        out_shape=jax.ShapeDtypeStruct((n, ho, wo, cout), jnp.float32),
        scratch_shapes=[pltpu.VMEM((m, cout), jnp.float32)],
        cost_estimate=cost,
    )(h1p, xp, w_packed, gamma, beta)


def tail_downsample(h1p, xs, w_packed, gamma, beta, wd_packed, gd, bd,
                    *, kh, kw, n, ho, wo, eps):
    taps = [(0, i, j) for i in range(kh) for j in range(kw)]
    m = n * ho * wo
    cin, cout = w_packed.shape[1], w_packed.shape[2]
    kern = functools.partial(_tail_downsample_kernel, taps=taps, n=n, ho=ho,
                             wo=wo, eps=eps, inv_count=1.0 / m)
    flops = 2 * m * cin * cout * len(taps) + 2 * m * wd_packed.shape[1] * cout
    cost = pl.CostEstimate(flops=flops, transcendentals=0,
                           bytes_accessed=_bytes_of([h1p, xs, w_packed, gamma,
                                                     beta, wd_packed, gd, bd])
                           + m * cout * 4)
    return pl.pallas_call(
        kern,
        out_shape=jax.ShapeDtypeStruct((n, ho, wo, cout), jnp.float32),
        scratch_shapes=[pltpu.VMEM((m, cout), jnp.float32),
                        pltpu.VMEM((m, cout), jnp.float32)],
        cost_estimate=cost,
    )(h1p, xs, w_packed, gamma, beta, wd_packed, gd, bd)


# ---------------------------------------------------------------------------
# Parameters (packed ONCE outside the jitted forward; channels padded to 128)
# ---------------------------------------------------------------------------
def init_raw_params(key, in_ch, out_ch, downsample):
    k1, k2, k3 = jax.random.split(key, 3)

    def conv_w(kk, o, i, kh, kw):
        std = (2.0 / (i * kh * kw)) ** 0.5
        return jax.random.normal(kk, (o, i, kh, kw), jnp.float32) * std

    raw = {
        "conv1_w": conv_w(k1, out_ch, in_ch, 3, 3),
        "bn1_g": jnp.ones((out_ch,), jnp.float32),
        "bn1_b": jnp.zeros((out_ch,), jnp.float32),
        "conv2_w": conv_w(k2, out_ch, out_ch, 3, 3),
        "bn2_g": jnp.ones((out_ch,), jnp.float32),
        "bn2_b": jnp.zeros((out_ch,), jnp.float32),
    }
    if downsample:
        raw["ds_w"] = conv_w(k3, out_ch, in_ch, 1, 1)
        raw["ds_bn_g"] = jnp.ones((out_ch,), jnp.float32)
        raw["ds_bn_b"] = jnp.zeros((out_ch,), jnp.float32)
    return raw


def pack_params(raw):
    def pad_vec(v):
        cp = _round_up(v.shape[0], LANES)
        return jnp.pad(v, (0, cp - v.shape[0])).reshape(1, cp).astype(jnp.float32)

    def pack_w(w):
        o, i, kh, kw = w.shape
        cp_i, cp_o = _round_up(i, LANES), _round_up(o, LANES)
        wp = jnp.transpose(w, (2, 3, 1, 0)).reshape(kh * kw, i, o)
        wp = jnp.pad(wp, ((0, 0), (0, cp_i - i), (0, cp_o - o)))
        return wp.astype(jnp.bfloat16)

    p = {"conv1_w": pack_w(raw["conv1_w"]),
         "bn1_g": pad_vec(raw["bn1_g"]), "bn1_b": pad_vec(raw["bn1_b"]),
         "conv2_w": pack_w(raw["conv2_w"]),
         "bn2_g": pad_vec(raw["bn2_g"]), "bn2_b": pad_vec(raw["bn2_b"])}
    if "ds_w" in raw:
        p["ds_w"] = pack_w(raw["ds_w"])
        p["ds_bn_g"] = pad_vec(raw["ds_bn_g"])
        p["ds_bn_b"] = pad_vec(raw["ds_bn_b"])
    return p


# ---------------------------------------------------------------------------
# BasicBlock forward: exactly 2 pallas_calls per block
# ---------------------------------------------------------------------------
def basic_block_forward(params, x_nchw, *, out_ch, stride=1, downsample=False,
                        kernel_size=3, padding=1, eps=1e-5):
    n, cin, h, w = x_nchw.shape
    cp_in = _round_up(cin, LANES)

    # XLA glue (one copy chain): NCHW f32 -> channel-padded NHWC bf16 + halo pad
    x = jnp.transpose(x_nchw, (0, 2, 3, 1)).astype(jnp.bfloat16)
    x = jnp.pad(x, ((0, 0), (0, 0), (0, 0), (0, cp_in - cin)))
    xp = jnp.pad(x, ((0, 0), (padding, padding), (padding, padding), (0, 0)))

    ho = (h + 2 * padding - kernel_size) // stride + 1
    wo = (w + 2 * padding - kernel_size) // stride + 1

    # conv1 + bn1 + relu (one fused kernel, bf16 output feeds conv2's MXU)
    h1 = conv_bn_relu(xp, params["conv1_w"], params["bn1_g"], params["bn1_b"],
                      kh=kernel_size, kw=kernel_size, stride=stride,
                      n=n, ho=ho, wo=wo, eps=eps)
    # TODO(synk): fold this halo pad into the conv1 epilogue (offset interior
    # store) once unaligned packed-sublane stores are validated on all targets.
    h1p = jnp.pad(h1, ((0, 0), (padding, padding), (padding, padding), (0, 0)))

    if downsample:
        xs = x[:, ::stride, ::stride, :][:, :ho, :wo, :]
        out = tail_downsample(h1p, xs, params["conv2_w"], params["bn2_g"],
                              params["bn2_b"], params["ds_w"],
                              params["ds_bn_g"], params["ds_bn_b"],
                              kh=kernel_size, kw=kernel_size,
                              n=n, ho=ho, wo=wo, eps=eps)
    else:
        assert stride == 1 and cin == out_ch, \
            "identity residual path requires stride==1 and in_ch == out_ch"
        out = tail_identity(h1p, xp, params["conv2_w"], params["bn2_g"],
                            params["bn2_b"], kh=kernel_size, kw=kernel_size,
                            pad=padding, n=n, ho=ho, wo=wo, eps=eps)

    # drop padded channels, back to NCHW (one XLA copy)
    return jnp.transpose(out[..., :out_ch], (0, 3, 1, 2))


# ---------------------------------------------------------------------------
# Pure-JAX reference (mirrors the torch module, train-mode BN) for validation
# ---------------------------------------------------------------------------
def reference_block(raw, x_nchw, *, stride=1, downsample=False, eps=1e-5):
    def conv(x, w, s, p):
        return jax.lax.conv_general_dilated(
            x, w, (s, s), ((p, p), (p, p)),
            dimension_numbers=("NCHW", "OIHW", "NCHW"))

    def bn(x, g, b):
        mean = jnp.mean(x, axis=(0, 2, 3), keepdims=True)
        var = jnp.mean((x - mean) ** 2, axis=(0, 2, 3), keepdims=True)
        return ((x - mean) * jax.lax.rsqrt(var + eps) * g.reshape(1, -1, 1, 1)
                + b.reshape(1, -1, 1, 1))

    identity = x_nchw
    h = jax.nn.relu(bn(conv(x_nchw, raw["conv1_w"], stride, 1),
                       raw["bn1_g"], raw["bn1_b"]))
    h = bn(conv(h, raw["conv2_w"], 1, 1), raw["bn2_g"], raw["bn2_b"])
    if downsample:
        identity = bn(conv(identity, raw["ds_w"], stride, 0),
                      raw["ds_bn_g"], raw["ds_bn_b"])
    return jax.nn.relu(h + identity)


if __name__ == "__main__":
    key = jax.random.PRNGKey(0)

    configs = [
        # (in_ch, out_ch, stride, downsample, H, W)
        (32, 64, 2, True, 16, 16),    # strided block with 1x1 downsample path
        (64, 64, 1, False, 16, 16),   # identity block
    ]
    for idx, (cin, cout, stride, ds, H, W) in enumerate(configs):
        pkey, xkey = jax.random.split(jax.random.fold_in(key, idx))
        raw = init_raw_params(pkey, cin, cout, ds)
        params = pack_params(raw)                 # one-time packing, outside jit
        x = jax.random.normal(xkey, (2, cin, H, W), jnp.float32)

        fwd = jax.jit(functools.partial(basic_block_forward, out_ch=cout,
                                        stride=stride, downsample=ds))
        y = fwd(params, x)
        jax.block_until_ready(y)

        Ho = (H + 2 - 3) // stride + 1
        assert y.shape == (2, cout, Ho, Ho), y.shape
        assert bool(jnp.all(jnp.isfinite(y)))
        assert bool(jnp.all(y >= 0.0))            # post-ReLU

        y_ref = reference_block(raw, x, stride=stride, downsample=ds)
        max_err = float(jnp.max(jnp.abs(y - y_ref)))
        assert max_err < 0.2, f"config {idx}: max abs err {max_err}"

    print("KERNEL_OK")
</pallas_src>

<mosaic_0001>
module attributes {stable_mosaic.version = 11 : i64} {
  func.func @_conv_bn_relu_kernel(%arg0: memref<2x9x9x128xbf16, #tpu.memory_space<vmem>>, %arg1: memref<2x9x9x128xbf16, #tpu.memory_space<vmem>>, %arg2: memref<2x9x9x128xbf16, #tpu.memory_space<vmem>>, %arg3: memref<2x9x9x128xbf16, #tpu.memory_space<vmem>>, %arg4: memref<9x128x128xbf16, #tpu.memory_space<vmem>>, %arg5: memref<1x128xf32, #tpu.memory_space<vmem>>, %arg6: memref<1x128xf32, #tpu.memory_space<vmem>>, %arg7: memref<2x8x8x128xbf16, #tpu.memory_space<vmem>>, %arg8: memref<128x128xf32, #tpu.memory_space<vmem>>) attributes {dimension_semantics = [], scalar_prefetch = 0 : i64, scratch_operands = 1 : i64, tpu.core_type = #tpu.core_type<tc>} {
    %cst = arith.constant 0.000000e+00 : f32
    %0 = vector.broadcast %cst : f32 to vector<128x128xf32>
    %c0 = arith.constant 0 : index
    %c0_0 = arith.constant 0 : index
    %1 = vector.load %arg8[%c0, %c0_0] : memref<128x128xf32, #tpu.memory_space<vmem>>, vector<128x128xf32>
    tpu.vector_store %arg8[%c0, %c0_0], %0 {strides = array<i32>} : memref<128x128xf32, #tpu.memory_space<vmem>>, vector<128x128xf32>,
    %c0_1 = arith.constant 0 : index
    %c0_2 = arith.constant 0 : index
    %c0_3 = arith.constant 0 : index
    %c0_4 = arith.constant 0 : index
    %2 = vector.load %arg0[%c0_1, %c0_2, %c0_3, %c0_4] : memref<2x9x9x128xbf16, #tpu.memory_space<vmem>>, vector<2x8x8x128xbf16>
    %3 = vector.shape_cast %2 : vector<2x8x8x128xbf16> to vector<128x128xbf16>
    %c0_5 = arith.constant 0 : index
    %c0_6 = arith.constant 0 : index
    %4 = vector.load %arg8[%c0_5, %c0_6] : memref<128x128xf32, #tpu.memory_space<vmem>>, vector<128x128xf32>
    %c0_7 = arith.constant 0 : index
    %c0_8 = arith.constant 0 : index
    %c0_9 = arith.constant 0 : index
    %5 = vector.load %arg4[%c0_7, %c0_8, %c0_9] : memref<9x128x128xbf16, #tpu.memory_space<vmem>>, vector<1x128x128xbf16>
    %6 = vector.shape_cast %5 : vector<1x128x128xbf16> to vector<128x128xbf16>
    %cst_10 = arith.constant dense<0.000000e+00> : vector<128x128xf32>
    %7 = tpu.matmul %3, %6, %cst_10 {dimension_numbers = #tpu.dot_dimension_numbers<[1], [0], [0], [1], [0, 0, 1, 1], [], []>} : vector<128x128xbf16>, vector<128x128xbf16>, vector<128x128xf32> -> vector<128x128xf32>
    %8 = arith.addf %4, %7 : vector<128x128xf32>
    %c0_11 = arith.constant 0 : index
    %c0_12 = arith.constant 0 : index
    %9 = vector.load %arg8[%c0_11, %c0_12] : memref<128x128xf32, #tpu.memory_space<vmem>>, vector<128x128xf32>
    tpu.vector_store %arg8[%c0_11, %c0_12], %8 {strides = array<i32>} : memref<128x128xf32, #tpu.memory_space<vmem>>, vector<128x128xf32>,
    %c0_13 = arith.constant 0 : index
    %c0_14 = arith.constant 0 : index
    %c0_15 = arith.constant 0 : index
    %c0_16 = arith.constant 0 : index
    %10 = vector.load %arg1[%c0_13, %c0_14, %c0_15, %c0_16] : memref<2x9x9x128xbf16, #tpu.memory_space<vmem>>, vector<2x8x8x128xbf16>
    %11 = vector.shape_cast %10 : vector<2x8x8x128xbf16> to vector<128x128xbf16>
    %c0_17 = arith.constant 0 : index
    %c0_18 = arith.constant 0 : index
    %12 = vector.load %arg8[%c0_17, %c0_18] : memref<128x128xf32, #tpu.memory_space<vmem>>, vector<128x128xf32>
    %c1 = arith.constant 1 : index
    %c0_19 = arith.constant 0 : index
    %c0_20 = arith.constant 0 : index
    %13 = vector.load %arg4[%c1, %c0_19, %c0_20] : memref<9x128x128xbf16, #tpu.memory_space<vmem>>, vector<1x128x128xbf16>
    %14 = vector.shape_cast %13 : vector<1x128x128xbf16> to vector<128x128xbf16>
    %cst_21 = arith.constant dense<0.000000e+00> : vector<128x128xf32>
    %15 = tpu.matmul %11, %14, %cst_21 {dimension_numbers = #tpu.dot_dimension_numbers<[1], [0], [0], [1], [0, 0, 1, 1], [], []>} : vector<128x128xbf16>, vector<128x128xbf16>, vector<128x128xf32> -> vector<128x128xf32>
    %16 = arith.addf %12, %15 : vector<128x128xf32>
    %c0_22 = arith.constant 0 : index
    %c0_23 = arith.constant 0 : index
    %17 = vector.load %arg8[%c0_22, %c0_23] : memref<128x128xf32, #tpu.memory_space<vmem>>, vector<128x128xf32>
    tpu.vector_store %arg8[%c0_22, %c0_23], %16 {strides = array<i32>} : memref<128x128xf32, #tpu.memory_space<vmem>>, vector<128x128xf32>,
    %c0_24 = arith.constant 0 : index
    %c0_25 = arith.constant 0 : index
    %c1_26 = arith.constant 1 : index
    %c0_27 = arith.constant 0 : index
    %18 = vector.load %arg0[%c0_24, %c0_25, %c1_26, %c0_27] : memref<2x9x9x128xbf16, #tpu.memory_space<vmem>>, vector<2x8x8x128xbf16>
    %19 = vector.shape_cast %18 : vector<2x8x8x128xbf16> to vector<128x128xbf16>
    %c0_28 = arith.constant 0 : index
    %c0_29 = arith.constant 0 : index
    %20 = vector.load %arg8[%c0_28, %c0_29] : memref<128x128xf32, #tpu.memory_space<vmem>>, vector<128x128xf32>
    %c2 = arith.constant 2 : index
    %c0_30 = arith.constant 0 : index
    %c0_31 = arith.constant 0 : index
    %21 = vector.load %arg4[%c2, %c0_30, %c0_31] : memref<9x128x128xbf16, #tpu.memory_space<vmem>>, vector<1x128x128xbf16>
    %22 = vector.shape_cast %21 : vector<1x128x128xbf16> to vector<128x128xbf16>
    %cst_32 = arith.constant dense<0.000000e+00> : vector<128x128xf32>
    %23 = tpu.matmul %19, %22, %cst_32 {dimension_numbers = #tpu.dot_dimension_numbers<[1], [0], [0], [1], [0, 0, 1, 1], [], []>} : vector<128x128xbf16>, vector<128x128xbf16>, vector<128x128xf32> -> vector<128x128xf32>
    %24 = arith.addf %20, %23 : vector<128x128xf32>
    %c0_33 = arith.constant 0 : index
    %c0_34 = arith.constant 0 : index
    %25 = vector.load %arg8[%c0_33, %c0_34] : memref<128x128xf32, #tpu.memory_space<vmem>>, vector<128x128xf32>
    tpu.vector_store %arg8[%c0_33, %c0_34], %24 {strides = array<i32>} : memref<128x128xf32, #tpu.memory_space<vmem>>, vector<128x128xf32>,
    %c0_35 = arith.constant 0 : index
    %c0_36 = arith.constant 0 : index
    %c0_37 = arith.constant 0 : index
    %c0_38 = arith.constant 0 : index
    %26 = vector.load %arg2[%c0_35, %c0_36, %c0_37, %c0_38] : memref<2x9x9x128xbf16, #tpu.memory_space<vmem>>, vector<2x8x8x128xbf16>
    %27 = vector.shape_cast %26 : vector<2x8x8x128xbf16> to vector<128x128xbf16>
    %c0_39 = arith.constant 0 : index
    %c0_40 = arith.constant 0 : index
    %28 = vector.load %arg8[%c0_39, %c0_40] : memref<128x128xf32, #tpu.memory_space<vmem>>, vector<128x128xf32>
    %c3 = arith.constant 3 : index
    %c0_41 = arith.constant 0 : index
    %c0_42 = arith.constant 0 : index
    %29 = vector.load %arg4[%c3, %c0_41, %c0_42] : memref<9x128x128xbf16, #tpu.memory_space<vmem>>, vector<1x128x128xbf16>
    %30 = vector.shape_cast %29 : vector<1x128x128xbf16> to vector<128x128xbf16>
    %cst_43 = arith.constant dense<0.000000e+00> : vector<128x128xf32>
    %31 = tpu.matmul %27, %30, %cst_43 {dimension_numbers = #tpu.dot_dimension_numbers<[1], [0], [0], [1], [0, 0, 1, 1], [], []>} : vector<128x128xbf16>, vector<128x128xbf16>, vector<128x128xf32> -> vector<128x128xf32>
    %32 = arith.addf %28, %31 : vector<128x128xf32>
    %c0_44 = arith.constant 0 : index
    %c0_45 = arith.constant 0 : index
    %33 = vector.load %arg8[%c0_44, %c0_45] : memref<128x128xf32, #tpu.memory_space<vmem>>, vector<128x128xf32>
    tpu.vector_store %arg8[%c0_44, %c0_45], %32 {strides = array<i32>} : memref<128x128xf32, #tpu.memory_space<vmem>>, vector<128x128xf32>,
    %c0_46 = arith.constant 0 : index
    %c0_47 = arith.constant 0 : index
    %c0_48 = arith.constant 0 : index
    %c0_49 = arith.constant 0 : index
    %34 = vector.load %arg3[%c0_46, %c0_47, %c0_48, %c0_49] : memref<2x9x9x128xbf16, #tpu.memory_space<vmem>>, vector<2x8x8x128xbf16>
    %35 = vector.shape_cast %34 : vector<2x8x8x128xbf16> to vector<128x128xbf16>
    %c0_50 = arith.constant 0 : index
    %c0_51 = arith.constant 0 : index
    %36 = vector.load %arg8[%c0_50, %c0_51] : memref<128x128xf32, #tpu.memory_space<vmem>>, vector<128x128xf32>
    %c4 = arith.constant 4 : index
    %c0_52 = arith.constant 0 : index
    %c0_53 = arith.constant 0 : index
    %37 = vector.load %arg4[%c4, %c0_52, %c0_53] : memref<9x128x128xbf16, #tpu.memory_space<vmem>>, vector<1x128x128xbf16>
    %38 = vector.shape_cast %37 : vector<1x128x128xbf16> to vector<128x128xbf16>
    %cst_54 = arith.constant dense<0.000000e+00> : vector<128x128xf32>
    %39 = tpu.matmul %35, %38, %cst_54 {dimension_numbers = #tpu.dot_dimension_numbers<[1], [0], [0], [1], [0, 0, 1, 1], [], []>} : vector<128x128xbf16>, vector<128x128xbf16>, vector<128x128xf32> -> vector<128x128xf32>
    %40 = arith.addf %36, %39 : vector<128x128xf32>
    %c0_55 = arith.constant 0 : index
    %c0_56 = arith.constant 0 : index
    %41 = vector.load %arg8[%c0_55, %c0_56] : memref<128x128xf32, #tpu.memory_space<vmem>>, vector<128x128xf32>
    tpu.vector_store %arg8[%c0_55, %c0_56], %40 {strides = array<i32>} : memref<128x128xf32, #tpu.memory_space<vmem>>, vector<128x128xf32>,
    %c0_57 = arith.constant 0 : index
    %c0_58 = arith.constant 0 : index
    %c1_59 = arith.constant 1 : index
    %c0_60 = arith.constant 0 : index
    %42 = vector.load %arg2[%c0_57, %c0_58, %c1_59, %c0_60] : memref<2x9x9x128xbf16, #tpu.memory_space<vmem>>, vector<2x8x8x128xbf16>
    %43 = vector.shape_cast %42 : vector<2x8x8x128xbf16> to vector<128x128xbf16>
    %c0_61 = arith.constant 0 : index
    %c0_62 = arith.constant 0 : index
    %44 = vector.load %arg8[%c0_61, %c0_62] : memref<128x128xf32, #tpu.memory_space<vmem>>, vector<128x128xf32>
    %c5 = arith.constant 5 : index
    %c0_63 = arith.constant 0 : index
    %c0_64 = arith.constant 0 : index
    %45 = vector.load %arg4[%c5, %c0_63, %c0_64] : memref<9x128x128xbf16, #tpu.memory_space<vmem>>, vector<1x128x128xbf16>
    %46 = vector.shape_cast %45 : vector<1x128x128xbf16> to vector<128x128xbf16>
    %cst_65 = arith.constant dense<0.000000e+00> : vector<128x128xf32>
    %47 = tpu.matmul %43, %46, %cst_65 {dimension_numbers = #tpu.dot_dimension_numbers<[1], [0], [0], [1], [0, 0, 1, 1], [], []>} : vector<128x128xbf16>, vector<128x128xbf16>, vector<128x128xf32> -> vector<128x128xf32>
    %48 = arith.addf %44, %47 : vector<128x128xf32>
    %c0_66 = arith.constant 0 : index
    %c0_67 = arith.constant 0 : index
    %49 = vector.load %arg8[%c0_66, %c0_67] : memref<128x128xf32, #tpu.memory_space<vmem>>, vector<128x128xf32>
    tpu.vector_store %arg8[%c0_66, %c0_67], %48 {strides = array<i32>} : memref<128x128xf32, #tpu.memory_space<vmem>>, vector<128x128xf32>,
    %c0_68 = arith.constant 0 : index
    %c1_69 = arith.constant 1 : index
    %c0_70 = arith.constant 0 : index
    %c0_71 = arith.constant 0 : index
    %50 = vector.load %arg0[%c0_68, %c1_69, %c0_70, %c0_71] : memref<2x9x9x128xbf16, #tpu.memory_space<vmem>>, vector<2x8x8x128xbf16>
    %51 = vector.shape_cast %50 : vector<2x8x8x128xbf16> to vector<128x128xbf16>
    %c0_72 = arith.constant 0 : index
    %c0_73 = arith.constant 0 : index
    %52 = vector.load %arg8[%c0_72, %c0_73] : memref<128x128xf32, #tpu.memory_space<vmem>>, vector<128x128xf32>
    %c6 = arith.constant 6 : index
    %c0_74 = arith.constant 0 : index
    %c0_75 = arith.constant 0 : index
    %53 = vector.load %arg4[%c6, %c0_74, %c0_75] : memref<9x128x128xbf16, #tpu.memory_space<vmem>>, vector<1x128x128xbf16>
    %54 = vector.shape_cast %53 : vector<1x128x128xbf16> to vector<128x128xbf16>
    %cst_76 = arith.constant dense<0.000000e+00> : vector<128x128xf32>
    %55 = tpu.matmul %51, %54, %cst_76 {dimension_numbers = #tpu.dot_dimension_numbers<[1], [0], [0], [1], [0, 0, 1, 1], [], []>} : vector<128x128xbf16>, vector<128x128xbf16>, vector<128x128xf32> -> vector<128x128xf32>
    %56 = arith.addf %52, %55 : vector<128x128xf32>
    %c0_77 = arith.constant 0 : index
    %c0_78 = arith.constant 0 : index
    %57 = vector.load %arg8[%c0_77, %c0_78] : memref<128x128xf32, #tpu.memory_space<vmem>>, vector<128x128xf32>
    tpu.vector_store %arg8[%c0_77, %c0_78], %56 {strides = array<i32>} : memref<128x128xf32, #tpu.memory_space<vmem>>, vector<128x128xf32>,
    %c0_79 = arith.constant 0 : index
    %c1_80 = arith.constant 1 : index
    %c0_81 = arith.constant 0 : index
    %c0_82 = arith.constant 0 : index
    %58 = vector.load %arg1[%c0_79, %c1_80, %c0_81, %c0_82] : memref<2x9x9x128xbf16, #tpu.memory_space<vmem>>, vector<2x8x8x128xbf16>
    %59 = vector.shape_cast %58 : vector<2x8x8x128xbf16> to vector<128x128xbf16>
    %c0_83 = arith.constant 0 : index
    %c0_84 = arith.constant 0 : index
    %60 = vector.load %arg8[%c0_83, %c0_84] : memref<128x128xf32, #tpu.memory_space<vmem>>, vector<128x128xf32>
    %c7 = arith.constant 7 : index
    %c0_85 = arith.constant 0 : index
    %c0_86 = arith.constant 0 : index
    %61 = vector.load %arg4[%c7, %c0_85, %c0_86] : memref<9x128x128xbf16, #tpu.memory_space<vmem>>, vector<1x128x128xbf16>
    %62 = vector.shape_cast %61 : vector<1x128x128xbf16> to vector<128x128xbf16>
    %cst_87 = arith.constant dense<0.000000e+00> : vector<128x128xf32>
    %63 = tpu.matmul %59, %62, %cst_87 {dimension_numbers = #tpu.dot_dimension_numbers<[1], [0], [0], [1], [0, 0, 1, 1], [], []>} : vector<128x128xbf16>, vector<128x128xbf16>, vector<128x128xf32> -> vector<128x128xf32>
    %64 = arith.addf %60, %63 : vector<128x128xf32>
    %c0_88 = arith.constant 0 : index
    %c0_89 = arith.constant 0 : index
    %65 = vector.load %arg8[%c0_88, %c0_89] : memref<128x128xf32, #tpu.memory_space<vmem>>, vector<128x128xf32>
    tpu.vector_store %arg8[%c0_88, %c0_89], %64 {strides = array<i32>} : memref<128x128xf32, #tpu.memory_space<vmem>>, vector<128x128xf32>,
    %c0_90 = arith.constant 0 : index
    %c1_91 = arith.constant 1 : index
    %c1_92 = arith.constant 1 : index
    %c0_93 = arith.constant 0 : index
    %66 = vector.load %arg0[%c0_90, %c1_91, %c1_92, %c0_93] : memref<2x9x9x128xbf16, #tpu.memory_space<vmem>>, vector<2x8x8x128xbf16>
    %67 = vector.shape_cast %66 : vector<2x8x8x128xbf16> to vector<128x128xbf16>
    %c0_94 = arith.constant 0 : index
    %c0_95 = arith.constant 0 : index
    %68 = vector.load %arg8[%c0_94, %c0_95] : memref<128x128xf32, #tpu.memory_space<vmem>>, vector<128x128xf32>
    %c8 = arith.constant 8 : index
    %c0_96 = arith.constant 0 : index
    %c0_97 = arith.constant 0 : index
    %69 = vector.load %arg4[%c8, %c0_96, %c0_97] : memref<9x128x128xbf16, #tpu.memory_space<vmem>>, vector<1x128x128xbf16>
    %70 = vector.shape_cast %69 : vector<1x128x128xbf16> to vector<128x128xbf16>
    %cst_98 = arith.constant dense<0.000000e+00> : vector<128x128xf32>
    %71 = tpu.matmul %67, %70, %cst_98 {dimension_numbers = #tpu.dot_dimension_numbers<[1], [0], [0], [1], [0, 0, 1, 1], [], []>} : vector<128x128xbf16>, vector<128x128xbf16>, vector<128x128xf32> -> vector<128x128xf32>
    %72 = arith.addf %68, %71 : vector<128x128xf32>
    %c0_99 = arith.constant 0 : index
    %c0_100 = arith.constant 0 : index
    %73 = vector.load %arg8[%c0_99, %c0_100] : memref<128x128xf32, #tpu.memory_space<vmem>>, vector<128x128xf32>
    tpu.vector_store %arg8[%c0_99, %c0_100], %72 {strides = array<i32>} : memref<128x128xf32, #tpu.memory_space<vmem>>, vector<128x128xf32>,
    %c0_101 = arith.constant 0 : index
    %c0_102 = arith.constant 0 : index
    %74 = vector.load %arg8[%c0_101, %c0_102] : memref<128x128xf32, #tpu.memory_space<vmem>>, vector<128x128xf32>
    %cst_103 = arith.constant dense<0.000000e+00> : vector<128xf32>
    %75 = vector.multi_reduction <add>, %74, %cst_103 [0] : vector<128x128xf32> to vector<128xf32>
    %76 = vector.shape_cast %75 : vector<128xf32> to vector<1x128xf32>
    %cst_104 = arith.constant 7.812500e-03 : f32
    %77 = vector.broadcast %cst_104 : f32 to vector<1x128xf32>
    %78 = arith.mulf %76, %77 : vector<1x128xf32>
    %79 = vector.broadcast %78 : vector<1x128xf32> to vector<128x128xf32>
    %80 = arith.subf %74, %79 : vector<128x128xf32>
    %81 = arith.mulf %80, %80 : vector<128x128xf32>
    %cst_105 = arith.constant dense<0.000000e+00> : vector<128xf32>
    %82 = vector.multi_reduction <add>, %81, %cst_105 [0] : vector<128x128xf32> to vector<128xf32>
    %83 = vector.shape_cast %82 : vector<128xf32> to vector<1x128xf32>
    %cst_106 = arith.constant 7.812500e-03 : f32
    %84 = vector.broadcast %cst_106 : f32 to vector<1x128xf32>
    %85 = arith.mulf %83, %84 : vector<1x128xf32>
    %c0_107 = arith.constant 0 : index
    %c0_108 = arith.constant 0 : index
    %86 = vector.load %arg5[%c0_107, %c0_108] : memref<1x128xf32, #tpu.memory_space<vmem>>, vector<1x128xf32>
    %cst_109 = arith.constant 9.99999974E-6 : f32
    %87 = vector.broadcast %cst_109 : f32 to vector<1x128xf32>
    %88 = arith.addf %85, %87 : vector<1x128xf32>
    %89 = math.rsqrt %88 : vector<1x128xf32>
    %90 = arith.mulf %86, %89 : vector<1x128xf32>
    %91 = vector.broadcast %90 : vector<1x128xf32> to vector<128x128xf32>
    %92 = arith.mulf %80, %91 : vector<128x128xf32>
    %c0_110 = arith.constant 0 : index
    %c0_111 = arith.constant 0 : index
    %93 = vector.load %arg6[%c0_110, %c0_111] : memref<1x128xf32, #tpu.memory_space<vmem>>, vector<1x128xf32>
    %94 = vector.broadcast %93 : vector<1x128xf32> to vector<128x128xf32>
    %95 = arith.addf %92, %94 : vector<128x128xf32>
    %cst_112 = arith.constant 0.000000e+00 : f32
    %96 = vector.broadcast %cst_112 : f32 to vector<128x128xf32>
    %97 = arith.maximumf %95, %96 : vector<128x128xf32>
    %98 = vector.shape_cast %97 : vector<128x128xf32> to vector<2x8x8x128xf32>
    %99 = arith.truncf %98 : vector<2x8x8x128xf32> to vector<2x8x8x128xbf16>
    %c0_113 = arith.constant 0 : index
    %c0_114 = arith.constant 0 : index
    %c0_115 = arith.constant 0 : index
    %c0_116 = arith.constant 0 : index
    %100 = vector.load %arg7[%c0_113, %c0_114, %c0_115, %c0_116] : memref<2x8x8x128xbf16, #tpu.memory_space<vmem>>, vector<2x8x8x128xbf16>
    tpu.vector_store %arg7[%c0_113, %c0_114, %c0_115, %c0_116], %99 {strides = array<i32>} : memref<2x8x8x128xbf16, #tpu.memory_space<vmem>>, vector<2x8x8x128xbf16>,
    return
  }
}

module attributes {stable_mosaic.version = 11 : i64} {
  func.func @_tail_downsample_kernel(%arg0: memref<2x10x10x128xbf16, #tpu.memory_space<vmem>>, %arg1: memref<2x8x8x128xbf16, #tpu.memory_space<vmem>>, %arg2: memref<9x128x128xbf16, #tpu.memory_space<vmem>>, %arg3: memref<1x128xf32, #tpu.memory_space<vmem>>, %arg4: memref<1x128xf32, #tpu.memory_space<vmem>>, %arg5: memref<1x128x128xbf16, #tpu.memory_space<vmem>>, %arg6: memref<1x128xf32, #tpu.memory_space<vmem>>, %arg7: memref<1x128xf32, #tpu.memory_space<vmem>>, %arg8: memref<2x8x8x128xf32, #tpu.memory_space<vmem>>, %arg9: memref<128x128xf32, #tpu.memory_space<vmem>>, %arg10: memref<128x128xf32, #tpu.memory_space<vmem>>) attributes {dimension_semantics = [], scalar_prefetch = 0 : i64, scratch_operands = 2 : i64, tpu.core_type = #tpu.core_type<tc>} {
    %cst = arith.constant 0.000000e+00 : f32
    %0 = vector.broadcast %cst : f32 to vector<128x128xf32>
    %c0 = arith.constant 0 : index
    %c0_0 = arith.constant 0 : index
    %1 = vector.load %arg9[%c0, %c0_0] : memref<128x128xf32, #tpu.memory_space<vmem>>, vector<128x128xf32>
    tpu.vector_store %arg9[%c0, %c0_0], %0 {strides = array<i32>} : memref<128x128xf32, #tpu.memory_space<vmem>>, vector<128x128xf32>,
    %c0_1 = arith.constant 0 : index
    %c0_2 = arith.constant 0 : index
    %c0_3 = arith.constant 0 : index
    %c0_4 = arith.constant 0 : index
    %2 = vector.load %arg0[%c0_1, %c0_2, %c0_3, %c0_4] : memref<2x10x10x128xbf16, #tpu.memory_space<vmem>>, vector<2x8x8x128xbf16>
    %3 = vector.shape_cast %2 : vector<2x8x8x128xbf16> to vector<128x128xbf16>
    %c0_5 = arith.constant 0 : index
    %c0_6 = arith.constant 0 : index
    %4 = vector.load %arg9[%c0_5, %c0_6] : memref<128x128xf32, #tpu.memory_space<vmem>>, vector<128x128xf32>
    %c0_7 = arith.constant 0 : index
    %c0_8 = arith.constant 0 : index
    %c0_9 = arith.constant 0 : index
    %5 = vector.load %arg2[%c0_7, %c0_8, %c0_9] : memref<9x128x128xbf16, #tpu.memory_space<vmem>>, vector<1x128x128xbf16>
    %6 = vector.shape_cast %5 : vector<1x128x128xbf16> to vector<128x128xbf16>
    %cst_10 = arith.constant dense<0.000000e+00> : vector<128x128xf32>
    %7 = tpu.matmul %3, %6, %cst_10 {dimension_numbers = #tpu.dot_dimension_numbers<[1], [0], [0], [1], [0, 0, 1, 1], [], []>} : vector<128x128xbf16>, vector<128x128xbf16>, vector<128x128xf32> -> vector<128x128xf32>
    %8 = arith.addf %4, %7 : vector<128x128xf32>
    %c0_11 = arith.constant 0 : index
    %c0_12 = arith.constant 0 : index
    %9 = vector.load %arg9[%c0_11, %c0_12] : memref<128x128xf32, #tpu.memory_space<vmem>>, vector<128x128xf32>
    tpu.vector_store %arg9[%c0_11, %c0_12], %8 {strides = array<i32>} : memref<128x128xf32, #tpu.memory_space<vmem>>, vector<128x128xf32>,
    %c0_13 = arith.constant 0 : index
    %c0_14 = arith.constant 0 : index
    %c1 = arith.constant 1 : index
    %c0_15 = arith.constant 0 : index
    %10 = vector.load %arg0[%c0_13, %c0_14, %c1, %c0_15] : memref<2x10x10x128xbf16, #tpu.memory_space<vmem>>, vector<2x8x8x128xbf16>
    %11 = vector.shape_cast %10 : vector<2x8x8x128xbf16> to vector<128x128xbf16>
    %c0_16 = arith.constant 0 : index
    %c0_17 = arith.constant 0 : index
    %12 = vector.load %arg9[%c0_16, %c0_17] : memref<128x128xf32, #tpu.memory_space<vmem>>, vector<128x128xf32>
    %c1_18 = arith.constant 1 : index
    %c0_19 = arith.constant 0 : index
    %c0_20 = arith.constant 0 : index
    %13 = vector.load %arg2[%c1_18, %c0_19, %c0_20] : memref<9x128x128xbf16, #tpu.memory_space<vmem>>, vector<1x128x128xbf16>
    %14 = vector.shape_cast %13 : vector<1x128x128xbf16> to vector<128x128xbf16>
    %cst_21 = arith.constant dense<0.000000e+00> : vector<128x128xf32>
    %15 = tpu.matmul %11, %14, %cst_21 {dimension_numbers = #tpu.dot_dimension_numbers<[1], [0], [0], [1], [0, 0, 1, 1], [], []>} : vector<128x128xbf16>, vector<128x128xbf16>, vector<128x128xf32> -> vector<128x128xf32>
    %16 = arith.addf %12, %15 : vector<128x128xf32>
    %c0_22 = arith.constant 0 : index
    %c0_23 = arith.constant 0 : index
    %17 = vector.load %arg9[%c0_22, %c0_23] : memref<128x128xf32, #tpu.memory_space<vmem>>, vector<128x128xf32>
    tpu.vector_store %arg9[%c0_22, %c0_23], %16 {strides = array<i32>} : memref<128x128xf32, #tpu.memory_space<vmem>>, vector<128x128xf32>,
    %c0_24 = arith.constant 0 : index
    %c0_25 = arith.constant 0 : index
    %c2 = arith.constant 2 : index
    %c0_26 = arith.constant 0 : index
    %18 = vector.load %arg0[%c0_24, %c0_25, %c2, %c0_26] : memref<2x10x10x128xbf16, #tpu.memory_space<vmem>>, vector<2x8x8x128xbf16>
    %19 = vector.shape_cast %18 : vector<2x8x8x128xbf16> to vector<128x128xbf16>
    %c0_27 = arith.constant 0 : index
    %c0_28 = arith.constant 0 : index
    %20 = vector.load %arg9[%c0_27, %c0_28] : memref<128x128xf32, #tpu.memory_space<vmem>>, vector<128x128xf32>
    %c2_29 = arith.constant 2 : index
    %c0_30 = arith.constant 0 : index
    %c0_31 = arith.constant 0 : index
    %21 = vector.load %arg2[%c2_29, %c0_30, %c0_31] : memref<9x128x128xbf16, #tpu.memory_space<vmem>>, vector<1x128x128xbf16>
    %22 = vector.shape_cast %21 : vector<1x128x128xbf16> to vector<128x128xbf16>
    %cst_32 = arith.constant dense<0.000000e+00> : vector<128x128xf32>
    %23 = tpu.matmul %19, %22, %cst_32 {dimension_numbers = #tpu.dot_dimension_numbers<[1], [0], [0], [1], [0, 0, 1, 1], [], []>} : vector<128x128xbf16>, vector<128x128xbf16>, vector<128x128xf32> -> vector<128x128xf32>
    %24 = arith.addf %20, %23 : vector<128x128xf32>
    %c0_33 = arith.constant 0 : index
    %c0_34 = arith.constant 0 : index
    %25 = vector.load %arg9[%c0_33, %c0_34] : memref<128x128xf32, #tpu.memory_space<vmem>>, vector<128x128xf32>
    tpu.vector_store %arg9[%c0_33, %c0_34], %24 {strides = array<i32>} : memref<128x128xf32, #tpu.memory_space<vmem>>, vector<128x128xf32>,
    %c0_35 = arith.constant 0 : index
    %c1_36 = arith.constant 1 : index
    %c0_37 = arith.constant 0 : index
    %c0_38 = arith.constant 0 : index
    %26 = vector.load %arg0[%c0_35, %c1_36, %c0_37, %c0_38] : memref<2x10x10x128xbf16, #tpu.memory_space<vmem>>, vector<2x8x8x128xbf16>
    %27 = vector.shape_cast %26 : vector<2x8x8x128xbf16> to vector<128x128xbf16>
    %c0_39 = arith.constant 0 : index
    %c0_40 = arith.constant 0 : index
    %28 = vector.load %arg9[%c0_39, %c0_40] : memref<128x128xf32, #tpu.memory_space<vmem>>, vector<128x128xf32>
    %c3 = arith.constant 3 : index
    %c0_41 = arith.constant 0 : index
    %c0_42 = arith.constant 0 : index
    %29 = vector.load %arg2[%c3, %c0_41, %c0_42] : memref<9x128x128xbf16, #tpu.memory_space<vmem>>, vector<1x128x128xbf16>
    %30 = vector.shape_cast %29 : vector<1x128x128xbf16> to vector<128x128xbf16>
    %cst_43 = arith.constant dense<0.000000e+00> : vector<128x128xf32>
    %31 = tpu.matmul %27, %30, %cst_43 {dimension_numbers = #tpu.dot_dimension_numbers<[1], [0], [0], [1], [0, 0, 1, 1], [], []>} : vector<128x128xbf16>, vector<128x128xbf16>, vector<128x128xf32> -> vector<128x128xf32>
    %32 = arith.addf %28, %31 : vector<128x128xf32>
    %c0_44 = arith.constant 0 : index
    %c0_45 = arith.constant 0 : index
    %33 = vector.load %arg9[%c0_44, %c0_45] : memref<128x128xf32, #tpu.memory_space<vmem>>, vector<128x128xf32>
    tpu.vector_store %arg9[%c0_44, %c0_45], %32 {strides = array<i32>} : memref<128x128xf32, #tpu.memory_space<vmem>>, vector<128x128xf32>,
    %c0_46 = arith.constant 0 : index
    %c1_47 = arith.constant 1 : index
    %c1_48 = arith.constant 1 : index
    %c0_49 = arith.constant 0 : index
    %34 = vector.load %arg0[%c0_46, %c1_47, %c1_48, %c0_49] : memref<2x10x10x128xbf16, #tpu.memory_space<vmem>>, vector<2x8x8x128xbf16>
    %35 = vector.shape_cast %34 : vector<2x8x8x128xbf16> to vector<128x128xbf16>
    %c0_50 = arith.constant 0 : index
    %c0_51 = arith.constant 0 : index
    %36 = vector.load %arg9[%c0_50, %c0_51] : memref<128x128xf32, #tpu.memory_space<vmem>>, vector<128x128xf32>
    %c4 = arith.constant 4 : index
    %c0_52 = arith.constant 0 : index
    %c0_53 = arith.constant 0 : index
    %37 = vector.load %arg2[%c4, %c0_52, %c0_53] : memref<9x128x128xbf16, #tpu.memory_space<vmem>>, vector<1x128x128xbf16>
    %38 = vector.shape_cast %37 : vector<1x128x128xbf16> to vector<128x128xbf16>
    %cst_54 = arith.constant dense<0.000000e+00> : vector<128x128xf32>
    %39 = tpu.matmul %35, %38, %cst_54 {dimension_numbers = #tpu.dot_dimension_numbers<[1], [0], [0], [1], [0, 0, 1, 1], [], []>} : vector<128x128xbf16>, vector<128x128xbf16>, vector<128x128xf32> -> vector<128x128xf32>
    %40 = arith.addf %36, %39 : vector<128x128xf32>
    %c0_55 = arith.constant 0 : index
    %c0_56 = arith.constant 0 : index
    %41 = vector.load %arg9[%c0_55, %c0_56] : memref<128x128xf32, #tpu.memory_space<vmem>>, vector<128x128xf32>
    tpu.vector_store %arg9[%c0_55, %c0_56], %40 {strides = array<i32>} : memref<128x128xf32, #tpu.memory_space<vmem>>, vector<128x128xf32>,
    %c0_57 = arith.constant 0 : index
    %c1_58 = arith.constant 1 : index
    %c2_59 = arith.constant 2 : index
    %c0_60 = arith.constant 0 : index
    %42 = vector.load %arg0[%c0_57, %c1_58, %c2_59, %c0_60] : memref<2x10x10x128xbf16, #tpu.memory_space<vmem>>, vector<2x8x8x128xbf16>
    %43 = vector.shape_cast %42 : vector<2x8x8x128xbf16> to vector<128x128xbf16>
    %c0_61 = arith.constant 0 : index
    %c0_62 = arith.constant 0 : index
    %44 = vector.load %arg9[%c0_61, %c0_62] : memref<128x128xf32, #tpu.memory_space<vmem>>, vector<128x128xf32>
    %c5 = arith.constant 5 : index
    %c0_63 = arith.constant 0 : index
    %c0_64 = arith.constant 0 : index
    %45 = vector.load %arg2[%c5, %c0_63, %c0_64] : memref<9x128x128xbf16, #tpu.memory_space<vmem>>, vector<1x128x128xbf16>
    %46 = vector.shape_cast %45 : vector<1x128x128xbf16> to vector<128x128xbf16>
    %cst_65 = arith.constant dense<0.000000e+00> : vector<128x128xf32>
    %47 = tpu.matmul %43, %46, %cst_65 {dimension_numbers = #tpu.dot_dimension_numbers<[1], [0], [0], [1], [0, 0, 1, 1], [], []>} : vector<128x128xbf16>, vector<128x128xbf16>, vector<128x128xf32> -> vector<128x128xf32>
    %48 = arith.addf %44, %47 : vector<128x128xf32>
    %c0_66 = arith.constant 0 : index
    %c0_67 = arith.constant 0 : index
    %49 = vector.load %arg9[%c0_66, %c0_67] : memref<128x128xf32, #tpu.memory_space<vmem>>, vector<128x128xf32>
    tpu.vector_store %arg9[%c0_66, %c0_67], %48 {strides = array<i32>} : memref<128x128xf32, #tpu.memory_space<vmem>>, vector<128x128xf32>,
    %c0_68 = arith.constant 0 : index
    %c2_69 = arith.constant 2 : index
    %c0_70 = arith.constant 0 : index
    %c0_71 = arith.constant 0 : index
    %50 = vector.load %arg0[%c0_68, %c2_69, %c0_70, %c0_71] : memref<2x10x10x128xbf16, #tpu.memory_space<vmem>>, vector<2x8x8x128xbf16>
    %51 = vector.shape_cast %50 : vector<2x8x8x128xbf16> to vector<128x128xbf16>
    %c0_72 = arith.constant 0 : index
    %c0_73 = arith.constant 0 : index
    %52 = vector.load %arg9[%c0_72, %c0_73] : memref<128x128xf32, #tpu.memory_space<vmem>>, vector<128x128xf32>
    %c6 = arith.constant 6 : index
    %c0_74 = arith.constant 0 : index
    %c0_75 = arith.constant 0 : index
    %53 = vector.load %arg2[%c6, %c0_74, %c0_75] : memref<9x128x128xbf16, #tpu.memory_space<vmem>>, vector<1x128x128xbf16>
    %54 = vector.shape_cast %53 : vector<1x128x128xbf16> to vector<128x128xbf16>
    %cst_76 = arith.constant dense<0.000000e+00> : vector<128x128xf32>
    %55 = tpu.matmul %51, %54, %cst_76 {dimension_numbers = #tpu.dot_dimension_numbers<[1], [0], [0], [1], [0, 0, 1, 1], [], []>} : vector<128x128xbf16>, vector<128x128xbf16>, vector<128x128xf32> -> vector<128x128xf32>
    %56 = arith.addf %52, %55 : vector<128x128xf32>
    %c0_77 = arith.constant 0 : index
    %c0_78 = arith.constant 0 : index
    %57 = vector.load %arg9[%c0_77, %c0_78] : memref<128x128xf32, #tpu.memory_space<vmem>>, vector<128x128xf32>
    tpu.vector_store %arg9[%c0_77, %c0_78], %56 {strides = array<i32>} : memref<128x128xf32, #tpu.memory_space<vmem>>, vector<128x128xf32>,
    %c0_79 = arith.constant 0 : index
    %c2_80 = arith.constant 2 : index
    %c1_81 = arith.constant 1 : index
    %c0_82 = arith.constant 0 : index
    %58 = vector.load %arg0[%c0_79, %c2_80, %c1_81, %c0_82] : memref<2x10x10x128xbf16, #tpu.memory_space<vmem>>, vector<2x8x8x128xbf16>
    %59 = vector.shape_cast %58 : vector<2x8x8x128xbf16> to vector<128x128xbf16>
    %c0_83 = arith.constant 0 : index
    %c0_84 = arith.constant 0 : index
    %60 = vector.load %arg9[%c0_83, %c0_84] : memref<128x128xf32, #tpu.memory_space<vmem>>, vector<128x128xf32>
    %c7 = arith.constant 7 : index
    %c0_85 = arith.constant 0 : index
    %c0_86 = arith.constant 0 : index
    %61 = vector.load %arg2[%c7, %c0_85, %c0_86] : memref<9x128x128xbf16, #tpu.memory_space<vmem>>, vector<1x128x128xbf16>
    %62 = vector.shape_cast %61 : vector<1x128x128xbf16> to vector<128x128xbf16>
    %cst_87 = arith.constant dense<0.000000e+00> : vector<128x128xf32>
    %63 = tpu.matmul %59, %62, %cst_87 {dimension_numbers = #tpu.dot_dimension_numbers<[1], [0], [0], [1], [0, 0, 1, 1], [], []>} : vector<128x128xbf16>, vector<128x128xbf16>, vector<128x128xf32> -> vector<128x128xf32>
    %64 = arith.addf %60, %63 : vector<128x128xf32>
    %c0_88 = arith.constant 0 : index
    %c0_89 = arith.constant 0 : index
    %65 = vector.load %arg9[%c0_88, %c0_89] : memref<128x128xf32, #tpu.memory_space<vmem>>, vector<128x128xf32>
    tpu.vector_store %arg9[%c0_88, %c0_89], %64 {strides = array<i32>} : memref<128x128xf32, #tpu.memory_space<vmem>>, vector<128x128xf32>,
    %c0_90 = arith.constant 0 : index
    %c2_91 = arith.constant 2 : index
    %c2_92 = arith.constant 2 : index
    %c0_93 = arith.constant 0 : index
    %66 = vector.load %arg0[%c0_90, %c2_91, %c2_92, %c0_93] : memref<2x10x10x128xbf16, #tpu.memory_space<vmem>>, vector<2x8x8x128xbf16>
    %67 = vector.shape_cast %66 : vector<2x8x8x128xbf16> to vector<128x128xbf16>
    %c0_94 = arith.constant 0 : index
    %c0_95 = arith.constant 0 : index
    %68 = vector.load %arg9[%c0_94, %c0_95] : memref<128x128xf32, #tpu.memory_space<vmem>>, vector<128x128xf32>
    %c8 = arith.constant 8 : index
    %c0_96 = arith.constant 0 : index
    %c0_97 = arith.constant 0 : index
    %69 = vector.load %arg2[%c8, %c0_96, %c0_97] : memref<9x128x128xbf16, #tpu.memory_space<vmem>>, vector<1x128x128xbf16>
    %70 = vector.shape_cast %69 : vector<1x128x128xbf16> to vector<128x128xbf16>
    %cst_98 = arith.constant dense<0.000000e+00> : vector<128x128xf32>
    %71 = tpu.matmul %67, %70, %cst_98 {dimension_numbers = #tpu.dot_dimension_numbers<[1], [0], [0], [1], [0, 0, 1, 1], [], []>} : vector<128x128xbf16>, vector<128x128xbf16>, vector<128x128xf32> -> vector<128x128xf32>
    %72 = arith.addf %68, %71 : vector<128x128xf32>
    %c0_99 = arith.constant 0 : index
    %c0_100 = arith.constant 0 : index
    %73 = vector.load %arg9[%c0_99, %c0_100] : memref<128x128xf32, #tpu.memory_space<vmem>>, vector<128x128xf32>
    tpu.vector_store %arg9[%c0_99, %c0_100], %72 {strides = array<i32>} : memref<128x128xf32, #tpu.memory_space<vmem>>, vector<128x128xf32>,
    %c0_101 = arith.constant 0 : index
    %c0_102 = arith.constant 0 : index
    %c0_103 = arith.constant 0 : index
    %c0_104 = arith.constant 0 : index
    %74 = vector.load %arg1[%c0_101, %c0_102, %c0_103, %c0_104] : memref<2x8x8x128xbf16, #tpu.memory_space<vmem>>, vector<2x8x8x128xbf16>
    %75 = vector.shape_cast %74 : vector<2x8x8x128xbf16> to vector<128x128xbf16>
    %c0_105 = arith.constant 0 : index
    %c0_106 = arith.constant 0 : index
    %c0_107 = arith.constant 0 : index
    %76 = vector.load %arg5[%c0_105, %c0_106, %c0_107] : memref<1x128x128xbf16, #tpu.memory_space<vmem>>, vector<1x128x128xbf16>
    %77 = vector.shape_cast %76 : vector<1x128x128xbf16> to vector<128x128xbf16>
    %cst_108 = arith.constant dense<0.000000e+00> : vector<128x128xf32>
    %78 = tpu.matmul %75, %77, %cst_108 {dimension_numbers = #tpu.dot_dimension_numbers<[1], [0], [0], [1], [0, 0, 1, 1], [], []>} : vector<128x128xbf16>, vector<128x128xbf16>, vector<128x128xf32> -> vector<128x128xf32>
    %c0_109 = arith.constant 0 : index
    %c0_110 = arith.constant 0 : index
    %79 = vector.load %arg10[%c0_109, %c0_110] : memref<128x128xf32, #tpu.memory_space<vmem>>, vector<128x128xf32>
    tpu.vector_store %arg10[%c0_109, %c0_110], %78 {strides = array<i32>} : memref<128x128xf32, #tpu.memory_space<vmem>>, vector<128x128xf32>,
    %c0_111 = arith.constant 0 : index
    %c0_112 = arith.constant 0 : index
    %80 = vector.load %arg9[%c0_111, %c0_112] : memref<128x128xf32, #tpu.memory_space<vmem>>, vector<128x128xf32>
    %c0_113 = arith.constant 0 : index
    %c0_114 = arith.constant 0 : index
    %81 = vector.load %arg3[%c0_113, %c0_114] : memref<1x128xf32, #tpu.memory_space<vmem>>, vector<1x128xf32>
    %c0_115 = arith.constant 0 : index
    %c0_116 = arith.constant 0 : index
    %82 = vector.load %arg4[%c0_115, %c0_116] : memref<1x128xf32, #tpu.memory_space<vmem>>, vector<1x128xf32>
    %cst_117 = arith.constant dense<0.000000e+00> : vector<128xf32>
    %83 = vector.multi_reduction <add>, %80, %cst_117 [0] : vector<128x128xf32> to vector<128xf32>
    %84 = vector.shape_cast %83 : vector<128xf32> to vector<1x128xf32>
    %cst_118 = arith.constant 7.812500e-03 : f32
    %85 = vector.broadcast %cst_118 : f32 to vector<1x128xf32>
    %86 = arith.mulf %84, %85 : vector<1x128xf32>
    %87 = vector.broadcast %86 : vector<1x128xf32> to vector<128x128xf32>
    %88 = arith.subf %80, %87 : vector<128x128xf32>
    %89 = arith.mulf %88, %88 : vector<128x128xf32>
    %cst_119 = arith.constant dense<0.000000e+00> : vector<128xf32>
    %90 = vector.multi_reduction <add>, %89, %cst_119 [0] : vector<128x128xf32> to vector<128xf32>
    %91 = vector.shape_cast %90 : vector<128xf32> to vector<1x128xf32>
    %cst_120 = arith.constant 7.812500e-03 : f32
    %92 = vector.broadcast %cst_120 : f32 to vector<1x128xf32>
    %93 = arith.mulf %91, %92 : vector<1x128xf32>
    %cst_121 = arith.constant 9.99999974E-6 : f32
    %94 = vector.broadcast %cst_121 : f32 to vector<1x128xf32>
    %95 = arith.addf %93, %94 : vector<1x128xf32>
    %96 = math.rsqrt %95 : vector<1x128xf32>
    %97 = arith.mulf %81, %96 : vector<1x128xf32>
    %98 = vector.broadcast %97 : vector<1x128xf32> to vector<128x128xf32>
    %99 = arith.mulf %88, %98 : vector<128x128xf32>
    %100 = vector.broadcast %82 : vector<1x128xf32> to vector<128x128xf32>
    %101 = arith.addf %99, %100 : vector<128x128xf32>
    %c0_122 = arith.constant 0 : index
    %c0_123 = arith.constant 0 : index
    %102 = vector.load %arg10[%c0_122, %c0_123] : memref<128x128xf32, #tpu.memory_space<vmem>>, vector<128x128xf32>
    %c0_124 = arith.constant 0 : index
    %c0_125 = arith.constant 0 : index
    %103 = vector.load %arg6[%c0_124, %c0_125] : memref<1x128xf32, #tpu.memory_space<vmem>>, vector<1x128xf32>
    %c0_126 = arith.constant 0 : index
    %c0_127 = arith.constant 0 : index
    %104 = vector.load %arg7[%c0_126, %c0_127] : memref<1x128xf32, #tpu.memory_space<vmem>>, vector<1x128xf32>
    %cst_128 = arith.constant dense<0.000000e+00> : vector<128xf32>
    %105 = vector.multi_reduction <add>, %102, %cst_128 [0] : vector<128x128xf32> to vector<128xf32>
    %106 = vector.shape_cast %105 : vector<128xf32> to vector<1x128xf32>
    %cst_129 = arith.constant 7.812500e-03 : f32
    %107 = vector.broadcast %cst_129 : f32 to vector<1x128xf32>
    %108 = arith.mulf %106, %107 : vector<1x128xf32>
    %109 = vector.broadcast %108 : vector<1x128xf32> to vector<128x128xf32>
    %110 = arith.subf %102, %109 : vector<128x128xf32>
    %111 = arith.mulf %110, %110 : vector<128x128xf32>
    %cst_130 = arith.constant dense<0.000000e+00> : vector<128xf32>
    %112 = vector.multi_reduction <add>, %111, %cst_130 [0] : vector<128x128xf32> to vector<128xf32>
    %113 = vector.shape_cast %112 : vector<128xf32> to vector<1x128xf32>
    %cst_131 = arith.constant 7.812500e-03 : f32
    %114 = vector.broadcast %cst_131 : f32 to vector<1x128xf32>
    %115 = arith.mulf %113, %114 : vector<1x128xf32>
    %cst_132 = arith.constant 9.99999974E-6 : f32
    %116 = vector.broadcast %cst_132 : f32 to vector<1x128xf32>
    %117 = arith.addf %115, %116 : vector<1x128xf32>
    %118 = math.rsqrt %117 : vector<1x128xf32>
    %119 = arith.mulf %103, %118 : vector<1x128xf32>
    %120 = vector.broadcast %119 : vector<1x128xf32> to vector<128x128xf32>
    %121 = arith.mulf %110, %120 : vector<128x128xf32>
    %122 = vector.broadcast %104 : vector<1x128xf32> to vector<128x128xf32>
    %123 = arith.addf %121, %122 : vector<128x128xf32>
    %124 = arith.addf %101, %123 : vector<128x128xf32>
    %cst_133 = arith.constant 0.000000e+00 : f32
    %125 = vector.broadcast %cst_133 : f32 to vector<128x128xf32>
    %126 = arith.maximumf %124, %125 : vector<128x128xf32>
    %127 = vector.shape_cast %126 : vector<128x128xf32> to vector<2x8x8x128xf32>
    %c0_134 = arith.constant 0 : index
    %c0_135 = arith.constant 0 : index
    %c0_136 = arith.constant 0 : index
    %c0_137 = arith.constant 0 : index
    %128 = vector.load %arg8[%c0_134, %c0_135, %c0_136, %c0_137] : memref<2x8x8x128xf32, #tpu.memory_space<vmem>>, vector<2x8x8x128xf32>
    tpu.vector_store %arg8[%c0_134, %c0_135, %c0_136, %c0_137], %127 {strides = array<i32>} : memref<2x8x8x128xf32, #tpu.memory_space<vmem>>, vector<2x8x8x128xf32>,
    return
  }
}

</mosaic_0001>

<bundles_post_ra>
// kernel: basic_block_forward.2
= control target key start
LH: loop header
LB: loop body
LE: loop exit
PB: predicated region body
PF: predicated region fallthrough
CT: control target
= control target key end

     0   :  { %vm525_vm0 = vsmask.f32 3328  ;;  %vm526_vm1 = vsmask.f32 7440  ;;  %s4993_s4 = inlined_call_operand.vmem [shape: bf16[9,128,128], index: 4, kind: input, shape index: {}]   ;;  %s4994_s0 = inlined_call_operand.vmem [shape: bf16[2,9,9,128], index: 0, kind: input, shape index: {}]   ;;  %s4995_s1 = inlined_call_operand.vmem [shape: bf16[2,9,9,128], index: 1, kind: input, shape index: {}]   ;;  %s4996_s2 = inlined_call_operand.vmem [shape: bf16[2,9,9,128], index: 2, kind: input, shape index: {}]   ;;  %s4997_s3 = inlined_call_operand.vmem [shape: bf16[2,9,9,128], index: 3, kind: input, shape index: {}]   ;;  %s4998_s6 = inlined_call_operand.vmem [shape: f32[1,128], index: 6, kind: input, shape index: {}]   ;;  %s4999_s5 = inlined_call_operand.vmem [shape: f32[1,128], index: 5, kind: input, shape index: {}]   ;;  %s5000_s7 = inlined_call_operand.vmem [shape: bf16[2,8,8,128], index: 7, kind: output, shape index: {}]  }
   0x1   :  { %v3635_v0 = vld [vmem:[%s4993_s4 + $0x38] sm:$0xff]  ;;  %v3634_v1 = vld [vmem:[%s4993_s4 + $0x30] sm:$0xff]  ;;  %v3633_v2 = vld [vmem:[%s4993_s4 + $0x28] sm:$0xff] }
   0x2   :  { %3787 = vmatpush.bf16.msra.mxu1 %v3635_v0  ;;  %3788 = vmatpush.bf16.msra.mxu2 %v3635_v0  ;;  %v3632_v3 = vld [vmem:[%s4993_s4 + $0x20] sm:$0xff]  ;;  %v3631_v4 = vld [vmem:[%s4993_s4 + $0x18] sm:$0xff]  ;;  %v3630_v5 = vld [vmem:[%s4993_s4 + $0x10] sm:$0xff] }
   0x3   :  { %3789 = vmatpush.bf16.msra.mxu3 %v3635_v0  ;;  %186 = vmatpush.bf16.msra.mxu0 %v3635_v0  ;;  %v3629_v6 = vld [vmem:[%s4993_s4 + $0x8] sm:$0xff]  ;;  %v3628_v7 = vld [vmem:[%s4993_s4] sm:$0xff]  ;;  %v3624_v11 = vld [vmem:[%s4994_s0 + $0x4c] sm:$0xf0] }
   0x4   :  { %v2958_v8 = vld [vmem:[%s4994_s0 + $0x20] sm:$0xf]  ;;  %v3622_v9 = vld [vmem:[%s4994_s0 + $0x24] sm:$0xf0]  ;;  %v3626_v13 = vld [vmem:[%s4994_s0 + $0x6c] sm:$0xf0] }
   0x5   :  { %v2966_v10 = vld [vmem:[%s4994_s0 + $0x48] sm:$0xf]  ;;  %v2950_v14 = vld [vmem:[%s4994_s0] sm:$0xf]  ;;  %v3659_v16 = vld [vmem:[%s4993_s4 + $0xb8] sm:$0xff]  ;;  %v2959_v18 = vor.u32 %v3622_v9, %v2958_v8 }
   0x6   :  { %3790 = vmatpush.bf16.msra.mxu1 %v3634_v1  ;;  %3791 = vmatpush.bf16.msra.mxu2 %v3634_v1  ;;  %v2974_v12 = vld [vmem:[%s4994_s0 + $0x68] sm:$0xf]  ;;  %v3651_v17 = vld [vmem:[%s4993_s4 + $0x78] sm:$0xff]  ;;  %v2967_v19 = vor.u32 %v3624_v11, %v2966_v10  ;;  %v3658_v24 = vld [vmem:[%s4993_s4 + $0xb0] sm:$0xff] }
   0x7   :  { %3792 = vmatpush.bf16.msra.mxu3 %v3634_v1  ;;  %187 = vmatpush.bf16.msra.mxu0 %v3634_v1  ;;  %v3620_v15 = vld [vmem:[%s4994_s0 + $0x4] sm:$0xf0]  ;;  %v2975_v20 = vor.u32 %v3626_v13, %v2974_v12  ;;  %v3675_v22 = vld [vmem:[%s4993_s4 + $0xf8] sm:$0xff]  ;;  %v3650_v25 = vld [vmem:[%s4993_s4 + $0x70] sm:$0xff] }
   0x8   :  { %v2951_v21 = vor.u32 %v3620_v15, %v2950_v14  ;;  %v3691_v23 = vld [vmem:[%s4993_s4 + $0x138] sm:$0xff]  ;;  %v493_v26 = vld [vmem:[%s4994_s0] sm:$0xf]  ;;  %v495_v27 = vld [vmem:[%s4994_s0 + $0x8] sm:$0xf] }
   0x9   :  { %v3674_v28 = vld [vmem:[%s4993_s4 + $0xf0] sm:$0xff]  ;;  %v3657_v30 = vld [vmem:[%s4993_s4 + $0xa8] sm:$0xff]  ;;  %v529_v32 = vshrl.u32 %v493_v26, 16  ;;  %v532_v33 = vshll.u32 %v493_v26, 16  ;;  %v543_v34 = vshrl.u32 %v495_v27, 16  ;;  %v546_v35 = vshll.u32 %v495_v27, 16  ;;  %vm4008_vm2 = vmor %vm525_vm0, %vm526_vm1 }
   0xa   :  { %3793 = vmatpush.bf16.msra.mxu1 %v3633_v2  ;;  %3794 = vmatpush.bf16.msra.mxu2 %v3633_v2  ;;  %v3690_v29 = vld [vmem:[%s4993_s4 + $0x130] sm:$0xff]  ;;  %v3649_v31 = vld [vmem:[%s4993_s4 + $0x68] sm:$0xff]  ;;  %v3656_v38 = vld [vmem:[%s4993_s4 + $0xa0] sm:$0xff] }
   0xb   :  { %3795 = vmatpush.bf16.msra.mxu3 %v3633_v2  ;;  %188 = vmatpush.bf16.msra.mxu0 %v3633_v2  ;;  %v3673_v36 = vld [vmem:[%s4993_s4 + $0xe8] sm:$0xff]  ;;  %v3648_v39 = vld [vmem:[%s4993_s4 + $0x60] sm:$0xff]  ;;  %v2962_v40 = vld [vmem:[%s4994_s0 + $0x30] sm:$0xf]  ;;  %v531_v46 = vrot.slane %v529_v32, 4  ;;  %v534_v47 = vrot.slane %v532_v33, 5 }
   0xc   :  { %v3689_v37 = vld [vmem:[%s4993_s4 + $0x128] sm:$0xff]  ;;  %v3623_v41 = vld [vmem:[%s4994_s0 + $0x34] sm:$0xf0]  ;;  %v3672_v43 = vld [vmem:[%s4993_s4 + $0xe0] sm:$0xff]  ;;  %v545_v48 = vrot.slane %v543_v34, 4  ;;  %v548_v49 = vrot.slane %v546_v35, 5 }
   0xd   :  { %v2970_v42 = vld [vmem:[%s4994_s0 + $0x58] sm:$0xf]  ;;  %v3688_v44 = vld [vmem:[%s4993_s4 + $0x120] sm:$0xff]  ;;  %v496_v52 = vld [vmem:[%s4994_s0 + $0xc] sm:$0x1]  ;;  %v2963_v56 = vor.u32 %v3623_v41, %v2962_v40  ;;  %v535_v60 = vor.u32 %v534_v47, %v531_v46 }
   0xe   :  { %3796 = vmatpush.bf16.msra.mxu1 %v3632_v3  ;;  %3797 = vmatpush.bf16.msra.mxu2 %v3632_v3  ;;  %v3625_v45 = vld [vmem:[%s4994_s0 + $0x5c] sm:$0xf0]  ;;  %v2978_v50 = vld [vmem:[%s4994_s0 + $0x78] sm:$0xf]  ;;  %v494_v51 = vld [vmem:[%s4994_s0 + $0x4] sm:$0x1]  ;;  %v549_v62 = vor.u32 %v548_v49, %v545_v48 }
   0xf   :  { %3798 = vmatpush.bf16.msra.mxu3 %v3632_v3  ;;  %189 = vmatpush.bf16.msra.mxu0 %v3632_v3  ;;  %v3627_v53 = vld [vmem:[%s4994_s0 + $0x7c] sm:$0xf0]  ;;  %v2954_v54 = vld [vmem:[%s4994_s0 + $0x10] sm:$0xf]  ;;  %v3621_v55 = vld [vmem:[%s4994_s0 + $0x14] sm:$0xf0]  ;;  %v2971_v57 = vor.u32 %v3625_v45, %v2970_v42 }
  0x10   :  { %v3655_v58 = vld [vmem:[%s4993_s4 + $0x98] sm:$0xff]  ;;  %v538_v61 = vshll.u32 %v494_v51, 16  ;;  %v552_v63 = vshll.u32 %v496_v52, 16  ;;  %v2979_v0 = vor.u32 %v3627_v53, %v2978_v50  ;;  %v2955_v1 = vor.u32 %v3621_v55, %v2954_v54  ;;  %v3670_v10 = vld [vmem:[%s4993_s4 + $0xd0] sm:$0xff]  ;;  %v3653_v15 = vld [vmem:[%s4993_s4 + $0x88] sm:$0xff] }
  0x11   :  { %v3647_v59 = vld [vmem:[%s4993_s4 + $0x58] sm:$0xff]  ;;  %v550_v8 = vrot.slane %v549_v62, 4  ;;  %v3686_v12 = vld [vmem:[%s4993_s4 + $0x110] sm:$0xff]  ;;  %v3644_v26 = vld [vmem:[%s4993_s4 + $0x40] sm:$0xff] }
  0x12   :  { %3799 = vmatpush.bf16.msra.mxu1 %v3631_v4  ;;  %3800 = vmatpush.bf16.msra.mxu2 %v3631_v4  ;;  %v3671_v2 = vld [vmem:[%s4993_s4 + $0xd8] sm:$0xff]  ;;  %v554_v9 = vrot.slane %v552_v63, 5  ;;  %v497_v13 = vld [vmem:[%s4994_s0 + $0x10] sm:$0xf]  ;;  %v3030_v27 = vld [vmem:[%s4995_s1] sm:$0xf] }
  0x13   :  { %3801 = vmatpush.bf16.msra.mxu3 %v3631_v4  ;;  %190 = vmatpush.bf16.msra.mxu0 %v3631_v4  ;;  %v3687_v3 = vld [vmem:[%s4993_s4 + $0x118] sm:$0xff]  ;;  %v3654_v4 = vld [vmem:[%s4993_s4 + $0x90] sm:$0xff]  ;;  %v3238_v35 = vld [vmem:[%s4997_s3] sm:$0xf] }
  0x14   :  { %v499_v14 = vld [vmem:[%s4994_s0 + $0x18] sm:$0xf]  ;;  %v3684_v42 = vld [vmem:[%s4993_s4 + $0x100] sm:$0xff]  ;;  %v3714_v55 = vld [vmem:[%s4993_s4 + $0x1b0] sm:$0xff] }
  0x15   :  { %v3715_v34 = vld [vmem:[%s4993_s4 + $0x1b8] sm:$0xff]  ;;  %v501_v63 = vld [vmem:[%s4994_s0 + $0x20] sm:$0xf] }
  0x16   :  { %3802 = vmatpush.bf16.msra.mxu1 %v3630_v5  ;;  %3803 = vmatpush.bf16.msra.mxu2 %v3630_v5  ;;  %v3731_v46 = vld [vmem:[%s4993_s4 + $0x1f8] sm:$0xff]  ;;  %v3506_v11 = vld [vmem:[%s4995_s1 + $0x80] sm:$0xf] }
  0x17   :  { %3804 = vmatpush.bf16.msra.mxu3 %v3630_v5  ;;  %191 = vmatpush.bf16.msra.mxu0 %v3630_v5  ;;  %v3646_v5 = vld [vmem:[%s4993_s4 + $0x50] sm:$0xff]  ;;  %v3739_v47 = vld [vmem:[%s4993_s4 + $0x238] sm:$0xff] }
  0x1a   :  { %3805 = vmatpush.bf16.msra.mxu1 %v3629_v6  ;;  %3806 = vmatpush.bf16.msra.mxu2 %v3629_v6 }
  0x1b   :  { %3807 = vmatpush.bf16.msra.mxu3 %v3629_v6  ;;  %192 = vmatpush.bf16.msra.mxu0 %v3629_v6  ;;  %v536_v6 = vrot.slane %v535_v60, 4 }
  0x1e   :  { %3808 = vmatpush.bf16.msra.mxu1 %v3628_v7  ;;  %3809 = vmatpush.bf16.msra.mxu2 %v3628_v7 }
  0x1f   :  { %3810 = vmatpush.bf16.msra.mxu3 %v3628_v7  ;;  %193 = vmatpush.bf16.msra.mxu0 %v3628_v7  ;;  %v540_v7 = vrot.slane %v538_v61, 5 }
  0x21   :  { %204 = vmatmul.bf16.vlgmr.msra.gmra.mxu1 %v2959_v18  ;;  %214 = vmatmul.bf16.vlgmr.msra.gmra.mxu2 %v2967_v19  ;;  %v555_v18 = vsel %vm4008_vm2, %v550_v8, %v554_v9  ;;  %v3669_v19 = vld [vmem:[%s4993_s4 + $0xc8] sm:$0xff] }
  0x22   :  { %865 = vmatpush.bf16.msrb.mxu2 %v3659_v16  ;;  %412 = vmatpush.bf16.msrb.mxu1 %v3651_v17  ;;  %v3645_v16 = vld [vmem:[%s4993_s4 + $0x48] sm:$0xff]  ;;  %v541_v17 = vsel %vm4008_vm2, %v536_v6, %v540_v7  ;;  %v786_v33 = vunpack.c.l.b16 %v555_v18  ;;  %v588_v6 = vshll.u32 %v501_v63, 16 }
  0x23   :  { %224 = vmatmul.bf16.vlgmr.msra.gmra.mxu3 %v2975_v20  ;;  %194 = vmatmul.bf16.vlgmr.msra.gmra.mxu0 %v2951_v21  ;;  %v3685_v20 = vld [vmem:[%s4993_s4 + $0x108] sm:$0xff]  ;;  %v557_v21 = vshrl.u32 %v497_v13, 16  ;;  %v785_v32 = vunpack.c.l.b16 %v541_v17 }
  0x24   :  { %1091 = vmatpush.bf16.msrb.mxu3 %v3675_v22  ;;  %1317 = vmatpush.bf16.msrb.mxu0 %v3691_v23  ;;  %v560_v22 = vshll.u32 %v497_v13, 16  ;;  %v571_v23 = vshrl.u32 %v499_v14, 16  ;;  %v3637_v13 = vld [vmem:[%s4995_s1 + $0x14] sm:$0xf0]  ;;  %v590_v18 = vrot.slane %v588_v6, 5 }
  0x25   :  { %v801_v48 = vpack.c.b16 %v786_v33, %v785_v32 }
  0x26   :  { %866 = vmatpush.bf16.msrb.mxu2 %v3658_v24  ;;  %413 = vmatpush.bf16.msrb.mxu1 %v3650_v25  ;;  %v574_v24 = vshll.u32 %v499_v14, 16  ;;  %v3652_v25 = vld [vmem:[%s4993_s4 + $0x80] sm:$0xff]  ;;  %v573_v40 = vrot.slane %v571_v23, 4  ;;  %v3677_v23 = vld [vmem:[%s4997_s3 + $0x14] sm:$0xf0] }
  0x28   :  { %1092 = vmatpush.bf16.msrb.mxu3 %v3674_v28  ;;  %1318 = vmatpush.bf16.msrb.mxu0 %v3690_v29  ;;  %v3636_v28 = vld [vmem:[%s4995_s1 + $0x4] sm:$0xf0]  ;;  %v3158_v29 = vld [vmem:[%s4996_s2] sm:$0xf]  ;;  %v576_v41 = vrot.slane %v574_v24, 5 }
  0x29   :  { %v3031_v45 = vor.u32 %v3636_v28, %v3030_v27  ;;  %v502_v24 = vld [vmem:[%s4994_s0 + $0x24] sm:$0x1] }
  0x2a   :  { %867 = vmatpush.bf16.msrb.mxu2 %v3657_v30  ;;  %414 = vmatpush.bf16.msrb.mxu1 %v3649_v31  ;;  %v3660_v30 = vld [vmem:[%s4996_s2 + $0x4] sm:$0xf0]  ;;  %v3668_v31 = vld [vmem:[%s4993_s4 + $0xc0] sm:$0xff]  ;;  %v577_v53 = vor.u32 %v576_v41, %v573_v40 }
  0x2b   :  { %v3159_v49 = vor.u32 %v3660_v30, %v3158_v29  ;;  %v3712_v40 = vld [vmem:[%s4993_s4 + $0x1a0] sm:$0xff] }
  0x2c   :  { %1093 = vmatpush.bf16.msrb.mxu3 %v3673_v36  ;;  %1319 = vmatpush.bf16.msrb.mxu0 %v3689_v37  ;;  %v3699_v36 = vld [vmem:[%s4993_s4 + $0x178] sm:$0xff]  ;;  %v3676_v37 = vld [vmem:[%s4997_s3 + $0x4] sm:$0xf0]  ;;  %v578_v61 = vrot.slane %v577_v53, 4  ;;  %v3728_v41 = vld [vmem:[%s4993_s4 + $0x1e0] sm:$0xff] }
  0x2d   :  { %v3239_v50 = vor.u32 %v3676_v37, %v3238_v35  ;;  %v505_v35 = vld [vmem:[%s4994_s0 + $0x30] sm:$0xf] }
  0x2e   :  { %868 = vmatpush.bf16.msrb.mxu2 %v3656_v38  ;;  %415 = vmatpush.bf16.msrb.mxu1 %v3648_v39  ;;  %v559_v38 = vrot.slane %v557_v21, 4  ;;  %v562_v39 = vrot.slane %v560_v22, 5 }
  0x30   :  { %1094 = vmatpush.bf16.msrb.mxu3 %v3672_v43  ;;  %1320 = vmatpush.bf16.msrb.mxu0 %v3688_v44  ;;  %v498_v43 = vld [vmem:[%s4994_s0 + $0x14] sm:$0x1]  ;;  %v500_v44 = vld [vmem:[%s4994_s0 + $0x1c] sm:$0x1]  ;;  %v563_v51 = vor.u32 %v562_v39, %v559_v38 }
  0x31   :  { %209 = vmatmul.bf16.gmra.mxu1 %v2963_v56  ;;  %219 = vmatmul.bf16.gmra.mxu2 %v2971_v57  ;;  %v566_v52 = vshll.u32 %v498_v43, 16  ;;  %v580_v54 = vshll.u32 %v500_v44, 16  ;;  %v3698_v56 = vld [vmem:[%s4993_s4 + $0x170] sm:$0xff]  ;;  %v3736_v43 = vld [vmem:[%s4993_s4 + $0x220] sm:$0xff]  ;;  %v613_v44 = vshrl.u32 %v505_v35, 16 }
  0x32   :  { %869 = vmatpush.bf16.msrb.mxu2 %v3655_v58  ;;  %416 = vmatpush.bf16.msrb.mxu1 %v3647_v59  ;;  %v3730_v57 = vld [vmem:[%s4993_s4 + $0x1f0] sm:$0xff]  ;;  %v564_v59 = vrot.slane %v563_v51, 4 }
  0x33   :  { %229 = vmatmul.bf16.gmra.mxu3 %v2979_v0  ;;  %199 = vmatmul.bf16.gmra.mxu0 %v2955_v1  ;;  %v3738_v58 = vld [vmem:[%s4993_s4 + $0x230] sm:$0xff]  ;;  %v568_v60 = vrot.slane %v566_v52, 5  ;;  %v582_v62 = vrot.slane %v580_v54, 5  ;;  %v503_v0 = vld [vmem:[%s4994_s0 + $0x28] sm:$0xf] }
  0x34   :  { %1095 = vmatpush.bf16.msrb.mxu3 %v3671_v2  ;;  %1321 = vmatpush.bf16.msrb.mxu0 %v3687_v3  ;;  %v3713_v1 = vld [vmem:[%s4993_s4 + $0x1a8] sm:$0xff]  ;;  %v599_v9 = vshrl.u32 %v503_v0, 16 }
  0x35   :  { %v3697_v2 = vld [vmem:[%s4993_s4 + $0x168] sm:$0xff]  ;;  %v569_v7 = vsel %vm4008_vm2, %v564_v59, %v568_v60  ;;  %v583_v8 = vsel %vm4008_vm2, %v578_v61, %v582_v62  ;;  %v3166_v60 = vld [vmem:[%s4996_s2 + $0x20] sm:$0xf] }
  0x36   :  { %870 = vmatpush.bf16.msrb.mxu2 %v3654_v4  ;;  %417 = vmatpush.bf16.msrb.mxu1 %v3646_v5  ;;  %v3729_v3 = vld [vmem:[%s4993_s4 + $0x1e8] sm:$0xff]  ;;  %v585_v5 = vshrl.u32 %v501_v63, 16  ;;  %v787_v14 = vunpack.c.l.b16 %v569_v7  ;;  %v601_v21 = vrot.slane %v599_v9, 4  ;;  %v3246_v62 = vld [vmem:[%s4997_s3 + $0x20] sm:$0xf] }
  0x37   :  { %v3737_v4 = vld [vmem:[%s4993_s4 + $0x228] sm:$0xff] }
  0x38   :  { %1096 = vmatpush.bf16.msrb.mxu3 %v3670_v10  ;;  %1322 = vmatpush.bf16.msrb.mxu0 %v3686_v12  ;;  %v602_v10 = vshll.u32 %v503_v0, 16  ;;  %v3034_v12 = vld [vmem:[%s4995_s1 + $0x10] sm:$0xf]  ;;  %v587_v17 = vrot.slane %v585_v5, 4  ;;  %v3638_v59 = vld [vmem:[%s4995_s1 + $0x24] sm:$0xf0] }
  0x39   :  { %v3662_v61 = vld [vmem:[%s4996_s2 + $0x24] sm:$0xf0] }
  0x3a   :  { %871 = vmatpush.bf16.msrb.mxu2 %v3653_v15  ;;  %418 = vmatpush.bf16.msrb.mxu1 %v3645_v16  ;;  %v788_v15 = vunpack.c.l.b16 %v583_v8  ;;  %v3162_v16 = vld [vmem:[%s4996_s2 + $0x10] sm:$0xf]  ;;  %v604_v22 = vrot.slane %v602_v10, 5  ;;  %v591_v29 = vor.u32 %v590_v18, %v587_v17  ;;  %v3678_v63 = vld [vmem:[%s4997_s3 + $0x24] sm:$0xf0]  ;;  %v3167_v6 = vor.u32 %v3662_v61, %v3166_v60  ;;  %v3695_v17 = vld [vmem:[%s4993_s4 + $0x158] sm:$0xff] }
  0x3b   :  { %v3247_v7 = vor.u32 %v3678_v63, %v3246_v62  ;;  %v3735_v18 = vld [vmem:[%s4993_s4 + $0x218] sm:$0xff]  ;;  %v3046_v63 = vld [vmem:[%s4995_s1 + $0x48] sm:$0xf] }
  0x3c   :  { %1097 = vmatpush.bf16.msrb.mxu3 %v3669_v19  ;;  %1323 = vmatpush.bf16.msrb.mxu0 %v3685_v20  ;;  %v3661_v19 = vld [vmem:[%s4996_s2 + $0x14] sm:$0xf0]  ;;  %v3242_v20 = vld [vmem:[%s4997_s3 + $0x10] sm:$0xf]  ;;  %v802_v27 = vpack.c.b16 %v788_v15, %v787_v14  ;;  %v605_v32 = vor.u32 %v604_v22, %v601_v21 }
  0x3d   :  { %v3163_v28 = vor.u32 %v3661_v19, %v3162_v16  ;;  %v3243_v30 = vor.u32 %v3677_v23, %v3242_v20  ;;  %v511_v14 = vld [vmem:[%s4994_s0 + $0x50] sm:$0xf]  ;;  %v3711_v15 = vld [vmem:[%s4993_s4 + $0x198] sm:$0xff] }
  0x3e   :  { %872 = vmatpush.bf16.msrb.mxu2 %v3652_v25  ;;  %419 = vmatpush.bf16.msrb.mxu1 %v3644_v26  ;;  %v504_v25 = vld [vmem:[%s4994_s0 + $0x2c] sm:$0x1]  ;;  %v3035_v26 = vor.u32 %v3637_v13, %v3034_v12  ;;  %v606_v38 = vrot.slane %v605_v32, 4  ;;  %v509_v13 = vld [vmem:[%s4994_s0 + $0x48] sm:$0xf]  ;;  %v3727_v16 = vld [vmem:[%s4993_s4 + $0x1d8] sm:$0xff] }
  0x3f   :  { %v608_v33 = vshll.u32 %v504_v25, 16  ;;  %v641_v21 = vshrl.u32 %v509_v13, 16  ;;  %v644_v22 = vshll.u32 %v509_v13, 16  ;;  %v655_v23 = vshrl.u32 %v511_v14, 16  ;;  %v3042_v25 = vld [vmem:[%s4995_s1 + $0x30] sm:$0xf] }
  0x40   :  { %1098 = vmatpush.bf16.msrb.mxu3 %v3668_v31  ;;  %1324 = vmatpush.bf16.msrb.mxu0 %v3684_v42  ;;  %v594_v31 = vshll.u32 %v502_v24, 16  ;;  %v3696_v42 = vld [vmem:[%s4993_s4 + $0x160] sm:$0xff]  ;;  %v658_v24 = vshll.u32 %v511_v14, 16 }
  0x41   :  { %420 = vmatmul.bf16.vlgmr.msrb.gmra.mxu1 %v3031_v45  ;;  %873 = vmatmul.bf16.vlgmr.msrb.gmra.mxu2 %v801_v48  ;;  %v610_v39 = vrot.slane %v608_v33, 5  ;;  %v616_v45 = vshll.u32 %v505_v35, 16  ;;  %v3170_v33 = vld [vmem:[%s4996_s2 + $0x30] sm:$0xf]  ;;  %v512_v35 = vld [vmem:[%s4994_s0 + $0x54] sm:$0x1] }
  0x42   :  { %1994 = vmatpush.bf16.msra.mxu2 %v3715_v34  ;;  %1767 = vmatpush.bf16.msra.mxu1 %v3699_v36  ;;  %v592_v34 = vrot.slane %v591_v29, 4  ;;  %v507_v36 = vld [vmem:[%s4994_s0 + $0x38] sm:$0xf]  ;;  %v596_v37 = vrot.slane %v594_v31, 5  ;;  %v643_v29 = vrot.slane %v641_v21, 4  ;;  %v657_v31 = vrot.slane %v655_v23, 4 }
  0x43   :  { %1099 = vmatmul.bf16.vlgmr.msrb.gmra.mxu3 %v3159_v49  ;;  %1325 = vmatmul.bf16.vlgmr.msrb.gmra.mxu0 %v3239_v50  ;;  %v611_v49 = vsel %vm4008_vm2, %v606_v38, %v610_v39  ;;  %v615_v50 = vrot.slane %v613_v44, 4  ;;  %v618_v51 = vrot.slane %v616_v45, 5  ;;  %v660_v32 = vrot.slane %v658_v24, 5  ;;  %v3679_v38 = vld [vmem:[%s4997_s3 + $0x34] sm:$0xf0] }
  0x44   :  { %2221 = vmatpush.bf16.msra.mxu3 %v3731_v46  ;;  %2671 = vmatpush.bf16.msra.mxu0 %v3739_v47  ;;  %v627_v46 = vshrl.u32 %v507_v36, 16  ;;  %v630_v47 = vshll.u32 %v507_v36, 16  ;;  %v597_v48 = vsel %vm4008_vm2, %v592_v34, %v596_v37  ;;  %v510_v34 = vld [vmem:[%s4994_s0 + $0x4c] sm:$0x1]  ;;  %v3663_v36 = vld [vmem:[%s4996_s2 + $0x34] sm:$0xf0] }
  0x45   :  { %v789_v54 = vunpack.c.l.b16 %v597_v48  ;;  %v619_v0 = vor.u32 %v618_v51, %v615_v50  ;;  %v3250_v37 = vld [vmem:[%s4997_s3 + $0x30] sm:$0xf]  ;;  %v664_v44 = vshll.u32 %v512_v35, 16  ;;  %v3171_v45 = vor.u32 %v3663_v36, %v3170_v33  ;;  %v516_v13 = vld [vmem:[%s4994_s0 + $0x64] sm:$0x1] }
  0x46   :  { %1995 = vmatpush.bf16.msra.mxu2 %v3714_v55  ;;  %1768 = vmatpush.bf16.msra.mxu1 %v3698_v56  ;;  %v629_v52 = vrot.slane %v627_v46, 4  ;;  %v632_v53 = vrot.slane %v630_v47, 5  ;;  %v790_v55 = vunpack.c.l.b16 %v611_v49  ;;  %v506_v56 = vld [vmem:[%s4994_s0 + $0x34] sm:$0x1]  ;;  %v3251_v46 = vor.u32 %v3679_v38, %v3250_v37  ;;  %v519_v23 = vld [vmem:[%s4994_s0 + $0x70] sm:$0xf] }
  0x47   :  { %v620_v8 = vrot.slane %v619_v0, 4  ;;  %v666_v50 = vrot.slane %v664_v44, 5  ;;  %v3710_v51 = vld [vmem:[%s4993_s4 + $0x190] sm:$0xff]  ;;  %v692_v21 = vshll.u32 %v516_v13, 16  ;;  %v714_v33 = vshll.u32 %v519_v23, 16  ;;  %v3733_v37 = vld [vmem:[%s4993_s4 + $0x208] sm:$0xff] }
  0x48   :  { %2222 = vmatpush.bf16.msra.mxu3 %v3730_v57  ;;  %2672 = vmatpush.bf16.msra.mxu0 %v3738_v58  ;;  %v508_v57 = vld [vmem:[%s4994_s0 + $0x3c] sm:$0x1]  ;;  %v3038_v58 = vld [vmem:[%s4995_s1 + $0x20] sm:$0xf]  ;;  %v803_v5 = vpack.c.b16 %v790_v55, %v789_v54  ;;  %v513_v54 = vld [vmem:[%s4994_s0 + $0x58] sm:$0xf] }
  0x49   :  { %v515_v55 = vld [vmem:[%s4994_s0 + $0x60] sm:$0xf]  ;;  %v672_v60 = vshll.u32 %v513_v54, 16  ;;  %v3640_v0 = vld [vmem:[%s4995_s1 + $0x4c] sm:$0xf0] }
  0x4a   :  { %1996 = vmatpush.bf16.msra.mxu2 %v3713_v1  ;;  %1769 = vmatpush.bf16.msra.mxu1 %v3697_v2  ;;  %v622_v1 = vshll.u32 %v506_v56, 16  ;;  %v633_v2 = vor.u32 %v632_v53, %v629_v52  ;;  %v3726_v52 = vld [vmem:[%s4993_s4 + $0x1d0] sm:$0xff]  ;;  %v683_v61 = vshrl.u32 %v515_v55, 16  ;;  %v686_v62 = vshll.u32 %v515_v55, 16  ;;  %v518_v44 = vld [vmem:[%s4994_s0 + $0x6c] sm:$0x1] }
  0x4b   :  { %v3694_v53 = vld [vmem:[%s4993_s4 + $0x150] sm:$0xff]  ;;  %v3047_v14 = vor.u32 %v3640_v0, %v3046_v63  ;;  %v521_v0 = vld [vmem:[%s4994_s0 + $0x78] sm:$0xf]  ;;  %v3054_v13 = vld [vmem:[%s4995_s1 + $0x68] sm:$0xf] }
  0x4c   :  { %2223 = vmatpush.bf16.msra.mxu3 %v3729_v3  ;;  %2673 = vmatpush.bf16.msra.mxu0 %v3737_v4  ;;  %v636_v3 = vshll.u32 %v508_v57, 16  ;;  %v3039_v4 = vor.u32 %v3638_v59, %v3038_v58  ;;  %v624_v9 = vrot.slane %v622_v1, 5  ;;  %v634_v10 = vrot.slane %v633_v2, 4  ;;  %v3734_v56 = vld [vmem:[%s4993_s4 + $0x210] sm:$0xff] }
  0x4d   :  { %v669_v59 = vshrl.u32 %v513_v54, 16 }
  0x4e   :  { %1997 = vmatpush.bf16.msra.mxu2 %v3712_v40  ;;  %1770 = vmatpush.bf16.msra.mxu1 %v3696_v42  ;;  %v638_v12 = vrot.slane %v636_v3, 5  ;;  %v625_v19 = vsel %vm4008_vm2, %v620_v8, %v624_v9  ;;  %v650_v42 = vshll.u32 %v510_v34, 16  ;;  %v3174_v3 = vld [vmem:[%s4996_s2 + $0x48] sm:$0xf]  ;;  %v674_v8 = vrot.slane %v672_v60, 5 }
  0x4f   :  { %v685_v9 = vrot.slane %v683_v61, 4  ;;  %v3693_v34 = vld [vmem:[%s4993_s4 + $0x148] sm:$0xff] }
  0x50   :  { %2224 = vmatpush.bf16.msra.mxu3 %v3728_v41  ;;  %2674 = vmatpush.bf16.msra.mxu0 %v3736_v43  ;;  %v639_v20 = vsel %vm4008_vm2, %v634_v10, %v638_v12  ;;  %v661_v43 = vor.u32 %v660_v32, %v657_v31  ;;  %v652_v48 = vrot.slane %v650_v42, 5  ;;  %v688_v10 = vrot.slane %v686_v62, 5  ;;  %v514_v12 = vld [vmem:[%s4994_s0 + $0x5c] sm:$0x1] }
  0x51   :  { %425 = vmatmul.bf16.gmra.mxu1 %v3035_v26  ;;  %878 = vmatmul.bf16.gmra.mxu2 %v802_v27  ;;  %v791_v26 = vunpack.c.l.b16 %v625_v19  ;;  %v792_v27 = vunpack.c.l.b16 %v639_v20  ;;  %v678_v19 = vshll.u32 %v514_v12, 16  ;;  %v711_v32 = vshrl.u32 %v519_v23, 16  ;;  %v3732_v12 = vld [vmem:[%s4993_s4 + $0x200] sm:$0xff] }
  0x52   :  { %1998 = vmatpush.bf16.msra.mxu2 %v3711_v15  ;;  %1771 = vmatpush.bf16.msra.mxu1 %v3695_v17  ;;  %v662_v49 = vrot.slane %v661_v43, 4  ;;  %v689_v20 = vor.u32 %v688_v10, %v685_v9  ;;  %v3692_v10 = vld [vmem:[%s4993_s4 + $0x140] sm:$0xff] }
  0x53   :  { %1104 = vmatmul.bf16.gmra.mxu3 %v3163_v28  ;;  %1330 = vmatmul.bf16.gmra.mxu0 %v3243_v30  ;;  %v3639_v28 = vld [vmem:[%s4995_s1 + $0x34] sm:$0xf0]  ;;  %v646_v30 = vrot.slane %v644_v22, 5  ;;  %v804_v40 = vpack.c.b16 %v792_v27, %v791_v26  ;;  %v517_v22 = vld [vmem:[%s4994_s0 + $0x68] sm:$0xf]  ;;  %v694_v27 = vrot.slane %v692_v21, 5 }
  0x54   :  { %2225 = vmatpush.bf16.msra.mxu3 %v3727_v16  ;;  %2675 = vmatpush.bf16.msra.mxu0 %v3735_v18  ;;  %v3043_v39 = vor.u32 %v3639_v28, %v3042_v25  ;;  %v667_v58 = vsel %vm4008_vm2, %v662_v49, %v666_v50  ;;  %v680_v25 = vrot.slane %v678_v19, 5  ;;  %v690_v26 = vrot.slane %v689_v20, 4  ;;  %v3709_v28 = vld [vmem:[%s4993_s4 + $0x188] sm:$0xff]  ;;  %v3665_v49 = vld [vmem:[%s4996_s2 + $0x5c] sm:$0xf0] }
  0x55   :  { %v647_v41 = vor.u32 %v646_v30, %v643_v29  ;;  %v794_v2 = vunpack.c.l.b16 %v667_v58  ;;  %v3725_v29 = vld [vmem:[%s4993_s4 + $0x1c8] sm:$0xff]  ;;  %v697_v30 = vshrl.u32 %v517_v22, 16  ;;  %v700_v31 = vshll.u32 %v517_v22, 16  ;;  %v3258_v50 = vld [vmem:[%s4997_s3 + $0x58] sm:$0xf] }
  0x56   :  { %1999 = vmatpush.bf16.msra.mxu2 %v3710_v51  ;;  %1772 = vmatpush.bf16.msra.mxu1 %v3694_v53  ;;  %v695_v36 = vsel %vm4008_vm2, %v690_v26, %v694_v27  ;;  %v3681_v51 = vld [vmem:[%s4997_s3 + $0x5c] sm:$0xf0]  ;;  %v706_v53 = vshll.u32 %v518_v44, 16  ;;  %v3182_v21 = vld [vmem:[%s4996_s2 + $0x68] sm:$0xf] }
  0x57   :  { %v648_v47 = vrot.slane %v647_v41, 4  ;;  %v699_v38 = vrot.slane %v697_v30, 4  ;;  %v716_v41 = vrot.slane %v714_v33, 5  ;;  %v796_v43 = vunpack.c.l.b16 %v695_v36  ;;  %v522_v22 = vld [vmem:[%s4994_s0 + $0x7c] sm:$0x1] }
  0x58   :  { %2226 = vmatpush.bf16.msra.mxu3 %v3726_v52  ;;  %2676 = vmatpush.bf16.msra.mxu0 %v3734_v56  ;;  %v708_v61 = vrot.slane %v706_v53, 5  ;;  %v524_v23 = vld [vmem:[%s4994_s0 + $0x84] sm:$0x1]  ;;  %v3682_v26 = vld [vmem:[%s4997_s3 + $0x6c] sm:$0xf0]  ;;  %v734_v30 = vshll.u32 %v522_v22, 16 }
  0x59   :  { %v653_v57 = vsel %vm4008_vm2, %v648_v47, %v652_v48  ;;  %v3641_v47 = vld [vmem:[%s4995_s1 + $0x5c] sm:$0xf0]  ;;  %v3178_v48 = vld [vmem:[%s4996_s2 + $0x58] sm:$0xf]  ;;  %v3540_v44 = vld [vmem:[%s4994_s0 + $0x8] sm:$0xf] }
  0x5a   :  { %v793_v1 = vunpack.c.l.b16 %v653_v57  ;;  %2000 = vmatpush.bf16.msra.mxu2 %v3709_v28  ;;  %1773 = vmatpush.bf16.msra.mxu1 %v3693_v34  ;;  %v3179_v58 = vor.u32 %v3665_v49, %v3178_v48 }
  0x5c   :  { %v805_v15 = vpack.c.b16 %v794_v2, %v793_v1  ;;  %2227 = vmatpush.bf16.msra.mxu3 %v3725_v29  ;;  %2677 = vmatpush.bf16.msra.mxu0 %v3733_v37  ;;  %v523_v1 = vld [vmem:[%s4994_s0 + $0x80] sm:$0xf] }
  0x5d   :  { %v3708_v2 = vld [vmem:[%s4993_s4 + $0x180] sm:$0xff]  ;;  %v742_v9 = vshll.u32 %v523_v1, 16 }
  0x5e   :  { %2001 = vmatpush.bf16.msra.mxu2 %v3708_v2  ;;  %1774 = vmatpush.bf16.msra.mxu1 %v3692_v10  ;;  %v3683_v2 = vld [vmem:[%s4997_s3 + $0x7c] sm:$0xf0] }
  0x5f   :  { %v744_v20 = vrot.slane %v742_v9, 5 }
  0x60   :  { %2678 = vmatpush.bf16.msra.mxu0 %v3732_v12 }
  0x61   :  { %430 = vmatmul.bf16.gmra.mxu1 %v3039_v4  ;;  %883 = vmatmul.bf16.gmra.mxu2 %v803_v5  ;;  %v3664_v4 = vld [vmem:[%s4996_s2 + $0x4c] sm:$0xf0]  ;;  %v3254_v5 = vld [vmem:[%s4997_s3 + $0x48] sm:$0xf] }
  0x62   :  { %v3175_v16 = vor.u32 %v3664_v4, %v3174_v3  ;;  %v3724_v3 = vld [vmem:[%s4993_s4 + $0x1c0] sm:$0xff] }
  0x63   :  { %1109 = vmatmul.bf16.gmra.mxu3 %v3167_v6  ;;  %1335 = vmatmul.bf16.gmra.mxu0 %v3247_v7  ;;  %v3680_v6 = vld [vmem:[%s4997_s3 + $0x4c] sm:$0xf0]  ;;  %v671_v7 = vrot.slane %v669_v59, 4  ;;  %v3259_v59 = vor.u32 %v3681_v51, %v3258_v50 }
  0x64   :  { %v3255_v17 = vor.u32 %v3680_v6, %v3254_v5  ;;  %2228 = vmatpush.bf16.msra.mxu3 %v3724_v3  ;;  %v725_v6 = vshrl.u32 %v521_v0, 16  ;;  %v1399_v3 = vld [vmem:[%s4996_s2 + $0x4] sm:$0x1] }
  0x65   :  { %v675_v18 = vor.u32 %v674_v8, %v671_v7  ;;  %v728_v7 = vshll.u32 %v521_v0, 16  ;;  %v739_v8 = vshrl.u32 %v523_v1, 16  ;;  %v3667_v0 = vld [vmem:[%s4996_s2 + $0x7c] sm:$0xf0]  ;;  %v3266_v1 = vld [vmem:[%s4997_s3 + $0x78] sm:$0xf] }
  0x67   :  { %v676_v24 = vrot.slane %v675_v18, 4  ;;  %v730_v18 = vrot.slane %v728_v7, 5  ;;  %v741_v19 = vrot.slane %v739_v8, 4  ;;  %v1401_v8 = vld [vmem:[%s4996_s2 + $0xc] sm:$0x1] }
  0x69   :  { %v681_v35 = vsel %vm4008_vm2, %v676_v24, %v680_v25  ;;  %v3666_v24 = vld [vmem:[%s4996_s2 + $0x6c] sm:$0xf0]  ;;  %v3262_v25 = vld [vmem:[%s4997_s3 + $0x68] sm:$0xf] }
  0x6a   :  { %v795_v42 = vunpack.c.l.b16 %v681_v35  ;;  %v3183_v34 = vor.u32 %v3666_v24, %v3182_v21  ;;  %v3263_v35 = vor.u32 %v3682_v26, %v3262_v25  ;;  %v3267_v21 = vor.u32 %v3683_v2, %v3266_v1  ;;  %v3382_v2 = vld [vmem:[%s4994_s0 + $0x8] sm:$0xf] }
  0x6b   :  { %v1440_v24 = vshll.u32 %v1399_v3, 16  ;;  %v1454_v26 = vshll.u32 %v1401_v8, 16 }
  0x6c   :  { %v806_v57 = vpack.c.b16 %v796_v43, %v795_v42  ;;  %v1400_v42 = vld [vmem:[%s4996_s2 + $0x8] sm:$0xf] }
  0x6d   :  { %v1448_v53 = vshll.u32 %v1400_v42, 16 }
  0x6f   :  { %v1450_v7 = vrot.slane %v1448_v53, 5 }
  0x71   :  { %435 = vmatmul.bf16.gmra.mxu1 %v3043_v39  ;;  %888 = vmatmul.bf16.gmra.mxu2 %v804_v40  ;;  %v702_v39 = vrot.slane %v700_v31, 5  ;;  %v713_v40 = vrot.slane %v711_v32, 4  ;;  %v745_v31 = vor.u32 %v744_v20, %v741_v19  ;;  %v748_v32 = vshll.u32 %v524_v23, 16 }
  0x73   :  { %1114 = vmatmul.bf16.gmra.mxu3 %v3171_v45  ;;  %1340 = vmatmul.bf16.gmra.mxu0 %v3251_v46  ;;  %v520_v45 = vld [vmem:[%s4994_s0 + $0x74] sm:$0x1]  ;;  %v3050_v46 = vld [vmem:[%s4995_s1 + $0x58] sm:$0xf]  ;;  %v703_v52 = vor.u32 %v702_v39, %v699_v38  ;;  %v717_v54 = vor.u32 %v716_v41, %v713_v40  ;;  %v736_v38 = vrot.slane %v734_v30, 5  ;;  %v746_v39 = vrot.slane %v745_v31, 4 }
  0x74   :  { %v720_v55 = vshll.u32 %v520_v45, 16  ;;  %v3051_v56 = vor.u32 %v3641_v47, %v3050_v46  ;;  %v750_v40 = vrot.slane %v748_v32, 5  ;;  %v1398_v41 = vld [vmem:[%s4996_s2] sm:$0xf]  ;;  %v3542_v45 = vld [vmem:[%s4994_s0 + $0x10] sm:$0xf] }
  0x75   :  { %v704_v60 = vrot.slane %v703_v52, 4  ;;  %v718_v62 = vrot.slane %v717_v54, 4  ;;  %v1431_v50 = vshrl.u32 %v1398_v41, 16  ;;  %v1434_v51 = vshll.u32 %v1398_v41, 16  ;;  %v1402_v32 = vld [vmem:[%s4996_s2 + $0x10] sm:$0xf] }
  0x76   :  { %v722_v63 = vrot.slane %v720_v55, 5  ;;  %v751_v48 = vsel %vm4008_vm2, %v746_v39, %v750_v40  ;;  %v1445_v52 = vshrl.u32 %v1400_v42, 16  ;;  %v2335_v55 = vshrl.u32 %v3540_v44, 16  ;;  %v3544_v40 = vld [vmem:[%s4994_s0 + $0x18] sm:$0xf] }
  0x77   :  { %v709_v4 = vsel %vm4008_vm2, %v704_v60, %v708_v61  ;;  %v3643_v60 = vld [vmem:[%s4995_s1 + $0x7c] sm:$0xf0]  ;;  %v3186_v61 = vld [vmem:[%s4996_s2 + $0x78] sm:$0xf]  ;;  %v1456_v39 = vrot.slane %v1454_v26, 5 }
  0x78   :  { %v723_v5 = vsel %vm4008_vm2, %v718_v62, %v722_v63  ;;  %v800_v63 = vunpack.c.l.b16 %v751_v48  ;;  %v2337_v9 = vrot.slane %v2335_v55, 4  ;;  %v3187_v20 = vor.u32 %v3667_v0, %v3186_v61 }
  0x81   :  { %440 = vmatmul.bf16.gmra.mxu1 %v3047_v14  ;;  %893 = vmatmul.bf16.gmra.mxu2 %v805_v15  ;;  %v797_v14 = vunpack.c.l.b16 %v709_v4  ;;  %v798_v15 = vunpack.c.l.b16 %v723_v5  ;;  %v1433_v4 = vrot.slane %v1431_v50, 4  ;;  %v1436_v5 = vrot.slane %v1434_v51, 5 }
  0x82   :  { %v1459_v50 = vshrl.u32 %v1402_v32, 16  ;;  %v1462_v51 = vshll.u32 %v1402_v32, 16 }
  0x83   :  { %1119 = vmatmul.bf16.gmra.mxu3 %v3175_v16  ;;  %1345 = vmatmul.bf16.gmra.mxu0 %v3255_v17  ;;  %v3642_v16 = vld [vmem:[%s4995_s1 + $0x6c] sm:$0xf0]  ;;  %v727_v17 = vrot.slane %v725_v6, 4  ;;  %v807_v28 = vpack.c.b16 %v798_v15, %v797_v14  ;;  %v1447_v6 = vrot.slane %v1445_v52, 4  ;;  %v3541_v15 = vld [vmem:[%s4994_s0 + $0xc] sm:$0x1]  ;;  %v1437_v23 = vor.u32 %v1436_v5, %v1433_v4 }
  0x84   :  { %v3055_v27 = vor.u32 %v3642_v16, %v3054_v13  ;;  %v3543_v16 = vld [vmem:[%s4994_s0 + $0x14] sm:$0x1]  ;;  %v1461_v3 = vrot.slane %v1459_v50, 4  ;;  %v1464_v4 = vrot.slane %v1462_v51, 5  ;;  %v1406_v50 = vld [vmem:[%s4996_s2 + $0x20] sm:$0xf] }
  0x85   :  { %v731_v29 = vor.u32 %v730_v18, %v727_v17  ;;  %v1451_v25 = vor.u32 %v1450_v7, %v1447_v6  ;;  %v2358_v31 = vshll.u32 %v3543_v16, 16 }
  0x87   :  { %v732_v37 = vrot.slane %v731_v29, 4  ;;  %v2344_v29 = vshll.u32 %v3541_v15, 16  ;;  %v3700_v15 = vld [vmem:[%s4994_s0 + $0xc] sm:$0xf0] }
  0x89   :  { %v737_v47 = vsel %vm4008_vm2, %v732_v37, %v736_v38  ;;  %v1442_v37 = vrot.slane %v1440_v24, 5  ;;  %v1452_v38 = vrot.slane %v1451_v25, 4  ;;  %v2346_v42 = vrot.slane %v2344_v29, 5  ;;  %v3716_v24 = vld [vmem:[%s4995_s1 + $0xc] sm:$0xf0] }
  0x8a   :  { %v799_v62 = vunpack.c.l.b16 %v737_v47  ;;  %v3546_v47 = vld [vmem:[%s4994_s0 + $0x20] sm:$0xf]  ;;  %v3547_v25 = vld [vmem:[%s4994_s0 + $0x24] sm:$0x1] }
  0x8b   :  { %v2377_v61 = vshrl.u32 %v3546_v47, 16 }
  0x8c   :  { %v808_v19 = vpack.c.b16 %v800_v63, %v799_v62  ;;  %v2380_v62 = vshll.u32 %v3546_v47, 16 }
  0x91   :  { %445 = vmatmul.bf16.gmra.mxu1 %v3051_v56  ;;  %898 = vmatmul.bf16.gmra.mxu2 %v806_v57  ;;  %v2338_v56 = vshll.u32 %v3540_v44, 16  ;;  %v2349_v57 = vshrl.u32 %v3542_v45, 16 }
  0x93   :  { %1124 = vmatmul.bf16.gmra.mxu3 %v3179_v58  ;;  %1350 = vmatmul.bf16.gmra.mxu0 %v3259_v59  ;;  %v2352_v58 = vshll.u32 %v3542_v45, 16  ;;  %v3058_v59 = vld [vmem:[%s4995_s1 + $0x78] sm:$0xf]  ;;  %v2340_v10 = vrot.slane %v2338_v56, 5  ;;  %v2351_v12 = vrot.slane %v2349_v57, 4  ;;  %v2360_v45 = vrot.slane %v2358_v31, 5 }
  0x94   :  { %v3059_v18 = vor.u32 %v3643_v60, %v3058_v59  ;;  %v2363_v56 = vshrl.u32 %v3544_v40, 16  ;;  %v2366_v57 = vshll.u32 %v3544_v40, 16  ;;  %v1457_v60 = vsel %vm4008_vm2, %v1452_v38, %v1456_v39 }
  0x95   :  { %v2354_v13 = vrot.slane %v2352_v58, 5  ;;  %v1688_v8 = vunpack.c.l.b16 %v1457_v60 }
  0x97   :  { %v2355_v30 = vor.u32 %v2354_v13, %v2351_v12  ;;  %v2365_v12 = vrot.slane %v2363_v56, 4  ;;  %v2368_v13 = vrot.slane %v2366_v57, 5  ;;  %v1408_v57 = vld [vmem:[%s4996_s2 + $0x28] sm:$0xf] }
  0x99   :  { %v2356_v44 = vrot.slane %v2355_v30, 4 }
  0x9b   :  { %v2361_v1 = vsel %vm4008_vm2, %v2356_v44, %v2360_v45  ;;  %v2386_v44 = vshll.u32 %v3547_v25, 16 }
  0x9e   :  { %v4373_v33 = vpop.f32.mrf.mxu1 }
  0xa0   :  { %v4375_v36 = vpop.f32.mrf.mxu0 }
  0xa1   :  { %450 = vmatmul.bf16.gmra.mxu1 %v3055_v27  ;;  %903 = vmatmul.bf16.gmra.mxu2 %v807_v28  ;;  %v2341_v28 = vor.u32 %v2340_v10, %v2337_v9  ;;  %v1403_v9 = vld [vmem:[%s4996_s2 + $0x14] sm:$0x1]  ;;  %v1405_v10 = vld [vmem:[%s4996_s2 + $0x1c] sm:$0x1] }
  0xa2   :  { %v1468_v29 = vshll.u32 %v1403_v9, 16  ;;  %v1482_v31 = vshll.u32 %v1405_v10, 16 }
  0xa3   :  { %1129 = vmatmul.bf16.gmra.mxu3 %v3183_v34  ;;  %1355 = vmatmul.bf16.gmra.mxu0 %v3263_v35  ;;  %v1404_v34 = vld [vmem:[%s4996_s2 + $0x18] sm:$0xf]  ;;  %v1438_v35 = vrot.slane %v1437_v23, 4  ;;  %v2342_v41 = vrot.slane %v2341_v28, 4  ;;  %v3478_v23 = vld [vmem:[%s4995_s1 + $0x8] sm:$0xf]  ;;  %v1465_v28 = vor.u32 %v1464_v4, %v1461_v3 }
  0xa4   :  { %v4383_v43 = vpop.f32.mrf.mxu2  ;;  %v1473_v52 = vshrl.u32 %v1404_v34, 16  ;;  %v1476_v53 = vshll.u32 %v1404_v34, 16  ;;  %v3479_v40 = vor.u32 %v3716_v24, %v3478_v23  ;;  %v1484_v56 = vrot.slane %v1482_v31, 5  ;;  %v1409_v31 = vld [vmem:[%s4996_s2 + $0x2c] sm:$0x1] }
  0xa5   :  { %v1443_v59 = vsel %vm4008_vm2, %v1438_v35, %v1442_v37  ;;  %v2347_v0 = vsel %vm4008_vm2, %v2342_v41, %v2346_v42  ;;  %v3383_v35 = vor.u32 %v3700_v15, %v3382_v2  ;;  %v2369_v37 = vor.u32 %v2368_v13, %v2365_v12 }
  0xa6   :  { %v4391_v46 = vpop.f32.mrf.mxu3  ;;  %v4397_v49 = vpop.f32.mrf.mxu1  ;;  %v1475_v5 = vrot.slane %v1473_v52, 4  ;;  %v1478_v6 = vrot.slane %v1476_v53, 5  ;;  %v1687_v7 = vunpack.c.l.b16 %v1443_v59  ;;  %v2591_v16 = vunpack.c.l.b16 %v2347_v0 }
  0xa7   :  { %v1466_v51 = vrot.slane %v1465_v28, 4  ;;  %v1470_v52 = vrot.slane %v1468_v29, 5  ;;  %v2370_v59 = vrot.slane %v2369_v37, 4  ;;  %v2388_v0 = vrot.slane %v2386_v44, 5  ;;  %v1407_v28 = vld [vmem:[%s4996_s2 + $0x24] sm:$0x1] }
  0xa8   :  { %v4399_v54 = vpop.f32.mrf.mxu0  ;;  %v1479_v30 = vor.u32 %v1478_v6, %v1475_v5  ;;  %v1703_v34 = vpack.c.b16 %v1688_v8, %v1687_v7  ;;  %v1490_v2 = vshll.u32 %v1406_v50, 16  ;;  %v1501_v3 = vshrl.u32 %v1408_v57, 16  ;;  %v3386_v44 = vld [vmem:[%s4994_s0 + $0x18] sm:$0xf] }
  0xa9   :  { %v1504_v4 = vshll.u32 %v1408_v57, 16  ;;  %v1471_v13 = vsel %vm4008_vm2, %v1466_v51, %v1470_v52  ;;  %v1496_v52 = vshll.u32 %v1407_v28, 16  ;;  %v3717_v57 = vld [vmem:[%s4995_s1 + $0x1c] sm:$0xf0]  ;;  %v3552_v28 = vld [vmem:[%s4994_s0 + $0x38] sm:$0xf] }
  0xaa   :  { %v1480_v53 = vrot.slane %v1479_v30, 4  ;;  %v1503_v29 = vrot.slane %v1501_v3, 4 }
  0xab   :  { %v1506_v30 = vrot.slane %v1504_v4, 5 }
  0xac   :  { %v4425_v14 = vpop.f32.mrf.mxu2  ;;  %v1485_v15 = vsel %vm4008_vm2, %v1480_v53, %v1484_v56  ;;  %v3482_v56 = vld [vmem:[%s4995_s1 + $0x18] sm:$0xf] }
  0xae   :  { %v4433_v17 = vpop.f32.mrf.mxu3  ;;  %v4435_v22 = vpop.f32.mrf.mxu1 }
  0xb0   :  { %v4437_v27 = vpop.f32.mrf.mxu0 }
  0xb1   :  { %455 = vmatmul.bf16.gmra.mxu1 %v3059_v18  ;;  %908 = vmatmul.bf16.gmra.mxu2 %v808_v19  ;;  %v2592_v18 = vunpack.c.l.b16 %v2361_v1  ;;  %v3545_v19 = vld [vmem:[%s4994_s0 + $0x1c] sm:$0x1]  ;;  %v1487_v1 = vshrl.u32 %v1406_v50, 16 }
  0xb2   :  { %v2372_v38 = vshll.u32 %v3545_v19, 16 }
  0xb3   :  { %1134 = vmatmul.bf16.gmra.mxu3 %v3187_v20  ;;  %1360 = vmatmul.bf16.gmra.mxu0 %v3267_v21  ;;  %v2379_v20 = vrot.slane %v2377_v61, 4  ;;  %v2382_v21 = vrot.slane %v2380_v62, 5  ;;  %v2607_v41 = vpack.c.b16 %v2592_v18, %v2591_v16  ;;  %v3550_v61 = vld [vmem:[%s4994_s0 + $0x30] sm:$0xf] }
  0xb4   :  { %v4451_v48 = vpop.f32.mrf.mxu2  ;;  %v2374_v60 = vrot.slane %v2372_v38, 5  ;;  %v2405_v8 = vshrl.u32 %v3550_v61, 16  ;;  %v2408_v9 = vshll.u32 %v3550_v61, 16 }
  0xb5   :  { %v2383_v42 = vor.u32 %v2382_v21, %v2379_v20  ;;  %v1489_v20 = vrot.slane %v1487_v1, 4  ;;  %v1492_v21 = vrot.slane %v1490_v2, 5 }
  0xb6   :  { %v4453_v55 = vpop.f32.mrf.mxu3  ;;  %v4455_v58 = vpop.f32.mrf.mxu1  ;;  %v2375_v18 = vsel %vm4008_vm2, %v2370_v59, %v2374_v60  ;;  %v2407_v37 = vrot.slane %v2405_v8, 4  ;;  %v2410_v38 = vrot.slane %v2408_v9, 5  ;;  %v1507_v59 = vor.u32 %v1506_v30, %v1503_v29 }
  0xb7   :  { %v2384_v62 = vrot.slane %v2383_v42, 4  ;;  %v3551_v42 = vld [vmem:[%s4994_s0 + $0x34] sm:$0x1]  ;;  %v1493_v51 = vor.u32 %v1492_v21, %v1489_v20  ;;  %v1510_v60 = vshll.u32 %v1409_v31, 16  ;;  %v1498_v9 = vrot.slane %v1496_v52, 5 }
  0xb8   :  { %v4461_v63 = vpop.f32.mrf.mxu0  ;;  %v2414_v1 = vshll.u32 %v3551_v42, 16  ;;  %v2419_v42 = vshrl.u32 %v3552_v28, 16 }
  0xb9   :  { %v2389_v19 = vsel %vm4008_vm2, %v2384_v62, %v2388_v0  ;;  %v2411_v0 = vor.u32 %v2410_v38, %v2407_v37  ;;  %v1494_v8 = vrot.slane %v1493_v51, 4 }
  0xba   :  { %v2594_v50 = vunpack.c.l.b16 %v2389_v19  ;;  %v2416_v21 = vrot.slane %v2414_v1, 5 }
  0xbb   :  { %v2412_v20 = vrot.slane %v2411_v0, 4  ;;  %v1499_v29 = vsel %vm4008_vm2, %v1494_v8, %v1498_v9  ;;  %v3718_v0 = vld [vmem:[%s4995_s1 + $0x2c] sm:$0xf0] }
  0xbc   :  { %v4491_v26 = vpop.f32.mrf.mxu2 }
  0xbe   :  { %v4493_v32 = vpop.f32.mrf.mxu3  ;;  %v421_v39 = vpop.f32.mrf.mxu1 }
  0xbf   :  { %v461_v45 = vadd.f32 %v421_v39, %v4375_v36  ;;  %v3548_v36 = vld [vmem:[%s4994_s0 + $0x28] sm:$0xf]  ;;  %v1689_v39 = vunpack.c.l.b16 %v1471_v13 }
  0xc0   :  { %v1326_v47 = vpop.f32.mrf.mxu0  ;;  %v2391_v6 = vshrl.u32 %v3548_v36, 16  ;;  %v2394_v7 = vshll.u32 %v3548_v36, 16 }
  0xc1   :  { %1775 = vmatmul.bf16.vlgmr.msra.gmra.mxu1 %v1703_v34  ;;  %2002 = vmatmul.bf16.vlgmr.msra.gmra.mxu2 %v3383_v35 }
  0xc2   :  { %v2393_v34 = vrot.slane %v2391_v6, 4  ;;  %v2396_v35 = vrot.slane %v2394_v7, 5  ;;  %v3483_v6 = vor.u32 %v3717_v57, %v3482_v56 }
  0xc3   :  { %2229 = vmatmul.bf16.vlgmr.msra.gmra.mxu3 %v3479_v40  ;;  %2679 = vmatmul.bf16.vlgmr.msra.gmra.mxu0 %v2607_v41  ;;  %v1690_v40 = vunpack.c.l.b16 %v1485_v15  ;;  %v2593_v41 = vunpack.c.l.b16 %v2375_v18  ;;  %v1508_v15 = vrot.slane %v1507_v59, 4  ;;  %v1691_v59 = vunpack.c.l.b16 %v1499_v29 }
  0xc4   :  { %v874_v5 = vpop.f32.mrf.mxu2  ;;  %v2397_v61 = vor.u32 %v2396_v35, %v2393_v34  ;;  %v2417_v35 = vsel %vm4008_vm2, %v2412_v20, %v2416_v21 }
  0xc5   :  { %v914_v10 = vadd.f32 %v874_v5, %v461_v45  ;;  %v3701_v45 = vld [vmem:[%s4994_s0 + $0x1c] sm:$0xf0]  ;;  %v1704_v4 = vpack.c.b16 %v1690_v40, %v1689_v39  ;;  %v2608_v7 = vpack.c.b16 %v2594_v50, %v2593_v41  ;;  %v2596_v1 = vunpack.c.l.b16 %v2417_v35 }
  0xc6   :  { %v1100_v12 = vpop.f32.mrf.mxu3  ;;  %v423_v16 = vpop.f32.mrf.mxu1  ;;  %v2398_v18 = vrot.slane %v2397_v61, 4  ;;  %v3486_v61 = vld [vmem:[%s4995_s1 + $0x28] sm:$0xf] }
  0xc7   :  { %v1140_v23 = vadd.f32 %v1100_v12, %v914_v10  ;;  %v462_v24 = vadd.f32 %v423_v16, %v4399_v54  ;;  %v3549_v54 = vld [vmem:[%s4994_s0 + $0x2c] sm:$0x1]  ;;  %v1512_v16 = vrot.slane %v1510_v60, 5  ;;  %v3390_v60 = vld [vmem:[%s4994_s0 + $0x28] sm:$0xf]  ;;  %v3487_v21 = vor.u32 %v3718_v0, %v3486_v61 }
  0xc8   :  { %v1328_v25 = vpop.f32.mrf.mxu0  ;;  %v2400_v62 = vshll.u32 %v3549_v54, 16  ;;  %v3558_v61 = vld [vmem:[%s4994_s0 + $0x58] sm:$0xf] }
  0xc9   :  { %v4535_v53 = vadd.f32 %v1326_v47, %v1140_v23  ;;  %v3387_v47 = vor.u32 %v3701_v45, %v3386_v44  ;;  %v1410_v23 = vld [vmem:[%s4996_s2 + $0x30] sm:$0xf]  ;;  %v1513_v30 = vsel %vm4008_vm2, %v1508_v15, %v1512_v16  ;;  %v2422_v45 = vshll.u32 %v3552_v28, 16  ;;  %v3553_v16 = vld [vmem:[%s4994_s0 + $0x3c] sm:$0x1] }
  0xca   :  { %v2402_v19 = vrot.slane %v2400_v62, 5  ;;  %v1515_v37 = vshrl.u32 %v1410_v23, 16  ;;  %v1518_v38 = vshll.u32 %v1410_v23, 16  ;;  %v1692_v62 = vunpack.c.l.b16 %v1513_v30 }
  0xcb   :  { %v2424_v8 = vrot.slane %v2422_v45, 5  ;;  %v2428_v35 = vshll.u32 %v3553_v16, 16 }
  0xcc   :  { %v876_v36 = vpop.f32.mrf.mxu2  ;;  %v2403_v34 = vsel %vm4008_vm2, %v2398_v18, %v2402_v19  ;;  %v3555_v18 = vld [vmem:[%s4994_s0 + $0x44] sm:$0x1]  ;;  %v1705_v20 = vpack.c.b16 %v1692_v62, %v1691_v59 }
  0xcd   :  { %v915_v2 = vadd.f32 %v876_v36, %v462_v24  ;;  %v3702_v36 = vld [vmem:[%s4994_s0 + $0x2c] sm:$0xf0]  ;;  %v2430_v59 = vrot.slane %v2428_v35, 5  ;;  %v3557_v35 = vld [vmem:[%s4994_s0 + $0x54] sm:$0x1] }
  0xce   :  { %v1102_v3 = vpop.f32.mrf.mxu3  ;;  %v426_v5 = vpop.f32.mrf.mxu1  ;;  %v3391_v15 = vor.u32 %v3702_v36, %v3390_v60 }
  0xcf   :  { %v1141_v10 = vadd.f32 %v1102_v3, %v915_v2  ;;  %v463_v12 = vadd.f32 %v426_v5, %v4437_v27  ;;  %v1412_v27 = vld [vmem:[%s4996_s2 + $0x38] sm:$0xf]  ;;  %v1411_v2 = vld [vmem:[%s4996_s2 + $0x34] sm:$0x1]  ;;  %v1517_v3 = vrot.slane %v1515_v37, 4 }
  0xd0   :  { %v1331_v13 = vpop.f32.mrf.mxu0  ;;  %v1529_v41 = vshrl.u32 %v1412_v27, 16  ;;  %v1532_v54 = vshll.u32 %v1412_v27, 16  ;;  %v1524_v23 = vshll.u32 %v1411_v2, 16 }
  0xd1   :  { %1780 = vmatmul.bf16.gmra.mxu1 %v1704_v4  ;;  %2007 = vmatmul.bf16.gmra.mxu2 %v3387_v47  ;;  %v4547_v24 = vadd.f32 %v1328_v25, %v1141_v10  ;;  %v3554_v25 = vld [vmem:[%s4994_s0 + $0x40] sm:$0xf]  ;;  %v1413_v4 = vld [vmem:[%s4996_s2 + $0x3c] sm:$0x1]  ;;  %v1520_v47 = vrot.slane %v1518_v38, 5  ;;  %v2442_v38 = vshll.u32 %v3555_v18, 16 }
  0xd2   :  { %v2433_v50 = vshrl.u32 %v3554_v25, 16  ;;  %v2436_v51 = vshll.u32 %v3554_v25, 16  ;;  %v1531_v5 = vrot.slane %v1529_v41, 4  ;;  %v1538_v27 = vshll.u32 %v1413_v4, 16 }
  0xd3   :  { %2234 = vmatmul.bf16.gmra.mxu3 %v3483_v6  ;;  %2684 = vmatmul.bf16.gmra.mxu0 %v2608_v7  ;;  %v1534_v6 = vrot.slane %v1532_v54, 5  ;;  %v2421_v7 = vrot.slane %v2419_v42, 4  ;;  %v1521_v25 = vor.u32 %v1520_v47, %v1517_v3  ;;  %v1526_v54 = vrot.slane %v1524_v23, 5  ;;  %v1415_v23 = vld [vmem:[%s4996_s2 + $0x4c] sm:$0x1] }
  0xd4   :  { %v879_v31 = vpop.f32.mrf.mxu2  ;;  %v2435_v9 = vrot.slane %v2433_v50, 4  ;;  %v2438_v10 = vrot.slane %v2436_v51, 5  ;;  %v1540_v42 = vrot.slane %v1538_v27, 5  ;;  %v1416_v51 = vld [vmem:[%s4996_s2 + $0x50] sm:$0xf]  ;;  %v2444_v36 = vrot.slane %v2442_v38, 5 }
  0xd5   :  { %v916_v39 = vadd.f32 %v879_v31, %v463_v12  ;;  %v1522_v45 = vrot.slane %v1521_v25, 4  ;;  %v1560_v2 = vshll.u32 %v1416_v51, 16 }
  0xd6   :  { %v1105_v40 = vpop.f32.mrf.mxu3  ;;  %v428_v44 = vpop.f32.mrf.mxu1  ;;  %v2439_v37 = vor.u32 %v2438_v10, %v2435_v9  ;;  %v3394_v10 = vld [vmem:[%s4994_s0 + $0x38] sm:$0xf] }
  0xd7   :  { %v1142_v52 = vadd.f32 %v1105_v40, %v916_v39  ;;  %v464_v56 = vadd.f32 %v428_v44, %v4461_v63  ;;  %v2595_v63 = vunpack.c.l.b16 %v2403_v34  ;;  %v2425_v34 = vor.u32 %v2424_v8, %v2421_v7  ;;  %v1414_v44 = vld [vmem:[%s4996_s2 + $0x48] sm:$0xf] }
  0xd8   :  { %v1333_v57 = vpop.f32.mrf.mxu0  ;;  %v2440_v60 = vrot.slane %v2439_v37, 4  ;;  %v1543_v62 = vshrl.u32 %v1414_v44, 16  ;;  %v1546_v0 = vshll.u32 %v1414_v44, 16  ;;  %v1527_v8 = vsel %vm4008_vm2, %v1522_v45, %v1526_v54  ;;  %v3559_v54 = vld [vmem:[%s4994_s0 + $0x5c] sm:$0x1] }
  0xd9   :  { %v4585_v12 = vadd.f32 %v1331_v13, %v1142_v52  ;;  %v2609_v30 = vpack.c.b16 %v2596_v1, %v2595_v63  ;;  %v1535_v13 = vor.u32 %v1534_v6, %v1531_v5  ;;  %v3556_v52 = vld [vmem:[%s4994_s0 + $0x50] sm:$0xf]  ;;  %v1557_v1 = vshrl.u32 %v1416_v51, 16  ;;  %v3490_v45 = vld [vmem:[%s4995_s1 + $0x38] sm:$0xf] }
  0xda   :  { %v2447_v3 = vshrl.u32 %v3556_v52, 16  ;;  %v2450_v4 = vshll.u32 %v3556_v52, 16  ;;  %v2461_v5 = vshrl.u32 %v3558_v61, 16  ;;  %v2464_v6 = vshll.u32 %v3558_v61, 16 }
  0xdb   :  { %v1536_v50 = vrot.slane %v1535_v13, 4  ;;  %v2445_v16 = vsel %vm4008_vm2, %v2440_v60, %v2444_v36  ;;  %v1545_v27 = vrot.slane %v1543_v62, 4  ;;  %v1562_v25 = vrot.slane %v1560_v2, 5 }
  0xdc   :  { %v881_v19 = vpop.f32.mrf.mxu2  ;;  %v2449_v13 = vrot.slane %v2447_v3, 4  ;;  %v2463_v37 = vrot.slane %v2461_v5, 4  ;;  %v2466_v38 = vrot.slane %v2464_v6, 5  ;;  %v1552_v51 = vshll.u32 %v1415_v23, 16 }
  0xdd   :  { %v917_v28 = vadd.f32 %v881_v19, %v464_v56  ;;  %v2426_v56 = vrot.slane %v2425_v34, 4  ;;  %v1541_v9 = vsel %vm4008_vm2, %v1536_v50, %v1540_v42  ;;  %v3719_v50 = vld [vmem:[%s4995_s1 + $0x3c] sm:$0xf0]  ;;  %v2456_v61 = vshll.u32 %v3557_v35, 16 }
  0xde   :  { %v1107_v29 = vpop.f32.mrf.mxu3  ;;  %v431_v31 = vpop.f32.mrf.mxu1  ;;  %v1694_v34 = vunpack.c.l.b16 %v1541_v9  ;;  %v3491_v3 = vor.u32 %v3719_v50, %v3490_v45  ;;  %v1554_v6 = vrot.slane %v1552_v51, 5 }
  0xdf   :  { %v1143_v39 = vadd.f32 %v1107_v29, %v917_v28  ;;  %v465_v40 = vadd.f32 %v431_v31, %v4373_v33  ;;  %v1548_v28 = vrot.slane %v1546_v0, 5  ;;  %v1417_v29 = vld [vmem:[%s4996_s2 + $0x54] sm:$0x1]  ;;  %v2452_v31 = vrot.slane %v2450_v4, 5 }
  0xe0   :  { %v1336_v41 = vpop.f32.mrf.mxu0  ;;  %v1566_v52 = vshll.u32 %v1417_v29, 16 }
  0xe1   :  { %1785 = vmatmul.bf16.gmra.mxu1 %v1705_v20  ;;  %2012 = vmatmul.bf16.gmra.mxu2 %v3391_v15  ;;  %v4603_v33 = vadd.f32 %v1333_v57, %v1143_v39  ;;  %v2431_v15 = vsel %vm4008_vm2, %v2426_v56, %v2430_v59  ;;  %v1549_v59 = vor.u32 %v1548_v28, %v1545_v27  ;;  %v3560_v28 = vld [vmem:[%s4994_s0 + $0x60] sm:$0xf] }
  0xe2   :  { %v2597_v39 = vunpack.c.l.b16 %v2431_v15  ;;  %v2453_v36 = vor.u32 %v2452_v31, %v2449_v13  ;;  %v3562_v13 = vld [vmem:[%s4994_s0 + $0x68] sm:$0xf]  ;;  %v2478_v45 = vshll.u32 %v3560_v28, 16 }
  0xe3   :  { %2239 = vmatmul.bf16.gmra.mxu3 %v3487_v21  ;;  %2689 = vmatmul.bf16.gmra.mxu0 %v2609_v30  ;;  %v3703_v21 = vld [vmem:[%s4994_s0 + $0x3c] sm:$0xf0]  ;;  %v1559_v30 = vrot.slane %v1557_v1, 4  ;;  %v2470_v1 = vshll.u32 %v3559_v54, 16  ;;  %v1550_v9 = vrot.slane %v1549_v59, 4  ;;  %v2492_v59 = vshll.u32 %v3562_v13, 16 }
  0xe4   :  { %v884_v63 = vpop.f32.mrf.mxu2  ;;  %v3395_v44 = vor.u32 %v3703_v21, %v3394_v10  ;;  %v2454_v15 = vrot.slane %v2453_v36, 4 }
  0xe5   :  { %v918_v47 = vadd.f32 %v884_v63, %v465_v40  ;;  %v2598_v40 = vunpack.c.l.b16 %v2445_v16  ;;  %v1563_v60 = vor.u32 %v1562_v25, %v1559_v30  ;;  %v2467_v63 = vor.u32 %v2466_v38, %v2463_v37 }
  0xe6   :  { %v1110_v57 = vpop.f32.mrf.mxu3  ;;  %v433_v7 = vpop.f32.mrf.mxu1  ;;  %v2458_v16 = vrot.slane %v2456_v61, 5  ;;  %v1555_v30 = vsel %vm4008_vm2, %v1550_v9, %v1554_v6  ;;  %v3398_v61 = vld [vmem:[%s4994_s0 + $0x50] sm:$0xf] }
  0xe7   :  { %v1144_v18 = vadd.f32 %v1110_v57, %v918_v47  ;;  %v466_v19 = vadd.f32 %v433_v7, %v4397_v49  ;;  %v1693_v49 = vunpack.c.l.b16 %v1527_v8  ;;  %v2610_v4 = vpack.c.b16 %v2598_v40, %v2597_v39  ;;  %v1418_v8 = vld [vmem:[%s4996_s2 + $0x58] sm:$0xf]  ;;  %v1419_v39 = vld [vmem:[%s4996_s2 + $0x5c] sm:$0x1] }
  0xe8   :  { %v1338_v20 = vpop.f32.mrf.mxu0  ;;  %v1568_v7 = vrot.slane %v1566_v52, 5  ;;  %v1564_v10 = vrot.slane %v1563_v60, 4  ;;  %v1571_v23 = vshrl.u32 %v1418_v8, 16  ;;  %v1574_v27 = vshll.u32 %v1418_v8, 16  ;;  %v3561_v8 = vld [vmem:[%s4994_s0 + $0x64] sm:$0x1] }
  0xe9   :  { %v4635_v42 = vadd.f32 %v1336_v41, %v1144_v18  ;;  %v1706_v41 = vpack.c.b16 %v1694_v34, %v1693_v49  ;;  %v2468_v18 = vrot.slane %v2467_v63, 4  ;;  %v2459_v25 = vsel %vm4008_vm2, %v2454_v15, %v2458_v16 }
  0xea   :  { %v1573_v40 = vrot.slane %v1571_v23, 4  ;;  %v1576_v54 = vrot.slane %v1574_v27, 5  ;;  %v1695_v60 = vunpack.c.l.b16 %v1555_v30 }
  0xec   :  { %v886_v56 = vpop.f32.mrf.mxu2 }
  0xed   :  { %v919_v62 = vadd.f32 %v886_v56, %v466_v19  ;;  %v2472_v19 = vrot.slane %v2470_v1, 5  ;;  %v2489_v56 = vshrl.u32 %v3562_v13, 16  ;;  %v1580_v1 = vshll.u32 %v1419_v39, 16  ;;  %v1424_v39 = vld [vmem:[%s4996_s2 + $0x70] sm:$0xf] }
  0xee   :  { %v1112_v0 = vpop.f32.mrf.mxu3  ;;  %v436_v2 = vpop.f32.mrf.mxu1  ;;  %v2484_v13 = vshll.u32 %v3561_v8, 16 }
  0xef   :  { %v1145_v47 = vadd.f32 %v1112_v0, %v919_v62  ;;  %v467_v57 = vadd.f32 %v436_v2, %v4435_v22  ;;  %v1420_v22 = vld [vmem:[%s4996_s2 + $0x60] sm:$0xf]  ;;  %v2473_v34 = vsel %vm4008_vm2, %v2468_v18, %v2472_v19  ;;  %v3704_v62 = vld [vmem:[%s4994_s0 + $0x54] sm:$0xf0]  ;;  %v3494_v0 = vld [vmem:[%s4995_s1 + $0x50] sm:$0xf] }
  0xf0   :  { %v1341_v5 = vpop.f32.mrf.mxu0  ;;  %v1585_v35 = vshrl.u32 %v1420_v22, 16  ;;  %v1588_v37 = vshll.u32 %v1420_v22, 16  ;;  %v2600_v63 = vunpack.c.l.b16 %v2473_v34  ;;  %v2491_v9 = vrot.slane %v2489_v56, 4  ;;  %v3563_v19 = vld [vmem:[%s4994_s0 + $0x6c] sm:$0x1] }
  0xf1   :  { %1790 = vmatmul.bf16.gmra.mxu1 %v1706_v41  ;;  %2017 = vmatmul.bf16.gmra.mxu2 %v3395_v44  ;;  %v4647_v21 = vadd.f32 %v1338_v20, %v1145_v47  ;;  %v1569_v20 = vsel %vm4008_vm2, %v1564_v10, %v1568_v7  ;;  %v2475_v44 = vshrl.u32 %v3560_v28, 16  ;;  %v2599_v41 = vunpack.c.l.b16 %v2459_v25 }
  0xf2   :  { %v1696_v36 = vunpack.c.l.b16 %v1569_v20  ;;  %v1587_v2 = vrot.slane %v1585_v35, 4  ;;  %v1577_v7 = vor.u32 %v1576_v54, %v1573_v40  ;;  %v2494_v10 = vrot.slane %v2492_v59, 5 }
  0xf3   :  { %2244 = vmatmul.bf16.gmra.mxu3 %v3491_v3  ;;  %2694 = vmatmul.bf16.gmra.mxu0 %v2610_v4  ;;  %v1421_v3 = vld [vmem:[%s4996_s2 + $0x64] sm:$0x1]  ;;  %v1590_v4 = vrot.slane %v1588_v37, 5  ;;  %v2477_v47 = vrot.slane %v2475_v44, 4  ;;  %v3399_v16 = vor.u32 %v3704_v62, %v3398_v61  ;;  %v2611_v28 = vpack.c.b16 %v2600_v63, %v2599_v41 }
  0xf4   :  { %v889_v29 = vpop.f32.mrf.mxu2  ;;  %v1707_v27 = vpack.c.b16 %v1696_v36, %v1695_v60  ;;  %v1582_v30 = vrot.slane %v1580_v1, 5  ;;  %v1578_v34 = vrot.slane %v1577_v7, 4  ;;  %v2495_v35 = vor.u32 %v2494_v10, %v2491_v9 }
  0xf5   :  { %v920_v31 = vadd.f32 %v889_v29, %v467_v57  ;;  %v2480_v57 = vrot.slane %v2478_v45, 5  ;;  %v1591_v20 = vor.u32 %v1590_v4, %v1587_v2  ;;  %v2498_v37 = vshll.u32 %v3563_v19, 16 }
  0xf6   :  { %v1115_v49 = vpop.f32.mrf.mxu3  ;;  %v438_v38 = vpop.f32.mrf.mxu1  ;;  %v1583_v59 = vsel %vm4008_vm2, %v1578_v34, %v1582_v30  ;;  %v2496_v60 = vrot.slane %v2495_v35, 4  ;;  %v1616_v41 = vshll.u32 %v1424_v39, 16  ;;  %v1425_v30 = vld [vmem:[%s4996_s2 + $0x74] sm:$0x1] }
  0xf7   :  { %v1146_v50 = vadd.f32 %v1115_v49, %v920_v31  ;;  %v468_v51 = vadd.f32 %v438_v38, %v4455_v58  ;;  %v3720_v58 = vld [vmem:[%s4995_s1 + $0x54] sm:$0xf0]  ;;  %v2481_v25 = vor.u32 %v2480_v57, %v2477_v47  ;;  %v1422_v38 = vld [vmem:[%s4996_s2 + $0x68] sm:$0xf]  ;;  %v1592_v54 = vrot.slane %v1591_v20, 4 }
  0xf8   :  { %v1343_v52 = vpop.f32.mrf.mxu0  ;;  %v3495_v18 = vor.u32 %v3720_v58, %v3494_v0  ;;  %v2500_v36 = vrot.slane %v2498_v37, 5  ;;  %v1599_v62 = vshrl.u32 %v1422_v38, 16  ;;  %v1602_v0 = vshll.u32 %v1422_v38, 16 }
  0xf9   :  { %v4685_v6 = vadd.f32 %v1341_v5, %v1146_v50  ;;  %v1594_v5 = vshll.u32 %v1421_v3, 16  ;;  %v2482_v45 = vrot.slane %v2481_v25, 4  ;;  %v2486_v50 = vrot.slane %v2484_v13, 5 }
  0xfa   :  { %v1613_v58 = vshrl.u32 %v1424_v39, 16  ;;  %v1697_v10 = vunpack.c.l.b16 %v1583_v59  ;;  %v1601_v19 = vrot.slane %v1599_v62, 4  ;;  %v1622_v59 = vshll.u32 %v1425_v30, 16 }
  0xfb   :  { %v1596_v44 = vrot.slane %v1594_v5, 5  ;;  %v2487_v47 = vsel %vm4008_vm2, %v2482_v45, %v2486_v50  ;;  %v3567_v45 = vld [vmem:[%s4994_s0 + $0x7c] sm:$0x1] }
  0xfc   :  { %v891_v15 = vpop.f32.mrf.mxu2  ;;  %v2601_v5 = vunpack.c.l.b16 %v2487_v47  ;;  %v1624_v47 = vrot.slane %v1622_v59, 5  ;;  %v3502_v59 = vld [vmem:[%s4995_s1 + $0x70] sm:$0xf] }
  0xfd   :  { %v921_v22 = vadd.f32 %v891_v15, %v468_v51  ;;  %v3564_v51 = vld [vmem:[%s4994_s0 + $0x70] sm:$0xf]  ;;  %v3402_v15 = vld [vmem:[%s4994_s0 + $0x60] sm:$0xf] }
  0xfe   :  { %v1117_v23 = vpop.f32.mrf.mxu3  ;;  %v441_v29 = vpop.f32.mrf.mxu1  ;;  %v2503_v2 = vshrl.u32 %v3564_v51, 16  ;;  %v2506_v3 = vshll.u32 %v3564_v51, 16 }
  0xff   :  { %v1147_v31 = vadd.f32 %v1117_v23, %v921_v22  ;;  %v469_v56 = vadd.f32 %v441_v29, %v4383_v43  ;;  %v1597_v43 = vsel %vm4008_vm2, %v1592_v54, %v1596_v44  ;;  %v1604_v22 = vrot.slane %v1602_v0, 5  ;;  %v1423_v29 = vld [vmem:[%s4996_s2 + $0x6c] sm:$0x1]  ;;  %v3498_v54 = vld [vmem:[%s4995_s1 + $0x60] sm:$0xf] }
 0x100   :  { %v1346_v49 = vpop.f32.mrf.mxu0  ;;  %v1615_v23 = vrot.slane %v1613_v58, 4  ;;  %v2505_v20 = vrot.slane %v2503_v2, 4  ;;  %v2508_v25 = vrot.slane %v2506_v3, 5  ;;  %v3721_v44 = vld [vmem:[%s4995_s1 + $0x64] sm:$0xf0] }
 0x101   :  { %1795 = vmatmul.bf16.gmra.mxu1 %v1707_v27  ;;  %2022 = vmatmul.bf16.gmra.mxu2 %v3399_v16  ;;  %v4699_v40 = vadd.f32 %v1343_v52, %v1147_v31  ;;  %v3566_v52 = vld [vmem:[%s4994_s0 + $0x78] sm:$0xf]  ;;  %v2501_v16 = vsel %vm4008_vm2, %v2496_v60, %v2500_v36  ;;  %v1618_v27 = vrot.slane %v1616_v41, 5  ;;  %v3565_v31 = vld [vmem:[%s4994_s0 + $0x74] sm:$0x1]  ;;  %v1605_v51 = vor.u32 %v1604_v22, %v1601_v19 }
 0x102   :  { %v2517_v57 = vshrl.u32 %v3566_v52, 16  ;;  %v2520_v7 = vshll.u32 %v3566_v52, 16  ;;  %v2602_v13 = vunpack.c.l.b16 %v2501_v16  ;;  %v2509_v52 = vor.u32 %v2508_v25, %v2505_v20  ;;  %v1426_v16 = vld [vmem:[%s4996_s2 + $0x78] sm:$0xf]  ;;  %v1428_v19 = vld [vmem:[%s4996_s2 + $0x80] sm:$0xf] }
 0x103   :  { %2249 = vmatmul.bf16.gmra.mxu3 %v3495_v18  ;;  %2699 = vmatmul.bf16.gmra.mxu0 %v2611_v28  ;;  %v3705_v18 = vld [vmem:[%s4994_s0 + $0x64] sm:$0xf0]  ;;  %v1698_v28 = vunpack.c.l.b16 %v1597_v43  ;;  %v3499_v0 = vor.u32 %v3721_v44, %v3498_v54  ;;  %v1606_v3 = vrot.slane %v1605_v51, 4  ;;  %v3568_v22 = vld [vmem:[%s4994_s0 + $0x80] sm:$0xf]  ;;  %v1627_v30 = vshrl.u32 %v1426_v16, 16 }
 0x104   :  { %v894_v61 = vpop.f32.mrf.mxu2  ;;  %v2519_v34 = vrot.slane %v2517_v57, 4  ;;  %v2522_v35 = vrot.slane %v2520_v7, 5  ;;  %v3403_v39 = vor.u32 %v3705_v18, %v3402_v15  ;;  %v2612_v58 = vpack.c.b16 %v2602_v13, %v2601_v5 }
 0x105   :  { %v922_v63 = vadd.f32 %v894_v61, %v469_v56  ;;  %v1608_v56 = vshll.u32 %v1423_v29, 16  ;;  %v1708_v36 = vpack.c.b16 %v1698_v28, %v1697_v10  ;;  %v2512_v61 = vshll.u32 %v3565_v31, 16  ;;  %v3570_v28 = vld [vmem:[%s4994_s0 + $0x88] sm:$0xf] }
 0x106   :  { %v1120_v1 = vpop.f32.mrf.mxu3  ;;  %v443_v4 = vpop.f32.mrf.mxu1  ;;  %v2523_v41 = vor.u32 %v2522_v35, %v2519_v34  ;;  %v2510_v57 = vrot.slane %v2509_v52, 4  ;;  %v1630_v20 = vshll.u32 %v1426_v16, 16  ;;  %v1641_v31 = vshrl.u32 %v1428_v19, 16  ;;  %v1427_v52 = vld [vmem:[%s4996_s2 + $0x7c] sm:$0x1] }
 0x107   :  { %v1148_v8 = vadd.f32 %v1120_v1, %v922_v63  ;;  %v470_v38 = vadd.f32 %v443_v4, %v4425_v14  ;;  %v2526_v63 = vshll.u32 %v3567_v45, 16  ;;  %v1610_v4 = vrot.slane %v1608_v56, 5  ;;  %v3406_v56 = vld [vmem:[%s4994_s0 + $0x70] sm:$0xf] }
 0x108   :  { %v1348_v9 = vpop.f32.mrf.mxu0  ;;  %v2514_v7 = vrot.slane %v2512_v61, 5  ;;  %v2524_v10 = vrot.slane %v2523_v41, 4  ;;  %v1644_v34 = vshll.u32 %v1428_v19, 16  ;;  %v2531_v35 = vshrl.u32 %v3568_v22, 16 }
 0x109   :  { %v4731_v37 = vadd.f32 %v1346_v49, %v1148_v8  ;;  %v1619_v49 = vor.u32 %v1618_v27, %v1615_v23  ;;  %v2528_v15 = vrot.slane %v2526_v63, 5  ;;  %v1611_v23 = vsel %vm4008_vm2, %v1606_v3, %v1610_v4  ;;  %v3569_v4 = vld [vmem:[%s4994_s0 + $0x84] sm:$0x1] }
 0x10a   :  { %v2515_v29 = vsel %vm4008_vm2, %v2510_v57, %v2514_v7  ;;  %v2534_v54 = vshll.u32 %v3568_v22, 16  ;;  %v2545_v44 = vshrl.u32 %v3570_v28, 16  ;;  %v2548_v45 = vshll.u32 %v3570_v28, 16 }
 0x10b   :  { %v1620_v43 = vrot.slane %v1619_v49, 4  ;;  %v2529_v13 = vsel %vm4008_vm2, %v2524_v10, %v2528_v15  ;;  %v3706_v49 = vld [vmem:[%s4994_s0 + $0x74] sm:$0xf0]  ;;  %v1629_v61 = vrot.slane %v1627_v30, 4  ;;  %v1643_v41 = vrot.slane %v1641_v31, 4 }
 0x10c   :  { %v896_v50 = vpop.f32.mrf.mxu2  ;;  %v1646_v63 = vrot.slane %v1644_v34, 5  ;;  %v2550_v57 = vrot.slane %v2548_v45, 5  ;;  %v3571_v15 = vld [vmem:[%s4994_s0 + $0x8c] sm:$0x1] }
 0x10d   :  { %v923_v60 = vadd.f32 %v896_v50, %v470_v38  ;;  %v1625_v27 = vsel %vm4008_vm2, %v1620_v43, %v1624_v47  ;;  %v1699_v50 = vunpack.c.l.b16 %v1611_v23  ;;  %v2536_v43 = vrot.slane %v2534_v54, 5 }
 0x10e   :  { %v1122_v14 = vpop.f32.mrf.mxu3  ;;  %v446_v62 = vpop.f32.mrf.mxu1  ;;  %v1700_v51 = vunpack.c.l.b16 %v1625_v27  ;;  %v2547_v47 = vrot.slane %v2545_v44, 4  ;;  %v1647_v27 = vor.u32 %v1646_v63, %v1643_v41  ;;  %v3410_v63 = vld [vmem:[%s4994_s0 + $0x80] sm:$0xf] }
 0x10f   :  { %v1149_v1 = vadd.f32 %v1122_v14, %v923_v60  ;;  %v471_v18 = vadd.f32 %v446_v62, %v4451_v48  ;;  %v3722_v60 = vld [vmem:[%s4995_s1 + $0x74] sm:$0xf0]  ;;  %v2603_v14 = vunpack.c.l.b16 %v2515_v29 }
 0x110   :  { %v1351_v2 = vpop.f32.mrf.mxu0  ;;  %v3503_v10 = vor.u32 %v3722_v60, %v3502_v59  ;;  %v1709_v19 = vpack.c.b16 %v1700_v51, %v1699_v50 }
 0x111   :  { %1800 = vmatmul.bf16.gmra.mxu1 %v1708_v36  ;;  %2027 = vmatmul.bf16.gmra.mxu2 %v3403_v39  ;;  %v4743_v8 = vadd.f32 %v1348_v9, %v1149_v1  ;;  %v2604_v36 = vunpack.c.l.b16 %v2529_v13  ;;  %v2533_v1 = vrot.slane %v2531_v35, 4  ;;  %v1648_v35 = vrot.slane %v1647_v27, 4 }
 0x113   :  { %2254 = vmatmul.bf16.gmra.mxu3 %v3499_v0  ;;  %2704 = vmatmul.bf16.gmra.mxu0 %v2612_v58  ;;  %v1429_v0 = vld [vmem:[%s4996_s2 + $0x84] sm:$0x1]  ;;  %v1632_v58 = vrot.slane %v1630_v20, 5  ;;  %v2613_v22 = vpack.c.b16 %v2604_v36, %v2603_v14  ;;  %v2537_v30 = vor.u32 %v2536_v43, %v2533_v1  ;;  %v2551_v20 = vor.u32 %v2550_v57, %v2547_v47  ;;  %v3707_v1 = vld [vmem:[%s4994_s0 + $0x84] sm:$0xf0] }
 0x114   :  { %v899_v9 = vpop.f32.mrf.mxu2  ;;  %v1650_v28 = vshll.u32 %v1429_v0, 16  ;;  %v3723_v47 = vld [vmem:[%s4995_s1 + $0x84] sm:$0xf0] }
 0x115   :  { %v924_v48 = vadd.f32 %v899_v9, %v471_v18  ;;  %v1636_v9 = vshll.u32 %v1427_v52, 16  ;;  %v1633_v23 = vor.u32 %v1632_v58, %v1629_v61  ;;  %v2538_v45 = vrot.slane %v2537_v30, 4 }
 0x116   :  { %v1125_v5 = vpop.f32.mrf.mxu3  ;;  %v448_v25 = vpop.f32.mrf.mxu1  ;;  %v2552_v50 = vrot.slane %v2551_v20, 4 }
 0x117   :  { %v1150_v38 = vadd.f32 %v1125_v5, %v924_v48  ;;  %v472_v3 = vadd.f32 %v448_v25, %v4491_v26  ;;  %v2540_v48 = vshll.u32 %v3569_v4, 16  ;;  %v2554_v25 = vshll.u32 %v3571_v15, 16 }
 0x118   :  { %v1353_v39 = vpop.f32.mrf.mxu0  ;;  %v1638_v13 = vrot.slane %v1636_v9, 5  ;;  %v1634_v34 = vrot.slane %v1633_v23, 4  ;;  %v3411_v15 = vor.u32 %v3707_v1, %v3410_v63 }
 0x119   :  { %v4781_v62 = vadd.f32 %v1351_v2, %v1150_v38  ;;  %v3407_v2 = vor.u32 %v3706_v49, %v3406_v56  ;;  %v1652_v38 = vrot.slane %v1650_v28, 5  ;;  %v2542_v54 = vrot.slane %v2540_v48, 5 }
 0x11a   :  { %v2556_v51 = vrot.slane %v2554_v25, 5  ;;  %v1639_v14 = vsel %vm4008_vm2, %v1634_v34, %v1638_v13 }
 0x11b   :  { %v2543_v61 = vsel %vm4008_vm2, %v2538_v45, %v2542_v54  ;;  %v1701_v0 = vunpack.c.l.b16 %v1639_v14 }
 0x11c   :  { %v901_v7 = vpop.f32.mrf.mxu2 }
 0x11d   :  { %v925_v16 = vadd.f32 %v901_v7, %v472_v3  ;;  %v2605_v3 = vunpack.c.l.b16 %v2543_v61 }
 0x11e   :  { %v1127_v18 = vpop.f32.mrf.mxu3  ;;  %v451_v26 = vpop.f32.mrf.mxu1 }
 0x11f   :  { %v1151_v5 = vadd.f32 %v1127_v18, %v925_v16  ;;  %v473_v44 = vadd.f32 %v451_v26, %v4391_v46  ;;  %v2557_v46 = vsel %vm4008_vm2, %v2552_v50, %v2556_v51  ;;  %v3507_v18 = vor.u32 %v3723_v47, %v3506_v11 }
 0x120   :  { %v1356_v29 = vpop.f32.mrf.mxu0  ;;  %v2606_v4 = vunpack.c.l.b16 %v2557_v46 }
 0x121   :  { %1805 = vmatmul.bf16.gmra.mxu1 %v1709_v19  ;;  %2032 = vmatmul.bf16.gmra.mxu2 %v3407_v2  ;;  %v4793_v31 = vadd.f32 %v1353_v39, %v1151_v5  ;;  %v1653_v39 = vsel %vm4008_vm2, %v1648_v35, %v1652_v38 }
 0x122   :  { %v1702_v58 = vunpack.c.l.b16 %v1653_v39  ;;  %v2614_v19 = vpack.c.b16 %v2606_v4, %v2605_v3 }
 0x123   :  { %2259 = vmatmul.bf16.gmra.mxu3 %v3503_v10  ;;  %2709 = vmatmul.bf16.gmra.mxu0 %v2613_v22 }
 0x124   :  { %v904_v56 = vpop.f32.mrf.mxu2  ;;  %v1710_v10 = vpack.c.b16 %v1702_v58, %v1701_v0 }
 0x125   :  { %v926_v49 = vadd.f32 %v904_v56, %v473_v44 }
 0x126   :  { %v1130_v59 = vpop.f32.mrf.mxu3  ;;  %v453_v60 = vpop.f32.mrf.mxu1 }
 0x127   :  { %v1152_v36 = vadd.f32 %v1130_v59, %v926_v49  ;;  %v474_v43 = vadd.f32 %v453_v60, %v4433_v17 }
 0x128   :  { %v1358_v52 = vpop.f32.mrf.mxu0 }
 0x129   :  { %v4804_v41 = vadd.f32 %v1356_v29, %v1152_v36 }
 0x12c   :  { %v906_v57 = vpop.f32.mrf.mxu2 }
 0x12d   :  { %v927_v7 = vadd.f32 %v906_v57, %v474_v43 }
 0x12e   :  { %v1132_v2 = vpop.f32.mrf.mxu3  ;;  %v456_v16 = vpop.f32.mrf.mxu1 }
 0x12f   :  { %v1153_v22 = vadd.f32 %v1132_v2, %v927_v7  ;;  %v475_v26 = vadd.f32 %v456_v16, %v4453_v55 }
 0x130   :  { %v1361_v9 = vpop.f32.mrf.mxu0 }
 0x131   :  { %1810 = vmatmul.bf16.gmra.mxu1 %v1710_v10  ;;  %2037 = vmatmul.bf16.gmra.mxu2 %v3411_v15  ;;  %v4819_v17 = vadd.f32 %v1358_v52, %v1153_v22 }
 0x133   :  { %2264 = vmatmul.bf16.gmra.mxu3 %v3507_v18  ;;  %2714 = vmatmul.bf16.gmra.mxu0 %v2614_v19 }
 0x134   :  { %v909_v23 = vpop.f32.mrf.mxu2 }
 0x135   :  { %v928_v27 = vadd.f32 %v909_v23, %v475_v26 }
 0x136   :  { %v1135_v28 = vpop.f32.mrf.mxu3  ;;  %v458_v48 = vpop.f32.mrf.mxu1 }
 0x137   :  { %v1154_v5 = vadd.f32 %v1135_v28, %v928_v27  ;;  %v476_v20 = vadd.f32 %v458_v48, %v4493_v32 }
 0x138   :  { %v1363_v29 = vpop.f32.mrf.mxu0 }
 0x139   :  { %v4822_v30 = vadd.f32 %v1361_v9, %v1154_v5 }
 0x13c   :  { %v911_v25 = vpop.f32.mrf.mxu2 }
 0x13d   :  { %v929_v13 = vadd.f32 %v911_v25, %v476_v20 }
 0x13e   :  { %v1137_v34 = vpop.f32.mrf.mxu3  ;;  %v1776_v35 = vpop.f32.mrf.mxu1 }
 0x13f   :  { %v1155_v38 = vadd.f32 %v1137_v34, %v929_v13  ;;  %v1816_v54 = vadd.f32 %v1776_v35, %v4535_v53 }
 0x140   :  { %v2680_v44 = vpop.f32.mrf.mxu0 }
 0x141   :  { %v4826_v45 = vadd.f32 %v1363_v29, %v1155_v38 }
 0x144   :  { %v2003_v55 = vpop.f32.mrf.mxu2 }
 0x145   :  { %v2043_v50 = vadd.f32 %v2003_v55, %v1816_v54 }
 0x146   :  { %v2230_v51 = vpop.f32.mrf.mxu3  ;;  %v1778_v56 = vpop.f32.mrf.mxu1 }
 0x147   :  { %v2270_v49 = vadd.f32 %v2230_v51, %v2043_v50  ;;  %v1817_v59 = vadd.f32 %v1778_v56, %v4547_v24 }
 0x148   :  { %v2682_v60 = vpop.f32.mrf.mxu0 }
 0x149   :  { %v4829_v14 = vadd.f32 %v2680_v44, %v2270_v49 }
 0x14c   :  { %v2005_v32 = vpop.f32.mrf.mxu2 }
 0x14d   :  { %v2044_v39 = vadd.f32 %v2005_v32, %v1817_v59 }
 0x14e   :  { %v2232_v36 = vpop.f32.mrf.mxu3  ;;  %v1781_v52 = vpop.f32.mrf.mxu1 }
 0x14f   :  { %v2271_v61 = vadd.f32 %v2232_v36, %v2044_v39  ;;  %v1818_v53 = vadd.f32 %v1781_v52, %v4585_v12 }
 0x150   :  { %v2685_v46 = vpop.f32.mrf.mxu0 }
 0x151   :  { %v4832_v0 = vadd.f32 %v2682_v60, %v2271_v61 }
 0x153   :  { %v2768_v58 = vadd.f32 %v4832_v0, %v4829_v14 }
 0x154   :  { %v2008_v63 = vpop.f32.mrf.mxu2 }
 0x155   :  { %v2045_v1 = vadd.f32 %v2008_v63, %v1818_v53 }
 0x156   :  { %v2235_v3 = vpop.f32.mrf.mxu3  ;;  %v1783_v24 = vpop.f32.mrf.mxu1 }
 0x157   :  { %v2272_v4 = vadd.f32 %v2235_v3, %v2045_v1  ;;  %v1819_v43 = vadd.f32 %v1783_v24, %v4603_v33 }
 0x158   :  { %v2687_v11 = vpop.f32.mrf.mxu0 }
 0x159   :  { %v4837_v47 = vadd.f32 %v2685_v46, %v2272_v4 }
 0x15b   :  { %v2769_v57 = vadd.f32 %v2768_v58, %v4837_v47 }
 0x15c   :  { %v2010_v7 = vpop.f32.mrf.mxu2 }
 0x15d   :  { %v2046_v12 = vadd.f32 %v2010_v7, %v1819_v43 }
 0x15e   :  { %v2237_v2 = vpop.f32.mrf.mxu3  ;;  %v1786_v10 = vpop.f32.mrf.mxu1 }
 0x15f   :  { %v2273_v15 = vadd.f32 %v2237_v2, %v2046_v12  ;;  %v1820_v16 = vadd.f32 %v1786_v10, %v4635_v42 }
 0x160   :  { %v2690_v18 = vpop.f32.mrf.mxu0 }
 0x161   :  { %v4841_v19 = vadd.f32 %v2687_v11, %v2273_v15 }
 0x163   :  { %v2770_v22 = vadd.f32 %v2769_v57, %v4841_v19 }
 0x164   :  { %v2013_v9 = vpop.f32.mrf.mxu2 }
 0x165   :  { %v2047_v26 = vadd.f32 %v2013_v9, %v1820_v16 }
 0x166   :  { %v2240_v33 = vpop.f32.mrf.mxu3  ;;  %v1788_v23 = vpop.f32.mrf.mxu1 }
 0x167   :  { %v2274_v27 = vadd.f32 %v2240_v33, %v2047_v26  ;;  %v1821_v29 = vadd.f32 %v1788_v23, %v4647_v21 }
 0x168   :  { %v2692_v28 = vpop.f32.mrf.mxu0 }
 0x169   :  { %v4844_v48 = vadd.f32 %v2690_v18, %v2274_v27 }
 0x16b   :  { %v2771_v5 = vadd.f32 %v2770_v22, %v4844_v48 }
 0x16c   :  { %v2015_v20 = vpop.f32.mrf.mxu2 }
 0x16d   :  { %v2048_v25 = vadd.f32 %v2015_v20, %v1821_v29 }
 0x16e   :  { %v2242_v42 = vpop.f32.mrf.mxu3  ;;  %v1791_v13 = vpop.f32.mrf.mxu1 }
 0x16f   :  { %v2275_v34 = vadd.f32 %v2242_v42, %v2048_v25  ;;  %v1822_v44 = vadd.f32 %v1791_v13, %v4685_v6 }
 0x170   :  { %v2695_v35 = vpop.f32.mrf.mxu0 }
 0x171   :  { %v4848_v38 = vadd.f32 %v2692_v28, %v2275_v34 }
 0x173   :  { %v2772_v54 = vadd.f32 %v2771_v5, %v4848_v38 }
 0x174   :  { %v2018_v55 = vpop.f32.mrf.mxu2 }
 0x175   :  { %v2049_v50 = vadd.f32 %v2018_v55, %v1822_v44 }
 0x176   :  { %v2245_v51 = vpop.f32.mrf.mxu3  ;;  %v1793_v56 = vpop.f32.mrf.mxu1 }
 0x177   :  { %v2276_v49 = vadd.f32 %v2245_v51, %v2049_v50  ;;  %v1823_v32 = vadd.f32 %v1793_v56, %v4699_v40 }
 0x178   :  { %v2697_v59 = vpop.f32.mrf.mxu0 }
 0x179   :  { %v4852_v60 = vadd.f32 %v2695_v35, %v2276_v49 }
 0x17b   :  { %v2773_v21 = vadd.f32 %v2772_v54, %v4852_v60 }
 0x17c   :  { %v2020_v39 = vpop.f32.mrf.mxu2 }
 0x17d   :  { %v2050_v36 = vadd.f32 %v2020_v39, %v1823_v32 }
 0x17e   :  { %v2247_v52 = vpop.f32.mrf.mxu3  ;;  %v1796_v61 = vpop.f32.mrf.mxu1 }
 0x17f   :  { %v2277_v53 = vadd.f32 %v2247_v52, %v2050_v36  ;;  %v1824_v63 = vadd.f32 %v1796_v61, %v4731_v37 }
 0x180   :  { %v2700_v46 = vpop.f32.mrf.mxu0 }
 0x181   :  { %v4856_v58 = vadd.f32 %v2697_v59, %v2277_v53 }
 0x183   :  { %v2774_v6 = vadd.f32 %v2773_v21, %v4856_v58 }
 0x184   :  { %v2023_v1 = vpop.f32.mrf.mxu2 }
 0x185   :  { %v2051_v3 = vadd.f32 %v2023_v1, %v1824_v63 }
 0x186   :  { %v2250_v24 = vpop.f32.mrf.mxu3  ;;  %v1798_v4 = vpop.f32.mrf.mxu1 }
 0x187   :  { %v2278_v43 = vadd.f32 %v2250_v24, %v2051_v3  ;;  %v1825_v7 = vadd.f32 %v1798_v4, %v4743_v8 }
 0x188   :  { %v2702_v11 = vpop.f32.mrf.mxu0 }
 0x189   :  { %v4860_v57 = vadd.f32 %v2700_v46, %v2278_v43 }
 0x18b   :  { %v2775_v40 = vadd.f32 %v2774_v6, %v4860_v57 }
 0x18c   :  { %v2025_v12 = vpop.f32.mrf.mxu2 }
 0x18d   :  { %v2052_v2 = vadd.f32 %v2025_v12, %v1825_v7 }
 0x18e   :  { %v2252_v10 = vpop.f32.mrf.mxu3  ;;  %v1801_v15 = vpop.f32.mrf.mxu1 }
 0x18f   :  { %v2279_v16 = vadd.f32 %v2252_v10, %v2052_v2  ;;  %v1826_v9 = vadd.f32 %v1801_v15, %v4781_v62 }
 0x190   :  { %v2705_v18 = vpop.f32.mrf.mxu0 }
 0x191   :  { %v4864_v22 = vadd.f32 %v2702_v11, %v2279_v16 }
 0x193   :  { %v2776_v37 = vadd.f32 %v2775_v40, %v4864_v22 }
 0x194   :  { %v2028_v26 = vpop.f32.mrf.mxu2 }
 0x195   :  { %v2053_v33 = vadd.f32 %v2028_v26, %v1826_v9 }
 0x196   :  { %v2255_v23 = vpop.f32.mrf.mxu3  ;;  %v1803_v27 = vpop.f32.mrf.mxu1 }
 0x197   :  { %v2280_v28 = vadd.f32 %v2255_v23, %v2053_v33  ;;  %v1827_v20 = vadd.f32 %v1803_v27, %v4793_v31 }
 0x198   :  { %v2707_v5 = vpop.f32.mrf.mxu0 }
 0x199   :  { %v2730_v29 = vadd.f32 %v2705_v18, %v2280_v28 }
 0x19b   :  { %v2777_v8 = vadd.f32 %v2776_v37, %v2730_v29 }
 0x19c   :  { %v2030_v25 = vpop.f32.mrf.mxu2 }
 0x19d   :  { %v2054_v42 = vadd.f32 %v2030_v25, %v1827_v20 }
 0x19e   :  { %v2257_v13 = vpop.f32.mrf.mxu3  ;;  %v1806_v34 = vpop.f32.mrf.mxu1 }
 0x19f   :  { %v2281_v35 = vadd.f32 %v2257_v13, %v2054_v42  ;;  %v1828_v62 = vadd.f32 %v1806_v34, %v4804_v41 }
 0x1a0   :  { %v2710_v44 = vpop.f32.mrf.mxu0 }
 0x1a1   :  { %v2731_v54 = vadd.f32 %v2707_v5, %v2281_v35 }
 0x1a3   :  { %v2778_v55 = vadd.f32 %v2777_v8, %v2731_v54 }
 0x1a4   :  { %v2033_v50 = vpop.f32.mrf.mxu2 }
 0x1a5   :  { %v2055_v51 = vadd.f32 %v2033_v50, %v1828_v62 }
 0x1a6   :  { %v2260_v56 = vpop.f32.mrf.mxu3  ;;  %v1808_v49 = vpop.f32.mrf.mxu1 }
 0x1a7   :  { %v2282_v59 = vadd.f32 %v2260_v56, %v2055_v51  ;;  %v1829_v39 = vadd.f32 %v1808_v49, %v4819_v17 }
 0x1a8   :  { %v2712_v31 = vpop.f32.mrf.mxu0 }
 0x1a9   :  { %v2732_v21 = vadd.f32 %v2710_v44, %v2282_v59 }
 0x1ab   :  { %v2779_v32 = vadd.f32 %v2778_v55, %v2732_v21 }
 0x1ac   :  { %v2035_v36 = vpop.f32.mrf.mxu2 }
 0x1ad   :  { %v2056_v52 = vadd.f32 %v2035_v36, %v1829_v39 }
 0x1ae   :  { %v2262_v61 = vpop.f32.mrf.mxu3  ;;  %v1811_v53 = vpop.f32.mrf.mxu1 }
 0x1af   :  { %v2283_v46 = vadd.f32 %v2262_v61, %v2056_v52  ;;  %v1830_v1 = vadd.f32 %v1811_v53, %v4822_v30 }
 0x1b0   :  { %v2715_v4 = vpop.f32.mrf.mxu0 }
 0x1b1   :  { %v2733_v6 = vadd.f32 %v2712_v31, %v2283_v46 }
 0x1b3   :  { %v2780_v63 = vadd.f32 %v2779_v32, %v2733_v6 }
 0x1b4   :  { %v2038_v41 = vpop.f32.mrf.mxu2 }
 0x1b5   :  { %v2057_v3 = vadd.f32 %v2038_v41, %v1830_v1 }
 0x1b6   :  { %v2265_v24 = vpop.f32.mrf.mxu3  ;;  %v1813_v11 = vpop.f32.mrf.mxu1 }
 0x1b7   :  { %v2284_v43 = vadd.f32 %v2265_v24, %v2057_v3  ;;  %v1831_v17 = vadd.f32 %v1813_v11, %v4826_v45 }
 0x1b8   :  { %v2717_v16 = vpop.f32.mrf.mxu0 }
 0x1b9   :  { %v2734_v40 = vadd.f32 %v2715_v4, %v2284_v43 }
 0x1bb   :  { %v2781_v7 = vadd.f32 %v2780_v63, %v2734_v40 }
 0x1bc   :  { %v2040_v12 = vpop.f32.mrf.mxu2 }
 0x1bd   :  { %v2058_v2 = vadd.f32 %v2040_v12, %v1831_v17 }
 0x1be   :  { %v2267_v10 = vpop.f32.mrf.mxu3 }
 0x1bf   :  { %v2285_v15 = vadd.f32 %v2267_v10, %v2058_v2 }
 0x1c1   :  { %v2735_v18 = vadd.f32 %v2717_v16, %v2285_v15 }
 0x1c3   :  { %v2782_v37 = vadd.f32 %v2781_v7, %v2735_v18 }
 0x1c5   :  { %v2783_v9 = vrot.slane %v2782_v37, 4 }
 0x1c7   :  { %v2784_v26 = vadd.f32 %v2783_v9, %v2782_v37 }
 0x1c9   :  { %v2785_v30 = vrot.slane %v2784_v26, 2 }
 0x1cb   :  { %v2786_v33 = vadd.f32 %v2785_v30, %v2784_v26 }
 0x1cd   :  { %v2787_v23 = vrot.slane %v2786_v33, 1 }
 0x1cf   :  { %v2788_v27 = vadd.f32 %v2787_v23, %v2786_v33  ;;  %v2844_v33 = vld [vmem:[%s4999_s5] sm:$0x1] }
 0x1d1   :  { %v2789_v28 = vmul.f32 0.0078125, %v2788_v27 }
 0x1d3   :  { %v4874_v5 = vsub.f32 %v4829_v14, %v2789_v28  ;;  %v4877_v8 = vsub.f32 %v4832_v0, %v2789_v28  ;;  %v4880_v45 = vsub.f32 %v4837_v47, %v2789_v28  ;;  %v4883_v20 = vsub.f32 %v4841_v19, %v2789_v28 }
 0x1d4   :  { %v4886_v25 = vsub.f32 %v4844_v48, %v2789_v28  ;;  %v4889_v42 = vsub.f32 %v4848_v38, %v2789_v28  ;;  %v4892_v13 = vsub.f32 %v4852_v60, %v2789_v28  ;;  %v4895_v14 = vsub.f32 %v4856_v58, %v2789_v28 }
 0x1d5   :  { %v4898_v0 = vsub.f32 %v4860_v57, %v2789_v28  ;;  %v4901_v47 = vsub.f32 %v4864_v22, %v2789_v28  ;;  %v4903_v19 = vsub.f32 %v2730_v29, %v2789_v28  ;;  %v4905_v34 = vsub.f32 %v2731_v54, %v2789_v28 }
 0x1d6   :  { %v4907_v48 = vsub.f32 %v2732_v21, %v2789_v28  ;;  %v4909_v38 = vsub.f32 %v2733_v6, %v2789_v28  ;;  %v4911_v35 = vsub.f32 %v2734_v40, %v2789_v28  ;;  %v4913_v60 = vsub.f32 %v2735_v18, %v2789_v28 }
 0x1d7   :  { %v2806_v58 = vmul.f32 %v4874_v5, %v4874_v5  ;;  %v2807_v57 = vmul.f32 %v4877_v8, %v4877_v8  ;;  %v2808_v22 = vmul.f32 %v4880_v45, %v4880_v45  ;;  %v2809_v54 = vmul.f32 %v4883_v20, %v4883_v20 }
 0x1d8   :  { %v2810_v55 = vmul.f32 %v4886_v25, %v4886_v25  ;;  %v2811_v50 = vmul.f32 %v4889_v42, %v4889_v42  ;;  %v2812_v56 = vmul.f32 %v4892_v13, %v4892_v13  ;;  %v2813_v59 = vmul.f32 %v4895_v14, %v4895_v14 }
 0x1d9   :  { %v2822_v29 = vadd.f32 %v2807_v57, %v2806_v58  ;;  %v2814_v32 = vmul.f32 %v4898_v0, %v4898_v0  ;;  %v2815_v31 = vmul.f32 %v4901_v47, %v4901_v47  ;;  %v2816_v52 = vmul.f32 %v4903_v19, %v4903_v19 }
 0x1da   :  { %v2817_v53 = vmul.f32 %v4905_v34, %v4905_v34  ;;  %v2818_v6 = vmul.f32 %v4907_v48, %v4907_v48  ;;  %v2819_v1 = vmul.f32 %v4909_v38, %v4909_v38  ;;  %v2820_v3 = vmul.f32 %v4911_v35, %v4911_v35 }
 0x1db   :  { %v2823_v44 = vadd.f32 %v2822_v29, %v2808_v22  ;;  %v2821_v4 = vmul.f32 %v4913_v60, %v4913_v60 }
 0x1dd   :  { %v2824_v62 = vadd.f32 %v2823_v44, %v2809_v54  ;;  %v3811_v44 = vld [vmem:[%s4998_s6] ss:$0 sm:$0xff] }
 0x1df   :  { %v2825_v51 = vadd.f32 %v2824_v62, %v2810_v55 }
 0x1e1   :  { %v2826_v49 = vadd.f32 %v2825_v51, %v2811_v50 }
 0x1e3   :  { %v2827_v21 = vadd.f32 %v2826_v49, %v2812_v56 }
 0x1e5   :  { %v2828_v39 = vadd.f32 %v2827_v21, %v2813_v59 }
 0x1e7   :  { %v2829_v36 = vadd.f32 %v2828_v39, %v2814_v32 }
 0x1e9   :  { %v2830_v61 = vadd.f32 %v2829_v36, %v2815_v31 }
 0x1eb   :  { %v2831_v46 = vadd.f32 %v2830_v61, %v2816_v52 }
 0x1ed   :  { %v2832_v63 = vadd.f32 %v2831_v46, %v2817_v53 }
 0x1ef   :  { %v2833_v41 = vadd.f32 %v2832_v63, %v2818_v6 }
 0x1f1   :  { %v2834_v24 = vadd.f32 %v2833_v41, %v2819_v1 }
 0x1f3   :  { %v2835_v43 = vadd.f32 %v2834_v24, %v2820_v3 }
 0x1f5   :  { %v2836_v11 = vadd.f32 %v2835_v43, %v2821_v4 }
 0x1f7   :  { %v2837_v40 = vrot.slane %v2836_v11, 4 }
 0x1f9   :  { %v2838_v7 = vadd.f32 %v2837_v40, %v2836_v11 }
 0x1fb   :  { %v2839_v17 = vrot.slane %v2838_v7, 2 }
 0x1fd   :  { %v2840_v12 = vadd.f32 %v2839_v17, %v2838_v7 }
 0x1ff   :  { %v2841_v2 = vrot.slane %v2840_v12, 1 }
 0x201   :  { %v2842_v10 = vadd.f32 %v2841_v2, %v2840_v12 }
 0x203   :  { %v2843_v15 = vmul.f32 0.0078125, %v2842_v10 }
 0x205   :  { %v2845_v16 = vadd.f32 1e-05, %v2843_v15 }
 0x207   :  { %3812 = vrsqrt.f32 %v2845_v16  ;;  %vm2852_vm4 = vweird.f32 %v2845_v16 }
 0x20d   :  { %v3813_v18 = vpop.eup %3812 }
 0x20e   :  { %v2847_v37 = vmul.f32 %v3813_v18, %v2845_v16  ;;  %vm2853_vm3 = vweird.f32 %v3813_v18 }
 0x20f   :  { %vm2854_vm5 = vmor %vm2852_vm4, %vm2853_vm3 }
 0x210   :  { %v2848_v9 = vmul.f32 %v3813_v18, %v2847_v37 }
 0x212   :  { %v2849_v26 = vmul.f32 0.5, %v2848_v9 }
 0x214   :  { %v2850_v30 = vsub.f32 1.5, %v2849_v26 }
 0x216   :  { %v2851_v23 = vmul.f32 %v3813_v18, %v2850_v30 }
 0x218   :  { %v2855_v27 = vsel %vm2854_vm5, %v3813_v18, %v2851_v23 }
 0x219   :  { %v2856_v28 = vmul.f32 %v2855_v27, %v2844_v33 }
 0x21b   :  { %v2858_v58 = vperm.slane %v2856_v28, 0 }
 0x21d   :  { %v2860_v57 = vmul.f32 %v2858_v58, %v4874_v5  ;;  %v2861_v22 = vmul.f32 %v2858_v58, %v4877_v8  ;;  %v2862_v29 = vmul.f32 %v2858_v58, %v4880_v45  ;;  %v2863_v54 = vmul.f32 %v2858_v58, %v4883_v20 }
 0x21e   :  { %v2864_v55 = vmul.f32 %v2858_v58, %v4886_v25  ;;  %v2865_v62 = vmul.f32 %v2858_v58, %v4889_v42  ;;  %v2866_v50 = vmul.f32 %v2858_v58, %v4892_v13  ;;  %v2867_v51 = vmul.f32 %v2858_v58, %v4895_v14 }
 0x21f   :  { %v2868_v5 = vmul.f32 %v2858_v58, %v4898_v0  ;;  %v2869_v8 = vmul.f32 %v2858_v58, %v4901_v47  ;;  %v2870_v45 = vmul.f32 %v2858_v58, %v4903_v19  ;;  %v2871_v20 = vmul.f32 %v2858_v58, %v4905_v34 }
 0x220   :  { %v2872_v56 = vmul.f32 %v2858_v58, %v4907_v48  ;;  %v2873_v49 = vmul.f32 %v2858_v58, %v4909_v38  ;;  %v2874_v25 = vmul.f32 %v2858_v58, %v4911_v35  ;;  %v2875_v42 = vmul.f32 %v2858_v58, %v4913_v60 }
 0x221   :  { %v2880_v59 = vadd.f32 %v3811_v44, %v2860_v57  ;;  %v2881_v13 = vadd.f32 %v3811_v44, %v2861_v22  ;;  %v2882_v21 = vadd.f32 %v3811_v44, %v2862_v29  ;;  %v2883_v14 = vadd.f32 %v3811_v44, %v2863_v54 }
 0x222   :  { %v2884_v32 = vadd.f32 %v3811_v44, %v2864_v55  ;;  %v2885_v0 = vadd.f32 %v3811_v44, %v2865_v62  ;;  %v2886_v39 = vadd.f32 %v3811_v44, %v2866_v50  ;;  %v2887_v47 = vadd.f32 %v3811_v44, %v2867_v51 }
 0x223   :  { %v2888_v31 = vadd.f32 %v3811_v44, %v2868_v5  ;;  %v2889_v19 = vadd.f32 %v3811_v44, %v2869_v8  ;;  %v2890_v36 = vadd.f32 %v3811_v44, %v2870_v45  ;;  %v2891_v34 = vadd.f32 %v3811_v44, %v2871_v20 }
 0x224   :  { %v2892_v52 = vadd.f32 %v3811_v44, %v2872_v56  ;;  %v2893_v48 = vadd.f32 %v3811_v44, %v2873_v49  ;;  %v2894_v61 = vadd.f32 %v3811_v44, %v2874_v25  ;;  %v2895_v38 = vadd.f32 %v3811_v44, %v2875_v42 }
 0x225   :  { %v2896_v53 = vmax.f32 %v2880_v59, 0.0  ;;  %v2897_v35 = vmax.f32 %v2881_v13, 0.0  ;;  %v2898_v46 = vmax.f32 %v2882_v21, 0.0  ;;  %v2899_v60 = vmax.f32 %v2883_v14, 0.0 }
 0x226   :  { %v2900_v6 = vmax.f32 %v2884_v32, 0.0  ;;  %v2901_v63 = vmax.f32 %v2885_v0, 0.0  ;;  %v2902_v1 = vmax.f32 %v2886_v39, 0.0  ;;  %v2903_v41 = vmax.f32 %v2887_v47, 0.0 }
 0x227   :  { %v2904_v3 = vmax.f32 %v2888_v31, 0.0  ;;  %v2905_v24 = vmax.f32 %v2889_v19, 0.0  ;;  %v2906_v4 = vmax.f32 %v2890_v36, 0.0  ;;  %v2907_v43 = vmax.f32 %v2891_v34, 0.0 }
 0x228   :  { %v2908_v11 = vmax.f32 %v2892_v52, 0.0  ;;  %v2909_v40 = vmax.f32 %v2893_v48, 0.0  ;;  %v2910_v7 = vmax.f32 %v2894_v61, 0.0  ;;  %v2911_v17 = vmax.f32 %v2895_v38, 0.0 }
 0x229   :  { %v3743_v12 = vpack.c.bf16 %v2897_v35, %v2896_v53  ;;  %v3748_v2 = vpack.c.bf16 %v2899_v60, %v2898_v46  ;;  %v3753_v10 = vpack.c.bf16 %v2901_v63, %v2900_v6  ;;  %v3758_v15 = vpack.c.bf16 %v2903_v41, %v2902_v1 }
 0x22a   :  { %v3763_v16 = vpack.c.bf16 %v2905_v24, %v2904_v3  ;;  %v3768_v18 = vpack.c.bf16 %v2907_v43, %v2906_v4  ;;  %v3773_v37 = vpack.c.bf16 %v2909_v40, %v2908_v11  ;;  %v3778_v9 = vpack.c.bf16 %v2911_v17, %v2910_v7 }
 0x22b   :  { %3744 = vst [vmem:[%s5000_s7] sm:$0xff] %v3743_v12  }
 0x22c   :  { %3780 = vst [vmem:[%s5000_s7 + $0x8] sm:$0xff] %v3748_v2  }
 0x22d   :  { %3781 = vst [vmem:[%s5000_s7 + $0x10] sm:$0xff] %v3753_v10  }
 0x22e   :  { %3782 = vst [vmem:[%s5000_s7 + $0x18] sm:$0xff] %v3758_v15  }
 0x22f   :  { %3783 = vst [vmem:[%s5000_s7 + $0x20] sm:$0xff] %v3763_v16  }
 0x230   :  { %3784 = vst [vmem:[%s5000_s7 + $0x28] sm:$0xff] %v3768_v18  }
 0x231   :  { %3785 = vst [vmem:[%s5000_s7 + $0x30] sm:$0xff] %v3773_v37  }
 0x232   :  { %3786 = vst [vmem:[%s5000_s7 + $0x38] sm:$0xff] %v3778_v9  }

// kernel: basic_block_forward.3
= control target key start
LH: loop header
LB: loop body
LE: loop exit
PB: predicated region body
PF: predicated region fallthrough
CT: control target
= control target key end

     0   :  { %vm302_vm0 = vsmask.f32 3328  ;;  %vm303_vm1 = vsmask.f32 7440  ;;  %vm787_vm3 = vcmask 1042432   ;;  %vm788_vm4 = vcmask 1046532   ;;  %s6186_s2 = inlined_call_operand.vmem [shape: bf16[9,128,128], index: 2, kind: input, shape index: {}]   ;;  %s6187_s0 = inlined_call_operand.vmem [shape: bf16[2,10,10,128], index: 0, kind: input, shape index: {}]   ;;  %s6188_s5 = inlined_call_operand.vmem [shape: bf16[1,128,128], index: 5, kind: input, shape index: {}]   ;;  %s6189_s1 = inlined_call_operand.vmem [shape: bf16[2,8,8,128], index: 1, kind: input, shape index: {}]   ;;  %s6190_s7 = inlined_call_operand.vmem [shape: f32[1,128], index: 7, kind: input, shape index: {}]   ;;  %s6191_s4 = inlined_call_operand.vmem [shape: f32[1,128], index: 4, kind: input, shape index: {}]   ;;  %s6192_s6 = inlined_call_operand.vmem [shape: f32[1,128], index: 6, kind: input, shape index: {}]   ;;  %s6193_s3 = inlined_call_operand.vmem [shape: f32[1,128], index: 3, kind: input, shape index: {}]   ;;  %s6194_s8 = inlined_call_operand.vmem [shape: f32[2,8,8,128], index: 8, kind: output, shape index: {}]  }
   0x1   :  { %v4378_v0 = vld [vmem:[%s6186_s2 + $0x38] sm:$0xff]  ;;  %v4377_v2 = vld [vmem:[%s6186_s2 + $0x30] sm:$0xff]  ;;  %v4376_v4 = vld [vmem:[%s6186_s2 + $0x28] sm:$0xff] }
   0x2   :  { %v4386_v1 = vld [vmem:[%s6186_s2 + $0x78] sm:$0xff]  ;;  %4475 = vmatpush.bf16.msra.mxu2 %v4378_v0  ;;  %v4385_v3 = vld [vmem:[%s6186_s2 + $0x70] sm:$0xff]  ;;  %189 = vmatpush.bf16.msra.mxu0 %v4378_v0  ;;  %v4384_v5 = vld [vmem:[%s6186_s2 + $0x68] sm:$0xff] }
   0x3   :  { %642 = vmatpush.bf16.msra.mxu1 %v4386_v1  ;;  %4483 = vmatpush.bf16.msra.mxu3 %v4386_v1  ;;  %v270_v6 = vld [vmem:[%s6187_s0] sm:$0xf]  ;;  %v272_v7 = vld [vmem:[%s6187_s0 + $0x8] sm:$0xf]  ;;  %v271_v8 = vld [vmem:[%s6187_s0 + $0x4] sm:$0x1] }
   0x4   :  { %v306_v9 = vshrl.u32 %v270_v6, 16  ;;  %v309_v10 = vshll.u32 %v270_v6, 16  ;;  %v320_v11 = vshrl.u32 %v272_v7, 16  ;;  %v273_v12 = vld [vmem:[%s6187_s0 + $0xc] sm:$0x1]  ;;  %v323_v13 = vshll.u32 %v272_v7, 16  ;;  %vm4599_vm2 = vmor %vm302_vm0, %vm303_vm1 }
   0x5   :  { %v286_v14 = vld [vmem:[%s6187_s0 + $0x50] sm:$0xf]  ;;  %v288_v18 = vld [vmem:[%s6187_s0 + $0x58] sm:$0xf]  ;;  %v4375_v19 = vld [vmem:[%s6186_s2 + $0x20] sm:$0xff]  ;;  %v315_v24 = vshll.u32 %v271_v8, 16 }
   0x6   :  { %4476 = vmatpush.bf16.msra.mxu2 %v4377_v2  ;;  %190 = vmatpush.bf16.msra.mxu0 %v4377_v2  ;;  %v308_v15 = vrot.slane %v306_v9, 4  ;;  %v311_v16 = vrot.slane %v309_v10, 5  ;;  %v322_v17 = vrot.slane %v320_v11, 4  ;;  %v4383_v20 = vld [vmem:[%s6186_s2 + $0x60] sm:$0xff]  ;;  %v325_v21 = vrot.slane %v323_v13, 5  ;;  %v4374_v36 = vld [vmem:[%s6186_s2 + $0x18] sm:$0xff]  ;;  %vm4916_vm5 = vmor %vm787_vm3, %vm788_vm4 }
   0x7   :  { %643 = vmatpush.bf16.msra.mxu1 %v4385_v3  ;;  %4484 = vmatpush.bf16.msra.mxu3 %v4385_v3  ;;  %v418_v22 = vshrl.u32 %v286_v14, 16  ;;  %v421_v23 = vshll.u32 %v286_v14, 16  ;;  %v329_v25 = vshll.u32 %v273_v12, 16  ;;  %v432_v26 = vshrl.u32 %v288_v18, 16  ;;  %v287_v30 = vld [vmem:[%s6187_s0 + $0x54] sm:$0x1] }
   0x8   :  { %v435_v27 = vshll.u32 %v288_v18, 16  ;;  %v312_v28 = vor.u32 %v311_v16, %v308_v15  ;;  %v326_v29 = vor.u32 %v325_v21, %v322_v17  ;;  %v289_v31 = vld [vmem:[%s6187_s0 + $0x5c] sm:$0x1]  ;;  %v427_v39 = vshll.u32 %v287_v30, 16  ;;  %v4373_v46 = vld [vmem:[%s6186_s2 + $0x10] sm:$0xff]  ;;  %v4372_v1 = vld [vmem:[%s6186_s2 + $0x8] sm:$0xff] }
   0x9   :  { %v420_v32 = vrot.slane %v418_v22, 4  ;;  %v423_v33 = vrot.slane %v421_v23, 5  ;;  %v434_v34 = vrot.slane %v432_v26, 4  ;;  %v4382_v37 = vld [vmem:[%s6186_s2 + $0x58] sm:$0xff]  ;;  %v441_v41 = vshll.u32 %v289_v31, 16  ;;  %v4381_v49 = vld [vmem:[%s6186_s2 + $0x50] sm:$0xff] }
   0xa   :  { %4477 = vmatpush.bf16.msra.mxu2 %v4376_v4  ;;  %191 = vmatpush.bf16.msra.mxu0 %v4376_v4  ;;  %v437_v35 = vrot.slane %v435_v27, 5  ;;  %v313_v42 = vrot.slane %v312_v28, 4  ;;  %v317_v43 = vrot.slane %v315_v24, 5  ;;  %v327_v44 = vrot.slane %v326_v29, 4  ;;  %v274_v48 = vld [vmem:[%s6187_s0 + $0x10] sm:$0xf] }
   0xb   :  { %644 = vmatpush.bf16.msra.mxu1 %v4384_v5  ;;  %4485 = vmatpush.bf16.msra.mxu3 %v4384_v5  ;;  %v424_v38 = vor.u32 %v423_v33, %v420_v32  ;;  %v331_v45 = vrot.slane %v329_v25, 5  ;;  %v276_v50 = vld [vmem:[%s6187_s0 + $0x18] sm:$0xf]  ;;  %v290_v51 = vld [vmem:[%s6187_s0 + $0x60] sm:$0xf]  ;;  %v429_v53 = vrot.slane %v427_v39, 5 }
   0xc   :  { %v438_v40 = vor.u32 %v437_v35, %v434_v34  ;;  %v443_v55 = vrot.slane %v441_v41, 5  ;;  %v292_v56 = vld [vmem:[%s6187_s0 + $0x68] sm:$0xf]  ;;  %v318_v57 = vsel %vm4599_vm2, %v313_v42, %v317_v43  ;;  %v334_v59 = vshrl.u32 %v274_v48, 16  ;;  %v3597_v4 = vld [vmem:[%s6187_s0 + $0x50] sm:$0xf] }
   0xd   :  { %v425_v52 = vrot.slane %v424_v38, 4  ;;  %v332_v58 = vsel %vm4599_vm2, %v327_v44, %v331_v45  ;;  %v337_v60 = vshll.u32 %v274_v48, 16  ;;  %v348_v61 = vshrl.u32 %v276_v50, 16  ;;  %v4380_v2 = vld [vmem:[%s6186_s2 + $0x48] sm:$0xff]  ;;  %v4367_v5 = vld [vmem:[%s6187_s0 + $0x54] sm:$0xf0] }
   0xe   :  { %4478 = vmatpush.bf16.msra.mxu2 %v4375_v19  ;;  %192 = vmatpush.bf16.msra.mxu0 %v4375_v19  ;;  %v439_v54 = vrot.slane %v438_v40, 4  ;;  %v351_v62 = vshll.u32 %v276_v50, 16  ;;  %v446_v63 = vshrl.u32 %v290_v51, 16  ;;  %v449_v0 = vshll.u32 %v290_v51, 16  ;;  %v275_v9 = vld [vmem:[%s6187_s0 + $0x14] sm:$0x1] }
   0xf   :  { %645 = vmatpush.bf16.msra.mxu1 %v4383_v20  ;;  %4486 = vmatpush.bf16.msra.mxu3 %v4383_v20  ;;  %v460_v3 = vshrl.u32 %v292_v56, 16  ;;  %v562_v6 = vunpack.c.l.b16 %v318_v57  ;;  %v430_v7 = vsel %vm4599_vm2, %v425_v52, %v429_v53  ;;  %v563_v10 = vunpack.c.l.b16 %v332_v58  ;;  %v277_v11 = vld [vmem:[%s6187_s0 + $0x1c] sm:$0x1]  ;;  %v291_v17 = vld [vmem:[%s6187_s0 + $0x64] sm:$0x1]  ;;  %v4393_v48 = vld [vmem:[%s6186_s2 + $0xb0] sm:$0xff] }
  0x10   :  { %v444_v8 = vsel %vm4599_vm2, %v439_v54, %v443_v55  ;;  %v336_v12 = vrot.slane %v334_v59, 4  ;;  %v339_v13 = vrot.slane %v337_v60, 5  ;;  %v463_v14 = vshll.u32 %v292_v56, 16  ;;  %v4371_v20 = vld [vmem:[%s6186_s2] sm:$0xff]  ;;  %v293_v24 = vld [vmem:[%s6187_s0 + $0x6c] sm:$0x1] }
  0x11   :  { %v350_v15 = vrot.slane %v348_v61, 4  ;;  %v353_v16 = vrot.slane %v351_v62, 5  ;;  %v448_v18 = vrot.slane %v446_v63, 4  ;;  %v451_v19 = vrot.slane %v449_v0, 5  ;;  %v4379_v21 = vld [vmem:[%s6186_s2 + $0x40] sm:$0xff]  ;;  %v4394_v30 = vld [vmem:[%s6186_s2 + $0xb8] sm:$0xff] }
  0x12   :  { %4479 = vmatpush.bf16.msra.mxu2 %v4374_v36  ;;  %193 = vmatpush.bf16.msra.mxu0 %v4374_v36  ;;  %v570_v22 = vunpack.c.l.b16 %v430_v7  ;;  %v571_v23 = vunpack.c.l.b16 %v444_v8  ;;  %v462_v25 = vrot.slane %v460_v3, 4  ;;  %v465_v26 = vrot.slane %v463_v14, 5  ;;  %v3581_v28 = vld [vmem:[%s6187_s0] sm:$0xf]  ;;  %v4363_v29 = vld [vmem:[%s6187_s0 + $0x4] sm:$0xf0] }
  0x13   :  { %646 = vmatpush.bf16.msra.mxu1 %v4382_v37  ;;  %4487 = vmatpush.bf16.msra.mxu3 %v4382_v37  ;;  %v3598_v27 = vor.u32 %v4367_v5, %v3597_v4  ;;  %v4410_v31 = vld [vmem:[%s6186_s2 + $0xf8] sm:$0xff]  ;;  %v340_v32 = vor.u32 %v339_v13, %v336_v12  ;;  %v343_v33 = vshll.u32 %v275_v9, 16  ;;  %v357_v34 = vshll.u32 %v277_v11, 16  ;;  %v278_v43 = vld [vmem:[%s6187_s0 + $0x20] sm:$0xf]  ;;  %v4392_v62 = vld [vmem:[%s6186_s2 + $0xa8] sm:$0xff] }
  0x14   :  { %v455_v35 = vshll.u32 %v291_v17, 16  ;;  %v578_v36 = vpack.c.b16 %v563_v10, %v562_v6  ;;  %v354_v37 = vor.u32 %v353_v16, %v350_v15  ;;  %v452_v38 = vor.u32 %v451_v19, %v448_v18  ;;  %v4418_v44 = vld [vmem:[%s6186_s2 + $0x138] sm:$0xff]  ;;  %v4417_v63 = vld [vmem:[%s6186_s2 + $0x130] sm:$0xff]  ;;  %v4416_v7 = vld [vmem:[%s6186_s2 + $0x128] sm:$0xff] }
  0x15   :  { %v469_v39 = vshll.u32 %v293_v24, 16  ;;  %v582_v40 = vpack.c.b16 %v571_v23, %v570_v22  ;;  %v3582_v41 = vor.u32 %v4363_v29, %v3581_v28  ;;  %v466_v42 = vor.u32 %v465_v26, %v462_v25  ;;  %v4426_v45 = vld [vmem:[%s6186_s2 + $0x178] sm:$0xff]  ;;  %v4425_v0 = vld [vmem:[%s6186_s2 + $0x170] sm:$0xff]  ;;  %v4424_v10 = vld [vmem:[%s6186_s2 + $0x168] sm:$0xff] }
  0x16   :  { %4480 = vmatpush.bf16.msra.mxu2 %v4373_v46  ;;  %194 = vmatpush.bf16.msra.mxu0 %v4373_v46  ;;  %v280_v46 = vld [vmem:[%s6187_s0 + $0x28] sm:$0xf]  ;;  %v341_v50 = vrot.slane %v340_v32, 4  ;;  %v345_v51 = vrot.slane %v343_v33, 5  ;;  %v359_v52 = vrot.slane %v357_v34, 5  ;;  %v457_v53 = vrot.slane %v455_v35, 5 }
  0x17   :  { %647 = vmatpush.bf16.msra.mxu1 %v4381_v49  ;;  %4488 = vmatpush.bf16.msra.mxu3 %v4381_v49  ;;  %v4409_v49 = vld [vmem:[%s6186_s2 + $0xf0] sm:$0xff]  ;;  %v355_v54 = vrot.slane %v354_v37, 4  ;;  %v453_v55 = vrot.slane %v452_v38, 4  ;;  %v471_v56 = vrot.slane %v469_v39, 5  ;;  %v362_v57 = vshrl.u32 %v278_v43, 16  ;;  %v4407_v22 = vld [vmem:[%s6186_s2 + $0xe0] sm:$0xff] }
  0x18   :  { %v467_v58 = vrot.slane %v466_v42, 4  ;;  %v365_v59 = vshll.u32 %v278_v43, 16  ;;  %v376_v60 = vshrl.u32 %v280_v46, 16  ;;  %v379_v61 = vshll.u32 %v280_v46, 16  ;;  %v296_v3 = vld [vmem:[%s6187_s0 + $0x78] sm:$0xf] }
  0x19   :  { %v346_v4 = vsel %vm4599_vm2, %v341_v50, %v345_v51  ;;  %v360_v5 = vsel %vm4599_vm2, %v355_v54, %v359_v52  ;;  %v458_v6 = vsel %vm4599_vm2, %v453_v55, %v457_v53  ;;  %v364_v8 = vrot.slane %v362_v57, 4  ;;  %v279_v11 = vld [vmem:[%s6187_s0 + $0x24] sm:$0x1]  ;;  %v281_v15 = vld [vmem:[%s6187_s0 + $0x2c] sm:$0x1]  ;;  %v4390_v42 = vld [vmem:[%s6186_s2 + $0x98] sm:$0xff] }
  0x1a   :  { %4481 = vmatpush.bf16.msra.mxu2 %v4372_v1  ;;  %195 = vmatpush.bf16.msra.mxu0 %v4372_v1  ;;  %v4408_v1 = vld [vmem:[%s6186_s2 + $0xe8] sm:$0xff]  ;;  %v472_v9 = vsel %vm4599_vm2, %v467_v58, %v471_v56  ;;  %v367_v12 = vrot.slane %v365_v59, 5  ;;  %v378_v13 = vrot.slane %v376_v60, 4  ;;  %v381_v14 = vrot.slane %v379_v61, 5  ;;  %v295_v34 = vld [vmem:[%s6187_s0 + $0x74] sm:$0x1] }
  0x1b   :  { %648 = vmatpush.bf16.msra.mxu1 %v4380_v2  ;;  %4489 = vmatpush.bf16.msra.mxu3 %v4380_v2  ;;  %v294_v2 = vld [vmem:[%s6187_s0 + $0x70] sm:$0xf]  ;;  %v488_v18 = vshrl.u32 %v296_v3, 16  ;;  %v491_v19 = vshll.u32 %v296_v3, 16  ;;  %v4368_v23 = vld [vmem:[%s6187_s0 + $0x64] sm:$0xf0]  ;;  %v564_v24 = vunpack.c.l.b16 %v346_v4  ;;  %v565_v25 = vunpack.c.l.b16 %v360_v5 }
  0x1c   :  { %v474_v16 = vshrl.u32 %v294_v2, 16  ;;  %v477_v17 = vshll.u32 %v294_v2, 16  ;;  %v572_v26 = vunpack.c.l.b16 %v458_v6  ;;  %v371_v28 = vshll.u32 %v279_v11, 16  ;;  %v4415_v39 = vld [vmem:[%s6186_s2 + $0x120] sm:$0xff]  ;;  %v4406_v43 = vld [vmem:[%s6186_s2 + $0xd8] sm:$0xff]  ;;  %v4389_v59 = vld [vmem:[%s6186_s2 + $0x90] sm:$0xff] }
  0x1d   :  { %v573_v29 = vunpack.c.l.b16 %v472_v9  ;;  %v382_v32 = vor.u32 %v381_v14, %v378_v13  ;;  %v385_v33 = vshll.u32 %v281_v15, 16  ;;  %v490_v37 = vrot.slane %v488_v18, 4  ;;  %v4414_v57 = vld [vmem:[%s6186_s2 + $0x118] sm:$0xff]  ;;  %v4405_v60 = vld [vmem:[%s6186_s2 + $0xd0] sm:$0xff]  ;;  %v300_v2 = vld [vmem:[%s6187_s0 + $0x88] sm:$0xf] }
  0x1e   :  { %4482 = vmatpush.bf16.msra.mxu2 %v4371_v20  ;;  %196 = vmatpush.bf16.msra.mxu0 %v4371_v20  ;;  %v3601_v20 = vld [vmem:[%s6187_s0 + $0x60] sm:$0xf]  ;;  %v476_v35 = vrot.slane %v474_v16, 4  ;;  %v493_v38 = vrot.slane %v491_v19, 5  ;;  %v483_v52 = vshll.u32 %v295_v34, 16  ;;  %v4422_v58 = vld [vmem:[%s6186_s2 + $0x158] sm:$0xff] }
  0x1f   :  { %649 = vmatpush.bf16.msra.mxu1 %v4379_v21  ;;  %4490 = vmatpush.bf16.msra.mxu3 %v4379_v21  ;;  %v4391_v21 = vld [vmem:[%s6186_s2 + $0xa0] sm:$0xff]  ;;  %v387_v51 = vrot.slane %v385_v33, 5  ;;  %v383_v53 = vrot.slane %v382_v32, 4  ;;  %v282_v61 = vld [vmem:[%s6187_s0 + $0x30] sm:$0xf]  ;;  %v4388_v13 = vld [vmem:[%s6186_s2 + $0x88] sm:$0xff] }
  0x20   :  { %v494_v55 = vor.u32 %v493_v38, %v490_v37  ;;  %v390_v9 = vshrl.u32 %v282_v61, 16  ;;  %v4404_v14 = vld [vmem:[%s6186_s2 + $0xc8] sm:$0xff]  ;;  %v519_v18 = vshll.u32 %v300_v2, 16  ;;  %v3605_v19 = vld [vmem:[%s6187_s0 + $0x70] sm:$0xf]  ;;  %v4387_v32 = vld [vmem:[%s6186_s2 + $0x80] sm:$0xff] }
  0x21   :  { %217 = vmatmul.bf16.vlgmr.msra.gmra.mxu2 %v3598_v27  ;;  %197 = vmatmul.bf16.vlgmr.msra.gmra.mxu0 %v3582_v41  ;;  %v3585_v27 = vld [vmem:[%s6187_s0 + $0x10] sm:$0xf]  ;;  %v297_v41 = vld [vmem:[%s6187_s0 + $0x7c] sm:$0x1]  ;;  %v388_v3 = vsel %vm4599_vm2, %v383_v53, %v387_v51  ;;  %v4403_v33 = vld [vmem:[%s6186_s2 + $0xc0] sm:$0xff] }
  0x22   :  { %967 = vmatpush.bf16.msrb.mxu2 %v4394_v30  ;;  %650 = vmatmul.bf16.vlgmr.msra.gmra.mxu1 %v578_v36  ;;  %v4364_v30 = vld [vmem:[%s6187_s0 + $0x14] sm:$0xf0]  ;;  %v479_v36 = vrot.slane %v477_v17, 5  ;;  %v497_v56 = vshll.u32 %v297_v41, 16  ;;  %v495_v5 = vrot.slane %v494_v55, 4  ;;  %v516_v17 = vshrl.u32 %v300_v2, 16 }
  0x23   :  { %1194 = vmatpush.bf16.msrb.mxu3 %v4410_v31  ;;  %1644 = vmatpush.bf16.msrb.mxu0 %v4418_v44  ;;  %v368_v31 = vor.u32 %v367_v12, %v364_v8  ;;  %v3602_v44 = vor.u32 %v4368_v23, %v3601_v20  ;;  %v3586_v46 = vor.u32 %v4364_v30, %v3585_v27  ;;  %v4421_v8 = vld [vmem:[%s6186_s2 + $0x150] sm:$0xff]  ;;  %v4369_v20 = vld [vmem:[%s6187_s0 + $0x74] sm:$0xf0]  ;;  %v4412_v27 = vld [vmem:[%s6186_s2 + $0x108] sm:$0xff]  ;;  %v521_v38 = vrot.slane %v519_v18, 5 }
  0x24   :  { %670 = vmatmul.bf16.vlgmr.msra.gmra.mxu3 %v582_v40  ;;  %1966 = vmatpush.bf16.msrb.mxu1 %v4426_v45  ;;  %v4423_v40 = vld [vmem:[%s6186_s2 + $0x160] sm:$0xff]  ;;  %v579_v45 = vpack.c.b16 %v565_v25, %v564_v24  ;;  %v480_v54 = vor.u32 %v479_v36, %v476_v35  ;;  %v499_v6 = vrot.slane %v497_v56, 5  ;;  %v283_v25 = vld [vmem:[%s6187_s0 + $0x34] sm:$0x1]  ;;  %v285_v34 = vld [vmem:[%s6187_s0 + $0x3c] sm:$0x1] }
  0x25   :  { %v369_v50 = vrot.slane %v368_v31, 4  ;;  %v518_v37 = vrot.slane %v516_v17, 4  ;;  %v3589_v41 = vld [vmem:[%s6187_s0 + $0x20] sm:$0xf]  ;;  %v399_v51 = vshll.u32 %v283_v25, 16  ;;  %v413_v53 = vshll.u32 %v285_v34, 16 }
  0x26   :  { %968 = vmatpush.bf16.msrb.mxu2 %v4393_v48  ;;  %v373_v48 = vrot.slane %v371_v28, 5  ;;  %v481_v4 = vrot.slane %v480_v54, 4  ;;  %v500_v24 = vsel %vm4599_vm2, %v495_v5, %v499_v6  ;;  %v392_v28 = vrot.slane %v390_v9, 4  ;;  %v4450_v5 = vld [vmem:[%s6186_s2 + $0x1f8] sm:$0xff]  ;;  %v3609_v18 = vld [vmem:[%s6187_s0 + $0x80] sm:$0xf] }
  0x27   :  { %1195 = vmatpush.bf16.msrb.mxu3 %v4409_v49  ;;  %1645 = vmatpush.bf16.msrb.mxu0 %v4417_v63  ;;  %v583_v49 = vpack.c.b16 %v573_v29, %v572_v26  ;;  %v4420_v26 = vld [vmem:[%s6186_s2 + $0x148] sm:$0xff]  ;;  %v522_v56 = vor.u32 %v521_v38, %v518_v37  ;;  %v4458_v6 = vld [vmem:[%s6186_s2 + $0x238] sm:$0xff]  ;;  %v724_v34 = vld [vmem:[%s6187_s0 + $0x4] sm:$0x1] }
  0x28   :  { %1967 = vmatpush.bf16.msrb.mxu1 %v4425_v0  ;;  %v374_v63 = vsel %vm4599_vm2, %v369_v50, %v373_v48  ;;  %v485_v0 = vrot.slane %v483_v52, 5  ;;  %v4419_v48 = vld [vmem:[%s6186_s2 + $0x140] sm:$0xff]  ;;  %v4474_v9 = vld [vmem:[%s6188_s5 + $0x38] sm:$0xff] }
  0x29   :  { %v523_v2 = vrot.slane %v522_v56, 4  ;;  %v4366_v25 = vld [vmem:[%s6187_s0 + $0x34] sm:$0xf0] }
  0x2a   :  { %969 = vmatpush.bf16.msrb.mxu2 %v4392_v62  ;;  %v284_v62 = vld [vmem:[%s6187_s0 + $0x38] sm:$0xf]  ;;  %v486_v23 = vsel %vm4599_vm2, %v481_v4, %v485_v0 }
  0x2b   :  { %1196 = vmatpush.bf16.msrb.mxu3 %v4408_v1  ;;  %1646 = vmatpush.bf16.msrb.mxu0 %v4416_v7  ;;  %v298_v1 = vld [vmem:[%s6187_s0 + $0x80] sm:$0xf]  ;;  %v4413_v7 = vld [vmem:[%s6186_s2 + $0x110] sm:$0xff]  ;;  %v404_v11 = vshrl.u32 %v284_v62, 16  ;;  %v407_v12 = vshll.u32 %v284_v62, 16  ;;  %v4442_v4 = vld [vmem:[%s6186_s2 + $0x1b8] sm:$0xff] }
  0x2c   :  { %1968 = vmatpush.bf16.msrb.mxu1 %v4424_v10  ;;  %v393_v10 = vshll.u32 %v282_v61, 16  ;;  %v502_v15 = vshrl.u32 %v298_v1, 16  ;;  %v505_v16 = vshll.u32 %v298_v1, 16  ;;  %v401_v61 = vrot.slane %v399_v51, 5 }
  0x2d   :  { %v406_v30 = vrot.slane %v404_v11, 4  ;;  %v409_v31 = vrot.slane %v407_v12, 5 }
  0x2e   :  { %970 = vmatpush.bf16.msrb.mxu2 %v4391_v21  ;;  %v566_v21 = vunpack.c.l.b16 %v374_v63  ;;  %v395_v29 = vrot.slane %v393_v10, 5  ;;  %v504_v35 = vrot.slane %v502_v15, 4  ;;  %v507_v36 = vrot.slane %v505_v16, 5 }
  0x2f   :  { %1197 = vmatpush.bf16.msrb.mxu3 %v4407_v22  ;;  %1647 = vmatpush.bf16.msrb.mxu0 %v4415_v39  ;;  %v567_v22 = vunpack.c.l.b16 %v388_v3  ;;  %v574_v39 = vunpack.c.l.b16 %v486_v23  ;;  %v410_v52 = vor.u32 %v409_v31, %v406_v30  ;;  %v415_v63 = vrot.slane %v413_v53, 5  ;;  %v723_v31 = vld [vmem:[%s6187_s0] sm:$0xe] }
  0x30   :  { %1969 = vmatpush.bf16.msrb.mxu1 %v4423_v40  ;;  %v575_v40 = vunpack.c.l.b16 %v500_v24  ;;  %v396_v50 = vor.u32 %v395_v29, %v392_v28  ;;  %v508_v54 = vor.u32 %v507_v36, %v504_v35  ;;  %v3593_v24 = vld [vmem:[%s6187_s0 + $0x30] sm:$0xf]  ;;  %v725_v35 = vld [vmem:[%s6187_s0 + $0x8] sm:$0xe]  ;;  %v726_v36 = vld [vmem:[%s6187_s0 + $0xc] sm:$0x1] }
  0x31   :  { %222 = vmatmul.bf16.gmra.mxu2 %v3602_v44  ;;  %202 = vmatmul.bf16.gmra.mxu0 %v3586_v46  ;;  %v3606_v44 = vor.u32 %v4369_v20, %v3605_v19  ;;  %v4365_v46 = vld [vmem:[%s6187_s0 + $0x24] sm:$0xf0]  ;;  %v411_v62 = vrot.slane %v410_v52, 4  ;;  %v3594_v38 = vor.u32 %v4366_v25, %v3593_v24  ;;  %v3692_v51 = vrot.slane %v725_v35, 9  ;;  %v729_v24 = vld [vmem:[%s6187_s0 + $0x18] sm:$0xe] }
  0x32   :  { %971 = vmatpush.bf16.msrb.mxu2 %v4390_v42  ;;  %655 = vmatmul.bf16.gmra.mxu1 %v579_v45  ;;  %v299_v42 = vld [vmem:[%s6187_s0 + $0x84] sm:$0x1]  ;;  %v580_v45 = vpack.c.b16 %v567_v22, %v566_v21  ;;  %v509_v0 = vrot.slane %v508_v54, 4  ;;  %v4370_v19 = vld [vmem:[%s6187_s0 + $0x84] sm:$0xf0]  ;;  %v796_v52 = vrot.slane %v726_v36, 5 }
  0x33   :  { %1198 = vmatpush.bf16.msrb.mxu3 %v4406_v43  ;;  %1648 = vmatpush.bf16.msrb.mxu0 %v4414_v57  ;;  %v301_v43 = vld [vmem:[%s6187_s0 + $0x8c] sm:$0x1]  ;;  %v511_v55 = vshll.u32 %v299_v42, 16  ;;  %v416_v11 = vsel %vm4599_vm2, %v411_v62, %v415_v63  ;;  %v4441_v62 = vld [vmem:[%s6186_s2 + $0x1b0] sm:$0xff] }
  0x34   :  { %675 = vmatmul.bf16.gmra.mxu3 %v583_v49  ;;  %1970 = vmatpush.bf16.msrb.mxu1 %v4422_v58  ;;  %v4411_v49 = vld [vmem:[%s6186_s2 + $0x100] sm:$0xff]  ;;  %v525_v57 = vshll.u32 %v301_v43, 16  ;;  %v584_v58 = vpack.c.b16 %v575_v40, %v574_v39  ;;  %v569_v21 = vunpack.c.l.b16 %v416_v11  ;;  %v3931_v39 = vld [vmem:[%s6187_s0 + $0x8] sm:$0xe]  ;;  %v3932_v40 = vld [vmem:[%s6187_s0 + $0xc] sm:$0x1] }
  0x35   :  { %v513_v1 = vrot.slane %v511_v55, 5  ;;  %v3933_v43 = vld [vmem:[%s6187_s0 + $0x10] sm:$0xe]  ;;  %v3963_v53 = vrot.slane %v3931_v39, 9  ;;  %v1791_v55 = vrot.slane %v3932_v40, 5 }
  0x36   :  { %972 = vmatpush.bf16.msrb.mxu2 %v4389_v59  ;;  %v3590_v59 = vor.u32 %v4365_v46, %v3589_v41  ;;  %v527_v3 = vrot.slane %v525_v57, 5  ;;  %v3964_v56 = vrot.slane %v3933_v43, 9  ;;  %v4449_v63 = vld [vmem:[%s6186_s2 + $0x1f0] sm:$0xff]  ;;  %v3938_v39 = vld [vmem:[%s6187_s0 + $0x24] sm:$0x1] }
  0x37   :  { %1199 = vmatpush.bf16.msrb.mxu3 %v4405_v60  ;;  %1649 = vmatpush.bf16.msrb.mxu0 %v4413_v7  ;;  %v397_v60 = vrot.slane %v396_v50, 4  ;;  %v3851_v7 = vld [vmem:[%s6187_s0 + $0x8] sm:$0xf]  ;;  %v514_v12 = vsel %vm4599_vm2, %v509_v0, %v513_v1  ;;  %v792_v50 = vrot.slane %v724_v34, 5  ;;  %v4457_v0 = vld [vmem:[%s6186_s2 + $0x230] sm:$0xff] }
  0x38   :  { %1971 = vmatpush.bf16.msrb.mxu1 %v4421_v8  ;;  %v3853_v8 = vld [vmem:[%s6187_s0 + $0x10] sm:$0xf]  ;;  %v1311_v15 = vshll.u32 %v3851_v7, 16  ;;  %v576_v22 = vunpack.c.l.b16 %v514_v12 }
  0x39   :  { %v402_v10 = vsel %vm4599_vm2, %v397_v60, %v401_v61  ;;  %v1322_v16 = vshrl.u32 %v3853_v8, 16  ;;  %v1325_v17 = vshll.u32 %v3853_v8, 16  ;;  %v4473_v1 = vld [vmem:[%s6188_s5 + $0x30] sm:$0xff] }
  0x3a   :  { %973 = vmatpush.bf16.msrb.mxu2 %v4388_v13  ;;  %v528_v13 = vsel %vm4599_vm2, %v523_v2, %v527_v3  ;;  %v568_v20 = vunpack.c.l.b16 %v402_v10  ;;  %v1313_v28 = vrot.slane %v1311_v15, 5  ;;  %v3855_v2 = vld [vmem:[%s6187_s0 + $0x18] sm:$0xf]  ;;  %v3857_v3 = vld [vmem:[%s6187_s0 + $0x20] sm:$0xf] }
  0x3b   :  { %1200 = vmatpush.bf16.msrb.mxu3 %v4404_v14  ;;  %1650 = vmatpush.bf16.msrb.mxu0 %v4412_v27  ;;  %v1308_v14 = vshrl.u32 %v3851_v7, 16  ;;  %v577_v23 = vunpack.c.l.b16 %v528_v13  ;;  %v1324_v29 = vrot.slane %v1322_v16, 4  ;;  %v1327_v30 = vrot.slane %v1325_v17, 5  ;;  %v727_v10 = vld [vmem:[%s6187_s0 + $0x10] sm:$0xe] }
  0x3c   :  { %1972 = vmatpush.bf16.msrb.mxu1 %v4420_v26  ;;  %v3852_v26 = vld [vmem:[%s6187_s0 + $0xc] sm:$0x1]  ;;  %v581_v37 = vpack.c.b16 %v569_v21, %v568_v20  ;;  %v1336_v11 = vshrl.u32 %v3855_v2, 16  ;;  %v1339_v12 = vshll.u32 %v3855_v2, 16  ;;  %v1350_v13 = vshrl.u32 %v3857_v3, 16 }
  0x3d   :  { %v1310_v27 = vrot.slane %v1308_v14, 4  ;;  %v1317_v41 = vshll.u32 %v3852_v26, 16  ;;  %v585_v42 = vpack.c.b16 %v577_v23, %v576_v22  ;;  %v1328_v46 = vor.u32 %v1327_v30, %v1324_v29  ;;  %v3789_v17 = vld [vmem:[%s6187_s0 + $0x8] sm:$0xf]  ;;  %v728_v23 = vld [vmem:[%s6187_s0 + $0x14] sm:$0x1] }
  0x3e   :  { %974 = vmatpush.bf16.msrb.mxu2 %v4387_v32  ;;  %v3854_v32 = vld [vmem:[%s6187_s0 + $0x14] sm:$0x1]  ;;  %v1353_v14 = vshll.u32 %v3857_v3, 16  ;;  %v3693_v25 = vrot.slane %v727_v10, 9  ;;  %v730_v26 = vld [vmem:[%s6187_s0 + $0x1c] sm:$0x1] }
  0x3f   :  { %1201 = vmatpush.bf16.msrb.mxu3 %v4403_v33  ;;  %1651 = vmatpush.bf16.msrb.mxu0 %v4411_v49  ;;  %v3610_v33 = vor.u32 %v4370_v19, %v3609_v18  ;;  %v3691_v49 = vrot.slane %v723_v31, 9  ;;  %v1329_v60 = vrot.slane %v1328_v46, 4  ;;  %v4395_v18 = vld [vmem:[%s6187_s0 + $0xc] sm:$0xf0]  ;;  %v1352_v29 = vrot.slane %v1350_v13, 4 }
  0x40   :  { %1973 = vmatpush.bf16.msrb.mxu1 %v4419_v48  ;;  %v1331_v48 = vshll.u32 %v3854_v32, 16  ;;  %v1355_v30 = vrot.slane %v1353_v14, 5  ;;  %v3935_v31 = vld [vmem:[%s6187_s0 + $0x18] sm:$0xe]  ;;  %v3856_v32 = vld [vmem:[%s6187_s0 + $0x1c] sm:$0x1]  ;;  %v3790_v35 = vor.u32 %v4395_v18, %v3789_v17 }
  0x41   :  { %227 = vmatmul.bf16.gmra.mxu2 %v3606_v44  ;;  %207 = vmatmul.bf16.gmra.mxu0 %v3590_v59  ;;  %v3934_v44 = vld [vmem:[%s6187_s0 + $0x14] sm:$0x1]  ;;  %v804_v43 = vrot.slane %v730_v26, 5  ;;  %v3793_v14 = vld [vmem:[%s6187_s0 + $0x18] sm:$0xf] }
  0x42   :  { %660 = vmatmul.bf16.gmra.mxu1 %v580_v45  ;;  %2193 = vmatpush.bf16.msra.mxu2 %v4442_v4  ;;  %v1314_v45 = vor.u32 %v1313_v28, %v1310_v27  ;;  %v1795_v57 = vrot.slane %v3934_v44, 5  ;;  %v1333_v61 = vrot.slane %v1331_v48, 5  ;;  %v793_v4 = vsel %vm4916_vm5, %v3691_v49, %v792_v50  ;;  %v733_v26 = vld [vmem:[%s6187_s0 + $0x28] sm:$0xe] }
  0x43   :  { %2643 = vmatpush.bf16.msra.mxu3 %v4450_v5  ;;  %2965 = vmatpush.bf16.msra.mxu0 %v4458_v6  ;;  %v797_v5 = vsel %vm4916_vm5, %v3692_v51, %v796_v52  ;;  %v1792_v6 = vsel %vm4916_vm5, %v3963_v53, %v1791_v55  ;;  %v887_v15 = vunpack.c.l.b16 %v793_v4  ;;  %v1338_v27 = vrot.slane %v1336_v11, 4  ;;  %v3859_v53 = vld [vmem:[%s6187_s0 + $0x28] sm:$0xf]  ;;  %v3861_v55 = vld [vmem:[%s6187_s0 + $0x30] sm:$0xf] }
  0x44   :  { %680 = vmatmul.bf16.gmra.mxu3 %v584_v58  ;;  %3174 = vmatpush.bf16.msra.mxu1 %v4474_v9  ;;  %v1319_v58 = vrot.slane %v1317_v41, 5  ;;  %v1315_v59 = vrot.slane %v1314_v45, 4  ;;  %v1796_v7 = vsel %vm4916_vm5, %v3964_v56, %v1795_v57  ;;  %v1334_v9 = vsel %vm4599_vm2, %v1329_v60, %v1333_v61  ;;  %v4440_v57 = vld [vmem:[%s6186_s2 + $0x1a8] sm:$0xff] }
  0x45   :  { %v888_v16 = vunpack.c.l.b16 %v797_v5  ;;  %v1886_v19 = vunpack.c.l.b16 %v1792_v6  ;;  %v1887_v20 = vunpack.c.l.b16 %v1796_v7  ;;  %v1565_v22 = vunpack.c.l.b16 %v1334_v9 }
  0x46   :  { %2194 = vmatpush.bf16.msra.mxu2 %v4441_v62  ;;  %v1320_v8 = vsel %vm4599_vm2, %v1315_v59, %v1319_v58  ;;  %v1341_v28 = vrot.slane %v1339_v12, 5  ;;  %v800_v41 = vrot.slane %v728_v23, 5  ;;  %v1345_v45 = vshll.u32 %v3856_v32, 16  ;;  %v4448_v58 = vld [vmem:[%s6186_s2 + $0x1e8] sm:$0xff]  ;;  %v3862_v23 = vld [vmem:[%s6187_s0 + $0x34] sm:$0x1] }
  0x47   :  { %2644 = vmatpush.bf16.msra.mxu3 %v4449_v63  ;;  %2966 = vmatpush.bf16.msra.mxu0 %v4457_v0  ;;  %v1564_v21 = vunpack.c.l.b16 %v1320_v8  ;;  %v903_v34 = vpack.c.b16 %v888_v16, %v887_v15  ;;  %v1902_v36 = vpack.c.b16 %v1887_v20, %v1886_v19  ;;  %v1356_v46 = vor.u32 %v1355_v30, %v1352_v29  ;;  %v4456_v59 = vld [vmem:[%s6186_s2 + $0x228] sm:$0xff]  ;;  %v4396_v19 = vld [vmem:[%s6187_s0 + $0x1c] sm:$0xf0]  ;;  %v3941_v32 = vld [vmem:[%s6187_s0 + $0x30] sm:$0xe] }
  0x48   :  { %3175 = vmatpush.bf16.msra.mxu1 %v4473_v1  ;;  %v1342_v44 = vor.u32 %v1341_v28, %v1338_v27  ;;  %v3965_v49 = vrot.slane %v3935_v31, 9  ;;  %v1803_v52 = vrot.slane %v3938_v39, 5  ;;  %v801_v56 = vsel %vm4916_vm5, %v3693_v25, %v800_v41  ;;  %v4472_v0 = vld [vmem:[%s6188_s5 + $0x28] sm:$0xff]  ;;  %v732_v25 = vld [vmem:[%s6187_s0 + $0x24] sm:$0x1] }
  0x49   :  { %v1580_v40 = vpack.c.b16 %v1565_v22, %v1564_v21  ;;  %v1347_v61 = vrot.slane %v1345_v45, 5  ;;  %v1357_v62 = vrot.slane %v1356_v46, 4  ;;  %v1364_v4 = vshrl.u32 %v3859_v53, 16  ;;  %v3860_v22 = vld [vmem:[%s6187_s0 + $0x2c] sm:$0x1] }
  0x4a   :  { %v1343_v60 = vrot.slane %v1342_v44, 4  ;;  %2195 = vmatpush.bf16.msra.mxu2 %v4440_v57  ;;  %v1367_v5 = vshll.u32 %v3859_v53, 16  ;;  %v1378_v6 = vshrl.u32 %v3861_v55, 16  ;;  %v1381_v7 = vshll.u32 %v3861_v55, 16  ;;  %v734_v29 = vld [vmem:[%s6187_s0 + $0x2c] sm:$0x1] }
  0x4b   :  { %2645 = vmatpush.bf16.msra.mxu3 %v4448_v58  ;;  %2967 = vmatpush.bf16.msra.mxu0 %v4456_v59  ;;  %v889_v10 = vunpack.c.l.b16 %v801_v56  ;;  %v1366_v15 = vrot.slane %v1364_v4, 4  ;;  %v3939_v30 = vld [vmem:[%s6187_s0 + $0x28] sm:$0xe]  ;;  %v3940_v31 = vld [vmem:[%s6187_s0 + $0x2c] sm:$0x1]  ;;  %v808_v41 = vrot.slane %v732_v25, 5 }
  0x4c   :  { %3176 = vmatpush.bf16.msra.mxu1 %v4472_v0  ;;  %v1348_v8 = vsel %vm4599_vm2, %v1343_v60, %v1347_v61  ;;  %v1369_v16 = vrot.slane %v1367_v5, 5  ;;  %v1380_v17 = vrot.slane %v1378_v6, 4  ;;  %v1383_v18 = vrot.slane %v1381_v7, 5  ;;  %v4439_v53 = vld [vmem:[%s6186_s2 + $0x1a0] sm:$0xff]  ;;  %v3863_v57 = vld [vmem:[%s6187_s0 + $0x38] sm:$0xf] }
  0x4d   :  { %v1566_v20 = vunpack.c.l.b16 %v1348_v8  ;;  %v3967_v44 = vrot.slane %v3939_v30, 9  ;;  %v1807_v45 = vrot.slane %v3940_v31, 5  ;;  %v3968_v46 = vrot.slane %v3941_v32, 9  ;;  %v4447_v55 = vld [vmem:[%s6186_s2 + $0x1e0] sm:$0xff]  ;;  %v3797_v8 = vld [vmem:[%s6187_s0 + $0x28] sm:$0xf] }
  0x4e   :  { %v4455_v56 = vld [vmem:[%s6186_s2 + $0x220] sm:$0xff]  ;;  %2196 = vmatpush.bf16.msra.mxu2 %v4439_v53 }
  0x4f   :  { %v3865_v58 = vld [vmem:[%s6187_s0 + $0x40] sm:$0xf]  ;;  %2646 = vmatpush.bf16.msra.mxu3 %v4447_v55  ;;  %2968 = vmatpush.bf16.msra.mxu0 %v4455_v56  ;;  %v3946_v31 = vld [vmem:[%s6187_s0 + $0x44] sm:$0x1] }
  0x50   :  { %v4471_v59 = vld [vmem:[%s6188_s5 + $0x20] sm:$0xff]  ;;  %v1406_v4 = vshrl.u32 %v3865_v58, 16  ;;  %v1409_v5 = vshll.u32 %v3865_v58, 16 }
  0x51   :  { %232 = vmatmul.bf16.gmra.mxu2 %v3610_v33  ;;  %212 = vmatmul.bf16.gmra.mxu0 %v3594_v38  ;;  %v3858_v33 = vld [vmem:[%s6187_s0 + $0x24] sm:$0x1]  ;;  %v3937_v38 = vld [vmem:[%s6187_s0 + $0x20] sm:$0xe] }
  0x52   :  { %665 = vmatmul.bf16.gmra.mxu1 %v581_v37  ;;  %v3936_v37 = vld [vmem:[%s6187_s0 + $0x1c] sm:$0x1]  ;;  %v1359_v48 = vshll.u32 %v3858_v33, 16  ;;  %v3966_v51 = vrot.slane %v3937_v38, 9  ;;  %v3942_v33 = vld [vmem:[%s6187_s0 + $0x34] sm:$0x1]  ;;  %v3794_v38 = vor.u32 %v4396_v19, %v3793_v14 }
  0x53   :  { %v1799_v50 = vrot.slane %v3936_v37, 5  ;;  %v1387_v37 = vshll.u32 %v3862_v23, 16  ;;  %3177 = vmatpush.bf16.msra.mxu1 %v4471_v59  ;;  %v3866_v19 = vld [vmem:[%s6187_s0 + $0x44] sm:$0x1]  ;;  %v3945_v30 = vld [vmem:[%s6187_s0 + $0x40] sm:$0xe] }
  0x54   :  { %685 = vmatmul.bf16.gmra.mxu3 %v585_v42  ;;  %v3694_v42 = vrot.slane %v729_v24, 9  ;;  %v1361_v63 = vrot.slane %v1359_v48, 5  ;;  %v1804_v3 = vsel %vm4916_vm5, %v3966_v51, %v1803_v52  ;;  %v731_v24 = vld [vmem:[%s6187_s0 + $0x20] sm:$0xe]  ;;  %v1811_v48 = vrot.slane %v3942_v33, 5 }
  0x55   :  { %v1800_v2 = vsel %vm4916_vm5, %v3965_v49, %v1799_v50  ;;  %v1889_v13 = vunpack.c.l.b16 %v1804_v3  ;;  %v1389_v52 = vrot.slane %v1387_v37, 5  ;;  %v1395_v3 = vshll.u32 %v3863_v57, 16 }
  0x56   :  { %v805_v1 = vsel %vm4916_vm5, %v3694_v42, %v804_v43  ;;  %v1362_v9 = vsel %vm4599_vm2, %v1357_v62, %v1361_v63  ;;  %v1888_v12 = vunpack.c.l.b16 %v1800_v2  ;;  %v3696_v42 = vrot.slane %v733_v26, 9 }
  0x57   :  { %v890_v11 = vunpack.c.l.b16 %v805_v1  ;;  %v1567_v21 = vunpack.c.l.b16 %v1362_v9  ;;  %v812_v43 = vrot.slane %v734_v29, 5  ;;  %v1808_v62 = vsel %vm4916_vm5, %v3967_v44, %v1807_v45  ;;  %v3944_v29 = vld [vmem:[%s6187_s0 + $0x3c] sm:$0x1] }
  0x58   :  { %v1903_v28 = vpack.c.b16 %v1889_v13, %v1888_v12  ;;  %v1812_v63 = vsel %vm4916_vm5, %v3968_v46, %v1811_v48  ;;  %v1392_v2 = vshrl.u32 %v3863_v57, 16  ;;  %v1890_v9 = vunpack.c.l.b16 %v1808_v62  ;;  %v4397_v13 = vld [vmem:[%s6187_s0 + $0x2c] sm:$0xf0] }
  0x59   :  { %v904_v27 = vpack.c.b16 %v890_v11, %v889_v10  ;;  %v1581_v39 = vpack.c.b16 %v1567_v21, %v1566_v20  ;;  %v813_v61 = vsel %vm4916_vm5, %v3696_v42, %v812_v43  ;;  %v1891_v10 = vunpack.c.l.b16 %v1812_v63  ;;  %v735_v20 = vld [vmem:[%s6187_s0 + $0x30] sm:$0xe]  ;;  %v736_v21 = vld [vmem:[%s6187_s0 + $0x34] sm:$0x1] }
  0x5a   :  { %v892_v7 = vunpack.c.l.b16 %v813_v61  ;;  %v1394_v14 = vrot.slane %v1392_v2, 4  ;;  %v816_v37 = vrot.slane %v736_v21, 5  ;;  %v3970_v42 = vrot.slane %v3945_v30, 9 }
  0x5b   :  { %v1904_v25 = vpack.c.b16 %v1891_v10, %v1890_v9  ;;  %v1819_v43 = vrot.slane %v3946_v31, 5 }
  0x5d   :  { %v1820_v57 = vsel %vm4916_vm5, %v3970_v42, %v1819_v43  ;;  %v4445_v42 = vld [vmem:[%s6186_s2 + $0x1d0] sm:$0xff] }
  0x61   :  { %975 = vmatmul.bf16.vlgmr.msrb.gmra.mxu2 %v903_v34  ;;  %1652 = vmatmul.bf16.vlgmr.msrb.gmra.mxu0 %v1580_v40  ;;  %v1370_v34 = vor.u32 %v1369_v16, %v1366_v15  ;;  %v3695_v40 = vrot.slane %v731_v24, 9  ;;  %v1397_v15 = vrot.slane %v1395_v3, 5  ;;  %v1408_v16 = vrot.slane %v1406_v4, 4 }
  0x62   :  { %1974 = vmatmul.bf16.vlgmr.msrb.gmra.mxu1 %v1902_v36  ;;  %v1384_v36 = vor.u32 %v1383_v18, %v1380_v17  ;;  %v1411_v17 = vrot.slane %v1409_v5, 5  ;;  %v3864_v18 = vld [vmem:[%s6187_s0 + $0x3c] sm:$0x1]  ;;  %v3798_v24 = vor.u32 %v4397_v13, %v3797_v8  ;;  %v1893_v4 = vunpack.c.l.b16 %v1820_v57  ;;  %v3801_v5 = vld [vmem:[%s6187_s0 + $0x38] sm:$0xf] }
  0x63   :  { %v1371_v49 = vrot.slane %v1370_v34, 4  ;;  %v809_v60 = vsel %vm4916_vm5, %v3695_v40, %v808_v41  ;;  %v1398_v32 = vor.u32 %v1397_v15, %v1394_v14  ;;  %v1401_v33 = vshll.u32 %v3864_v18, 16  ;;  %v4398_v8 = vld [vmem:[%s6187_s0 + $0x3c] sm:$0xf0]  ;;  %v739_v13 = vld [vmem:[%s6187_s0 + $0x50] sm:$0xe] }
  0x64   :  { %1202 = vmatmul.bf16.vlgmr.msrb.gmra.mxu3 %v3790_v35  ;;  %v1373_v35 = vshll.u32 %v3860_v22, 16  ;;  %v1385_v51 = vrot.slane %v1384_v36, 4  ;;  %v891_v6 = vunpack.c.l.b16 %v809_v60  ;;  %v737_v22 = vld [vmem:[%s6187_s0 + $0x38] sm:$0xe]  ;;  %v1412_v34 = vor.u32 %v1411_v17, %v1408_v16  ;;  %v3868_v14 = vld [vmem:[%s6187_s0 + $0x5c] sm:$0x1] }
  0x65   :  { %v3697_v36 = vrot.slane %v735_v20, 9  ;;  %v1815_v41 = vrot.slane %v3944_v29, 5  ;;  %v1399_v44 = vrot.slane %v1398_v32, 4  ;;  %v1403_v45 = vrot.slane %v1401_v33, 5  ;;  %v3870_v15 = vld [vmem:[%s6187_s0 + $0x64] sm:$0x1] }
  0x66   :  { %v1375_v50 = vrot.slane %v1373_v35, 5  ;;  %v1390_v1 = vsel %vm4599_vm2, %v1385_v51, %v1389_v52  ;;  %v905_v23 = vpack.c.b16 %v892_v7, %v891_v6  ;;  %v1415_v35 = vshll.u32 %v3866_v19, 16  ;;  %v3867_v51 = vld [vmem:[%s6187_s0 + $0x58] sm:$0xf]  ;;  %v3869_v52 = vld [vmem:[%s6187_s0 + $0x60] sm:$0xf] }
  0x67   :  { %v1569_v12 = vunpack.c.l.b16 %v1390_v1  ;;  %v1413_v46 = vrot.slane %v1412_v34, 4  ;;  %v817_v53 = vsel %vm4916_vm5, %v3697_v36, %v816_v37  ;;  %v1404_v58 = vsel %vm4599_vm2, %v1399_v44, %v1403_v45  ;;  %v740_v18 = vld [vmem:[%s6187_s0 + $0x54] sm:$0x1]  ;;  %v741_v19 = vld [vmem:[%s6187_s0 + $0x58] sm:$0xe] }
  0x68   :  { %v1376_v0 = vsel %vm4599_vm2, %v1371_v49, %v1375_v50  ;;  %v1417_v48 = vrot.slane %v1415_v35, 5  ;;  %v4438_v49 = vld [vmem:[%s6186_s2 + $0x198] sm:$0xff]  ;;  %v1420_v60 = vshrl.u32 %v3867_v51, 16  ;;  %v1423_v61 = vshll.u32 %v3867_v51, 16 }
  0x69   :  { %v1568_v11 = vunpack.c.l.b16 %v1376_v0  ;;  %v4446_v50 = vld [vmem:[%s6186_s2 + $0x1d8] sm:$0xff]  ;;  %2197 = vmatpush.bf16.msra.mxu2 %v4438_v49  ;;  %v1434_v62 = vshrl.u32 %v3869_v52, 16  ;;  %v1437_v63 = vshll.u32 %v3869_v52, 16  ;;  %v893_v1 = vunpack.c.l.b16 %v817_v53 }
  0x6a   :  { %2647 = vmatpush.bf16.msra.mxu3 %v4446_v50  ;;  %v1418_v59 = vsel %vm4599_vm2, %v1413_v46, %v1417_v48  ;;  %v4454_v0 = vld [vmem:[%s6186_s2 + $0x218] sm:$0xff]  ;;  %v1570_v6 = vunpack.c.l.b16 %v1404_v58  ;;  %v1422_v9 = vrot.slane %v1420_v60, 4  ;;  %v1425_v10 = vrot.slane %v1423_v61, 5  ;;  %v3873_v48 = vld [vmem:[%s6187_s0 + $0x70] sm:$0xf] }
  0x6b   :  { %v1582_v26 = vpack.c.b16 %v1569_v12, %v1568_v11  ;;  %v1571_v7 = vunpack.c.l.b16 %v1418_v59  ;;  %2969 = vmatpush.bf16.msra.mxu0 %v4454_v0  ;;  %v1436_v11 = vrot.slane %v1434_v62, 4  ;;  %v1439_v12 = vrot.slane %v1437_v63, 5  ;;  %v742_v20 = vld [vmem:[%s6187_s0 + $0x5c] sm:$0x1]  ;;  %v4453_v62 = vld [vmem:[%s6186_s2 + $0x210] sm:$0xff] }
  0x6c   :  { %v3802_v21 = vor.u32 %v4398_v8, %v3801_v5  ;;  %v1429_v29 = vshll.u32 %v3868_v14, 16  ;;  %v1443_v31 = vshll.u32 %v3870_v15, 16  ;;  %v3699_v32 = vrot.slane %v739_v13, 9  ;;  %v745_v13 = vld [vmem:[%s6187_s0 + $0x68] sm:$0xe] }
  0x6d   :  { %v1440_v30 = vor.u32 %v1439_v12, %v1436_v11  ;;  %v824_v33 = vrot.slane %v740_v18, 5  ;;  %v3700_v34 = vrot.slane %v741_v19, 9  ;;  %v828_v35 = vrot.slane %v742_v20, 5  ;;  %v3874_v11 = vld [vmem:[%s6187_s0 + $0x74] sm:$0x1] }
  0x6e   :  { %v1431_v44 = vrot.slane %v1429_v29, 5  ;;  %v1445_v46 = vrot.slane %v1443_v31, 5  ;;  %2648 = vmatpush.bf16.msra.mxu3 %v4445_v42  ;;  %v1465_v57 = vshll.u32 %v3873_v48, 16  ;;  %v744_v12 = vld [vmem:[%s6187_s0 + $0x64] sm:$0x1] }
  0x6f   :  { %v1441_v45 = vrot.slane %v1440_v30, 4  ;;  %v825_v49 = vsel %vm4916_vm5, %v3699_v32, %v824_v33  ;;  %v829_v50 = vsel %vm4916_vm5, %v3700_v34, %v828_v35  ;;  %2970 = vmatpush.bf16.msra.mxu0 %v4453_v62  ;;  %v746_v14 = vld [vmem:[%s6187_s0 + $0x6c] sm:$0x1]  ;;  %v832_v31 = vrot.slane %v744_v12, 5 }
  0x70   :  { %v895_v60 = vunpack.c.l.b16 %v825_v49  ;;  %v896_v61 = vunpack.c.l.b16 %v829_v50  ;;  %v1467_v8 = vrot.slane %v1465_v57, 5  ;;  %v3952_v18 = vld [vmem:[%s6187_s0 + $0x6c] sm:$0x1]  ;;  %v3702_v32 = vrot.slane %v745_v13, 9 }
  0x71   :  { %980 = vmatmul.bf16.gmra.mxu2 %v904_v27  ;;  %1657 = vmatmul.bf16.gmra.mxu0 %v1581_v39  ;;  %v738_v27 = vld [vmem:[%s6187_s0 + $0x3c] sm:$0x1]  ;;  %v1446_v59 = vsel %vm4599_vm2, %v1441_v45, %v1445_v46  ;;  %v836_v34 = vrot.slane %v746_v14, 5  ;;  %v4444_v45 = vld [vmem:[%s6186_s2 + $0x1c8] sm:$0xff]  ;;  %v3877_v46 = vld [vmem:[%s6187_s0 + $0x80] sm:$0xf] }
  0x72   :  { %1979 = vmatmul.bf16.gmra.mxu1 %v1903_v28  ;;  %v3943_v28 = vld [vmem:[%s6187_s0 + $0x38] sm:$0xe]  ;;  %v820_v39 = vrot.slane %v738_v27, 5  ;;  %v3950_v27 = vld [vmem:[%s6187_s0 + $0x64] sm:$0x1]  ;;  %v1573_v5 = vunpack.c.l.b16 %v1446_v59  ;;  %v907_v15 = vpack.c.b16 %v896_v61, %v895_v60  ;;  %2649 = vmatpush.bf16.msra.mxu3 %v4444_v45  ;;  %v1490_v61 = vshrl.u32 %v3877_v46, 16 }
  0x73   :  { %v3969_v40 = vrot.slane %v3943_v28, 9  ;;  %v1426_v28 = vor.u32 %v1425_v10, %v1422_v9  ;;  %v4399_v9 = vld [vmem:[%s6187_s0 + $0x5c] sm:$0xf0]  ;;  %v837_v50 = vsel %vm4916_vm5, %v3702_v32, %v836_v34  ;;  %v1493_v62 = vshll.u32 %v3877_v46, 16  ;;  %v747_v14 = vld [vmem:[%s6187_s0 + $0x70] sm:$0xe] }
  0x74   :  { %1207 = vmatmul.bf16.gmra.mxu3 %v3794_v38  ;;  %v3698_v38 = vrot.slane %v737_v22, 9  ;;  %v1583_v22 = vpack.c.b16 %v1571_v7, %v1570_v6  ;;  %v3872_v6 = vld [vmem:[%s6187_s0 + $0x6c] sm:$0x1]  ;;  %v743_v10 = vld [vmem:[%s6187_s0 + $0x60] sm:$0xe]  ;;  %v1492_v12 = vrot.slane %v1490_v61, 4 }
  0x75   :  { %v1816_v56 = vsel %vm4916_vm5, %v3969_v40, %v1815_v41  ;;  %v4437_v40 = vld [vmem:[%s6186_s2 + $0x190] sm:$0xff]  ;;  %v3871_v41 = vld [vmem:[%s6187_s0 + $0x68] sm:$0xf]  ;;  %v1427_v43 = vrot.slane %v1426_v28, 4  ;;  %v1457_v20 = vshll.u32 %v3872_v6, 16  ;;  %v3701_v30 = vrot.slane %v743_v10, 9 }
  0x76   :  { %v821_v55 = vsel %vm4916_vm5, %v3698_v38, %v820_v39  ;;  %v1892_v3 = vunpack.c.l.b16 %v1816_v56  ;;  %v1827_v39 = vrot.slane %v3950_v27, 5  ;;  %2198 = vmatpush.bf16.msra.mxu2 %v4437_v40  ;;  %v1448_v51 = vshrl.u32 %v3871_v41, 16  ;;  %v4469_v28 = vld [vmem:[%s6188_s5 + $0x10] sm:$0xff]  ;;  %v3809_v6 = vld [vmem:[%s6187_s0 + $0x68] sm:$0xf] }
  0x77   :  { %v894_v2 = vunpack.c.l.b16 %v821_v55  ;;  %v1451_v52 = vshll.u32 %v3871_v41, 16  ;;  %v1462_v56 = vshrl.u32 %v3873_v48, 16  ;;  %v1432_v58 = vsel %vm4599_vm2, %v1427_v43, %v1431_v44  ;;  %v4436_v43 = vld [vmem:[%s6186_s2 + $0x188] sm:$0xff]  ;;  %v3875_v44 = vld [vmem:[%s6187_s0 + $0x78] sm:$0xf] }
  0x78   :  { %v1905_v17 = vpack.c.b16 %v1893_v4, %v1892_v3  ;;  %v3805_v3 = vld [vmem:[%s6187_s0 + $0x58] sm:$0xf]  ;;  %v1572_v4 = vunpack.c.l.b16 %v1432_v58  ;;  %v1471_v27 = vshll.u32 %v3874_v11, 16  ;;  %v1459_v40 = vrot.slane %v1457_v20, 5  ;;  %v3958_v32 = vld [vmem:[%s6187_s0 + $0x84] sm:$0x1] }
  0x79   :  { %v906_v16 = vpack.c.b16 %v894_v2, %v893_v1  ;;  %v1450_v1 = vrot.slane %v1448_v51, 4  ;;  %v1453_v2 = vrot.slane %v1451_v52, 5  ;;  %v1464_v7 = vrot.slane %v1462_v56, 4  ;;  %v749_v20 = vld [vmem:[%s6187_s0 + $0x78] sm:$0xe] }
  0x7a   :  { %v1473_v42 = vrot.slane %v1471_v27, 5  ;;  %v833_v49 = vsel %vm4916_vm5, %v3701_v30, %v832_v31  ;;  %2199 = vmatpush.bf16.msra.mxu2 %v4436_v43  ;;  %v1476_v56 = vshrl.u32 %v3875_v44, 16  ;;  %v1479_v57 = vshll.u32 %v3875_v44, 16  ;;  %v3956_v27 = vld [vmem:[%s6187_s0 + $0x7c] sm:$0x1] }
  0x7b   :  { %v1454_v19 = vor.u32 %v1453_v2, %v1450_v1  ;;  %v898_v2 = vunpack.c.l.b16 %v837_v50  ;;  %v1495_v13 = vrot.slane %v1493_v62, 5  ;;  %v1839_v45 = vrot.slane %v3956_v27, 5  ;;  %v3880_v27 = vld [vmem:[%s6187_s0 + $0x8c] sm:$0x1] }
  0x7c   :  { %v1478_v10 = vrot.slane %v1476_v56, 4  ;;  %v1481_v11 = vrot.slane %v1479_v57, 5  ;;  %v3879_v57 = vld [vmem:[%s6187_s0 + $0x88] sm:$0xf] }
  0x81   :  { %985 = vmatmul.bf16.gmra.mxu2 %v905_v23  ;;  %1662 = vmatmul.bf16.gmra.mxu0 %v1582_v26  ;;  %v3947_v23 = vld [vmem:[%s6187_s0 + $0x58] sm:$0xe]  ;;  %v3949_v26 = vld [vmem:[%s6187_s0 + $0x60] sm:$0xe] }
  0x82   :  { %1984 = vmatmul.bf16.gmra.mxu1 %v1904_v25  ;;  %v4470_v25 = vld [vmem:[%s6188_s5 + $0x18] sm:$0xff]  ;;  %v3971_v36 = vrot.slane %v3947_v23, 9  ;;  %v3972_v38 = vrot.slane %v3949_v26, 9  ;;  %v1584_v23 = vpack.c.b16 %v1573_v5, %v1572_v4  ;;  %v1468_v26 = vor.u32 %v1467_v8, %v1464_v7  ;;  %v4452_v5 = vld [vmem:[%s6186_s2 + $0x208] sm:$0xff]  ;;  %v4400_v7 = vld [vmem:[%s6187_s0 + $0x6c] sm:$0xf0] }
  0x83   :  { %3178 = vmatpush.bf16.msra.mxu1 %v4470_v25  ;;  %v3954_v25 = vld [vmem:[%s6187_s0 + $0x74] sm:$0x1]  ;;  %2971 = vmatpush.bf16.msra.mxu0 %v4452_v5 }
  0x84   :  { %1212 = vmatmul.bf16.gmra.mxu3 %v3798_v24  ;;  %v3948_v24 = vld [vmem:[%s6187_s0 + $0x5c] sm:$0x1]  ;;  %v1828_v55 = vsel %vm4916_vm5, %v3972_v38, %v1827_v39  ;;  %v1835_v38 = vrot.slane %v3954_v25, 5  ;;  %v1455_v39 = vrot.slane %v1454_v19, 4  ;;  %v1469_v41 = vrot.slane %v1468_v26, 4 }
  0x85   :  { %v1823_v37 = vrot.slane %v3948_v24, 5  ;;  %v1895_v0 = vunpack.c.l.b16 %v1828_v55  ;;  %v3953_v24 = vld [vmem:[%s6187_s0 + $0x70] sm:$0xe]  ;;  %v748_v19 = vld [vmem:[%s6187_s0 + $0x74] sm:$0x1] }
  0x86   :  { %v1460_v55 = vsel %vm4599_vm2, %v1455_v39, %v1459_v40  ;;  %v1474_v60 = vsel %vm4599_vm2, %v1469_v41, %v1473_v42  ;;  %v3955_v26 = vld [vmem:[%s6187_s0 + $0x78] sm:$0xe]  ;;  %v3703_v39 = vrot.slane %v747_v14, 9  ;;  %v840_v41 = vrot.slane %v748_v19, 5 }
  0x87   :  { %v1824_v53 = vsel %vm4916_vm5, %v3971_v36, %v1823_v37  ;;  %v1831_v36 = vrot.slane %v3952_v18, 5  ;;  %3179 = vmatpush.bf16.msra.mxu1 %v4469_v28  ;;  %v3974_v37 = vrot.slane %v3953_v24, 9  ;;  %v1574_v8 = vunpack.c.l.b16 %v1460_v55  ;;  %v3957_v28 = vld [vmem:[%s6187_s0 + $0x80] sm:$0xe] }
  0x88   :  { %v1894_v63 = vunpack.c.l.b16 %v1824_v53  ;;  %v3810_v18 = vor.u32 %v4400_v7, %v3809_v6  ;;  %v3704_v42 = vrot.slane %v749_v20, 9  ;;  %v3975_v44 = vrot.slane %v3955_v26, 9  ;;  %v4443_v55 = vld [vmem:[%s6186_s2 + $0x1c0] sm:$0xff] }
  0x89   :  { %v1836_v53 = vsel %vm4916_vm5, %v3974_v37, %v1835_v38  ;;  %v4468_v37 = vld [vmem:[%s6188_s5 + $0x8] sm:$0xff]  ;;  %v3976_v46 = vrot.slane %v3957_v28, 9  ;;  %2650 = vmatpush.bf16.msra.mxu3 %v4443_v55  ;;  %v841_v61 = vsel %vm4916_vm5, %v3703_v39, %v840_v41  ;;  %v1504_v7 = vshrl.u32 %v3879_v57, 16  ;;  %v4401_v20 = vld [vmem:[%s6187_s0 + $0x7c] sm:$0xf0] }
  0x8a   :  { %v1897_v4 = vunpack.c.l.b16 %v1836_v53  ;;  %v4435_v53 = vld [vmem:[%s6186_s2 + $0x180] sm:$0xff]  ;;  %v3882_v28 = vld [vmem:[%s6187_s0 + $0x94] sm:$0x1] }
  0x8b   :  { %3180 = vmatpush.bf16.msra.mxu1 %v4468_v37  ;;  %2200 = vmatpush.bf16.msra.mxu2 %v4435_v53  ;;  %v751_v26 = vld [vmem:[%s6187_s0 + $0x80] sm:$0xe] }
  0x8c   :  { %v3705_v55 = vrot.slane %v751_v26, 9 }
  0x91   :  { %990 = vmatmul.bf16.gmra.mxu2 %v906_v16  ;;  %1667 = vmatmul.bf16.gmra.mxu0 %v1583_v22  ;;  %v1906_v16 = vpack.c.b16 %v1895_v0, %v1894_v63  ;;  %v3806_v22 = vor.u32 %v4399_v9, %v3805_v3  ;;  %v897_v0 = vunpack.c.l.b16 %v833_v49  ;;  %v1575_v9 = vunpack.c.l.b16 %v1474_v60 }
  0x92   :  { %1989 = vmatmul.bf16.gmra.mxu1 %v1905_v17  ;;  %v3951_v17 = vld [vmem:[%s6187_s0 + $0x68] sm:$0xe] }
  0x93   :  { %v3973_v35 = vrot.slane %v3951_v17, 9  ;;  %v1585_v25 = vpack.c.b16 %v1575_v9, %v1574_v8  ;;  %v1507_v8 = vshll.u32 %v3879_v57, 16 }
  0x94   :  { %1217 = vmatmul.bf16.gmra.mxu3 %v3802_v21 }
  0x95   :  { %v1832_v51 = vsel %vm4916_vm5, %v3973_v35, %v1831_v36  ;;  %v1496_v35 = vor.u32 %v1495_v13, %v1492_v12  ;;  %v4451_v12 = vld [vmem:[%s6186_s2 + $0x200] sm:$0xff]  ;;  %v899_v13 = vunpack.c.l.b16 %v841_v61 }
  0x96   :  { %v1896_v3 = vunpack.c.l.b16 %v1832_v51  ;;  %2972 = vmatpush.bf16.msra.mxu0 %v4451_v12 }
  0x97   :  { %v1497_v51 = vrot.slane %v1496_v35, 4  ;;  %v753_v35 = vld [vmem:[%s6187_s0 + $0x88] sm:$0xe] }
  0x98   :  { %v1907_v24 = vpack.c.b16 %v1897_v4, %v1896_v3  ;;  %v3706_v57 = vrot.slane %v753_v35, 9 }
  0x9e   :  { %v198_v29 = vpop.f32.mrf.mxu0 }
  0x9f   :  { %v651_v21 = vpop.f32.mrf.mxu1 }
  0xa0   :  { %v5250_v33 = vadd.f32 %v651_v21, %v198_v29  ;;  %v750_v21 = vld [vmem:[%s6187_s0 + $0x7c] sm:$0x1]  ;;  %v1482_v29 = vor.u32 %v1481_v11, %v1478_v10 }
  0xa1   :  { %995 = vmatmul.bf16.gmra.mxu2 %v907_v15  ;;  %1672 = vmatmul.bf16.gmra.mxu0 %v1584_v23  ;;  %v3876_v15 = vld [vmem:[%s6187_s0 + $0x7c] sm:$0x1]  ;;  %v908_v23 = vpack.c.b16 %v898_v2, %v897_v0  ;;  %v844_v43 = vrot.slane %v750_v21, 5  ;;  %v1506_v21 = vrot.slane %v1504_v7, 4  ;;  %v4125_v7 = vld [vmem:[%s6187_s0 + $0x18] sm:$0xf] }
  0xa2   :  { %1994 = vmatmul.bf16.gmra.mxu1 %v1906_v16  ;;  %v3878_v16 = vld [vmem:[%s6187_s0 + $0x84] sm:$0x1]  ;;  %v1485_v34 = vshll.u32 %v3876_v15, 16  ;;  %v1483_v49 = vrot.slane %v1482_v29, 4 }
  0xa3   :  { %v1499_v36 = vshll.u32 %v3878_v16, 16  ;;  %v845_v62 = vsel %vm4916_vm5, %v3704_v42, %v844_v43  ;;  %v754_v42 = vld [vmem:[%s6187_s0 + $0x8c] sm:$0x1]  ;;  %v3959_v43 = vld [vmem:[%s6187_s0 + $0x88] sm:$0xe] }
  0xa4   :  { %1222 = vmatmul.bf16.gmra.mxu3 %v3806_v22  ;;  %v218_v48 = vpop.f32.mrf.mxu2  ;;  %v1487_v50 = vrot.slane %v1485_v34, 5  ;;  %v900_v14 = vunpack.c.l.b16 %v845_v62  ;;  %v752_v34 = vld [vmem:[%s6187_s0 + $0x84] sm:$0x1] }
  0xa6   :  { %v200_v63 = vpop.f32.mrf.mxu0  ;;  %v1488_v4 = vsel %vm4599_vm2, %v1483_v49, %v1487_v50  ;;  %v1513_v50 = vshll.u32 %v3880_v27, 16  ;;  %v3817_v27 = vld [vmem:[%s6187_s0 + $0x88] sm:$0xf] }
  0xa7   :  { %v671_v52 = vpop.f32.mrf.mxu3  ;;  %v653_v59 = vpop.f32.mrf.mxu1 }
  0xa8   :  { %v5274_v58 = vadd.f32 %v671_v52, %v218_v48  ;;  %v5278_v1 = vadd.f32 %v653_v59, %v200_v63  ;;  %v1843_v48 = vrot.slane %v3958_v32, 5  ;;  %v1501_v52 = vrot.slane %v1499_v36, 5  ;;  %v3881_v59 = vld [vmem:[%s6187_s0 + $0x90] sm:$0xf]  ;;  %v4467_v36 = vld [vmem:[%s6188_s5] sm:$0xff] }
  0xa9   :  { %v1840_v63 = vsel %vm4916_vm5, %v3975_v44, %v1839_v45  ;;  %v1518_v9 = vshrl.u32 %v3881_v59, 16  ;;  %v1521_v10 = vshll.u32 %v3881_v59, 16  ;;  %v3960_v44 = vld [vmem:[%s6187_s0 + $0x8c] sm:$0x1]  ;;  %3181 = vmatpush.bf16.msra.mxu1 %v4467_v36  ;;  %v852_v59 = vrot.slane %v754_v42, 5 }
  0xaa   :  { %v1844_v3 = vsel %vm4916_vm5, %v3976_v46, %v1843_v48  ;;  %v1502_v5 = vsel %vm4599_vm2, %v1497_v51, %v1501_v52  ;;  %v1898_v15 = vunpack.c.l.b16 %v1840_v63  ;;  %v3961_v46 = vld [vmem:[%s6187_s0 + $0x90] sm:$0xe]  ;;  %v3962_v48 = vld [vmem:[%s6187_s0 + $0x94] sm:$0x1]  ;;  %v1527_v52 = vshll.u32 %v3882_v28, 16 }
  0xab   :  { %v1899_v16 = vunpack.c.l.b16 %v1844_v3  ;;  %v1577_v19 = vunpack.c.l.b16 %v1502_v5  ;;  %v1847_v61 = vrot.slane %v3960_v44, 5  ;;  %v3978_v62 = vrot.slane %v3961_v46, 9  ;;  %v4402_v28 = vld [vmem:[%s6187_s0 + $0x8c] sm:$0xf0]  ;;  %v4126_v42 = vld [vmem:[%s6187_s0 + $0x1c] sm:$0x1] }
  0xac   :  { %v220_v17 = vpop.f32.mrf.mxu2  ;;  %v1851_v63 = vrot.slane %v3962_v48, 5  ;;  %v853_v12 = vsel %vm4916_vm5, %v3706_v57, %v852_v59  ;;  %v3818_v44 = vor.u32 %v4402_v28, %v3817_v27  ;;  %v2330_v57 = vshll.u32 %v4126_v42, 16  ;;  %v4128_v42 = vld [vmem:[%s6187_s0 + $0x24] sm:$0x1] }
  0xad   :  { %v1908_v32 = vpack.c.b16 %v1899_v16, %v1898_v15  ;;  %v902_v26 = vunpack.c.l.b16 %v853_v12 }
  0xae   :  { %v203_v38 = vpop.f32.mrf.mxu0 }
  0xaf   :  { %v673_v22 = vpop.f32.mrf.mxu3  ;;  %v656_v31 = vpop.f32.mrf.mxu1 }
  0xb0   :  { %v5316_v30 = vadd.f32 %v673_v22, %v220_v17  ;;  %v5324_v40 = vadd.f32 %v656_v31, %v203_v38  ;;  %v3813_v17 = vld [vmem:[%s6187_s0 + $0x78] sm:$0xf]  ;;  %v1509_v22 = vrot.slane %v1507_v8, 5  ;;  %v909_v31 = vpack.c.b16 %v900_v14, %v899_v13 }
  0xb1   :  { %1000 = vmatmul.bf16.gmra.mxu2 %v908_v23  ;;  %1677 = vmatmul.bf16.gmra.mxu0 %v1585_v25  ;;  %v1520_v23 = vrot.slane %v1518_v9, 4  ;;  %v3814_v39 = vor.u32 %v4401_v20, %v3813_v17  ;;  %v2324_v20 = vshll.u32 %v4125_v7, 16 }
  0xb2   :  { %1999 = vmatmul.bf16.gmra.mxu1 %v1907_v24  ;;  %v1523_v24 = vrot.slane %v1521_v10, 5  ;;  %v1510_v49 = vor.u32 %v1509_v22, %v1506_v21 }
  0xb4   :  { %1227 = vmatmul.bf16.gmra.mxu3 %v3810_v18  ;;  %v223_v56 = vpop.f32.mrf.mxu2  ;;  %v1576_v18 = vunpack.c.l.b16 %v1488_v4  ;;  %v1524_v51 = vor.u32 %v1523_v24, %v1520_v23  ;;  %v1511_v3 = vrot.slane %v1510_v49, 4  ;;  %v1515_v4 = vrot.slane %v1513_v50, 5 }
  0xb6   :  { %v205_v6 = vpop.f32.mrf.mxu0  ;;  %v1586_v41 = vpack.c.b16 %v1577_v19, %v1576_v18  ;;  %v1525_v5 = vrot.slane %v1524_v51, 4  ;;  %v1852_v18 = vsel %vm4916_vm5, %v3978_v62, %v1851_v63  ;;  %v2321_v19 = vshrl.u32 %v4125_v7, 16  ;;  %v4204_v62 = vld [vmem:[%s6187_s0 + $0x14] sm:$0x1]  ;;  %v4205_v63 = vld [vmem:[%s6187_s0 + $0x18] sm:$0xe] }
  0xb7   :  { %v676_v60 = vpop.f32.mrf.mxu3  ;;  %v658_v2 = vpop.f32.mrf.mxu1  ;;  %v1516_v22 = vsel %vm4599_vm2, %v1511_v3, %v1515_v4  ;;  %v4127_v7 = vld [vmem:[%s6187_s0 + $0x20] sm:$0xf] }
  0xb8   :  { %v5344_v0 = vadd.f32 %v676_v60, %v223_v56  ;;  %v5352_v11 = vadd.f32 %v658_v2, %v205_v6  ;;  %v848_v56 = vrot.slane %v752_v34, 5  ;;  %v3977_v60 = vrot.slane %v3959_v43, 9  ;;  %v4123_v2 = vld [vmem:[%s6187_s0 + $0x10] sm:$0xf] }
  0xb9   :  { %v1529_v6 = vrot.slane %v1527_v52, 5  ;;  %v2307_v14 = vshrl.u32 %v4123_v2, 16  ;;  %v2310_v15 = vshll.u32 %v4123_v2, 16  ;;  %v1578_v35 = vunpack.c.l.b16 %v1516_v22  ;;  %v4206_v2 = vld [vmem:[%s6187_s0 + $0x1c] sm:$0x1] }
  0xba   :  { %v849_v9 = vsel %vm4916_vm5, %v3705_v55, %v848_v56  ;;  %v1848_v13 = vsel %vm4916_vm5, %v3977_v60, %v1847_v61  ;;  %v4203_v60 = vld [vmem:[%s6187_s0 + $0x10] sm:$0xe]  ;;  %v2794_v12 = vrot.slane %v4206_v2, 5 }
  0xbb   :  { %v1530_v23 = vsel %vm4599_vm2, %v1525_v5, %v1529_v6  ;;  %v2312_v34 = vrot.slane %v2310_v15, 5  ;;  %v2332_v6 = vrot.slane %v2330_v57, 5 }
  0xbc   :  { %v225_v25 = vpop.f32.mrf.mxu2  ;;  %v1579_v36 = vunpack.c.l.b16 %v1530_v23 }
  0xbe   :  { %v208_v45 = vpop.f32.mrf.mxu0  ;;  %v1587_v55 = vpack.c.b16 %v1579_v36, %v1578_v35 }
  0xbf   :  { %v678_v29 = vpop.f32.mrf.mxu3  ;;  %v661_v38 = vpop.f32.mrf.mxu1 }
  0xc0   :  { %v5381_v37 = vadd.f32 %v678_v29, %v225_v25  ;;  %v5398_v53 = vadd.f32 %v661_v38, %v208_v45  ;;  %v901_v25 = vunpack.c.l.b16 %v849_v9  ;;  %v1900_v29 = vunpack.c.l.b16 %v1848_v13  ;;  %v4124_v38 = vld [vmem:[%s6187_s0 + $0x14] sm:$0x1]  ;;  %v4129_v13 = vld [vmem:[%s6187_s0 + $0x28] sm:$0xf] }
  0xc1   :  { %1005 = vmatmul.bf16.gmra.mxu2 %v909_v31  ;;  %1682 = vmatmul.bf16.gmra.mxu0 %v1586_v41  ;;  %v1901_v31 = vunpack.c.l.b16 %v1852_v18  ;;  %v2326_v41 = vrot.slane %v2324_v20, 5  ;;  %v2316_v50 = vshll.u32 %v4124_v38, 16  ;;  %v2790_v9 = vrot.slane %v4204_v62, 5  ;;  %v4427_v38 = vld [vmem:[%s6187_s0 + $0x14] sm:$0xf0] }
  0xc2   :  { %2004 = vmatmul.bf16.gmra.mxu1 %v1908_v32  ;;  %v2309_v32 = vrot.slane %v2307_v14, 4  ;;  %v910_v46 = vpack.c.b16 %v902_v26, %v901_v25  ;;  %v2335_v18 = vshrl.u32 %v4127_v7, 16  ;;  %v2349_v23 = vshrl.u32 %v4129_v13, 16 }
  0xc3   :  { %v1909_v48 = vpack.c.b16 %v1901_v31, %v1900_v29  ;;  %v2318_v4 = vrot.slane %v2316_v50, 5  ;;  %v2352_v25 = vshll.u32 %v4129_v13, 16  ;;  %v4061_v31 = vld [vmem:[%s6187_s0 + $0x10] sm:$0xf] }
  0xc4   :  { %1232 = vmatmul.bf16.gmra.mxu3 %v3814_v39  ;;  %v228_v8 = vpop.f32.mrf.mxu2  ;;  %v2323_v39 = vrot.slane %v2321_v19, 4  ;;  %v2313_v49 = vor.u32 %v2312_v34, %v2309_v32  ;;  %v2338_v19 = vshll.u32 %v4127_v7, 16  ;;  %v2337_v35 = vrot.slane %v2335_v18, 4  ;;  %v4133_v18 = vld [vmem:[%s6187_s0 + $0x38] sm:$0xf] }
  0xc6   :  { %v210_v21 = vpop.f32.mrf.mxu0  ;;  %v2327_v56 = vor.u32 %v2326_v41, %v2323_v39  ;;  %v2314_v3 = vrot.slane %v2313_v49, 4  ;;  %v2340_v36 = vrot.slane %v2338_v19, 5  ;;  %v4062_v49 = vor.u32 %v4427_v38, %v4061_v31 }
  0xc7   :  { %v681_v10 = vpop.f32.mrf.mxu3  ;;  %v663_v17 = vpop.f32.mrf.mxu1  ;;  %v2377_v31 = vshrl.u32 %v4133_v18, 16 }
  0xc8   :  { %v5412_v16 = vadd.f32 %v681_v10, %v228_v8  ;;  %v5420_v24 = vadd.f32 %v663_v17, %v210_v21  ;;  %v2328_v5 = vrot.slane %v2327_v56, 4  ;;  %v4235_v8 = vrot.slane %v4203_v60, 9 }
  0xc9   :  { %v4236_v10 = vrot.slane %v4205_v63, 9  ;;  %v2319_v17 = vsel %vm4599_vm2, %v2314_v3, %v2318_v4  ;;  %v2344_v56 = vshll.u32 %v4128_v42, 16  ;;  %v4207_v3 = vld [vmem:[%s6187_s0 + $0x20] sm:$0xe]  ;;  %v4208_v4 = vld [vmem:[%s6187_s0 + $0x24] sm:$0x1] }
  0xca   :  { %v2333_v22 = vsel %vm4599_vm2, %v2328_v5, %v2332_v6  ;;  %v2791_v27 = vsel %vm4916_vm5, %v4235_v8, %v2790_v9  ;;  %v2563_v32 = vunpack.c.l.b16 %v2319_v17  ;;  %v4209_v5 = vld [vmem:[%s6187_s0 + $0x28] sm:$0xe]  ;;  %v4210_v6 = vld [vmem:[%s6187_s0 + $0x2c] sm:$0x1]  ;;  %v4237_v13 = vrot.slane %v4207_v3, 9 }
  0xcb   :  { %v2795_v28 = vsel %vm4916_vm5, %v4236_v10, %v2794_v12  ;;  %v2564_v34 = vunpack.c.l.b16 %v2333_v22  ;;  %v2885_v39 = vunpack.c.l.b16 %v2791_v27  ;;  %v2346_v8 = vrot.slane %v2344_v56, 5  ;;  %v4131_v12 = vld [vmem:[%s6187_s0 + $0x30] sm:$0xf]  ;;  %v4460_v3 = vld [vmem:[%s6189_s1 + $0x8] sm:$0xff] }
  0xcc   :  { %v230_v43 = vpop.f32.mrf.mxu2  ;;  %v2886_v41 = vunpack.c.l.b16 %v2795_v28  ;;  %v2802_v17 = vrot.slane %v4210_v6, 5 }
  0xcd   :  { %v2579_v50 = vpack.c.b16 %v2564_v34, %v2563_v32  ;;  %v2380_v32 = vshll.u32 %v4133_v18, 16 }
  0xce   :  { %v213_v59 = vpop.f32.mrf.mxu0  ;;  %v2901_v60 = vpack.c.b16 %v2886_v41, %v2885_v39  ;;  %v4065_v41 = vld [vmem:[%s6187_s0 + $0x20] sm:$0xf] }
  0xcf   :  { %v683_v45 = vpop.f32.mrf.mxu3  ;;  %v666_v52 = vpop.f32.mrf.mxu1 }
  0xd0   :  { %v5434_v51 = vadd.f32 %v683_v45, %v230_v43  ;;  %v5439_v61 = vadd.f32 %v666_v52, %v213_v59  ;;  %v2351_v43 = vrot.slane %v2349_v23, 4  ;;  %v4130_v45 = vld [vmem:[%s6187_s0 + $0x2c] sm:$0x1]  ;;  %v4459_v52 = vld [vmem:[%s6189_s1] sm:$0xff] }
  0xd1   :  { %1010 = vmatmul.bf16.gmra.mxu2 %v910_v46  ;;  %1687 = vmatmul.bf16.gmra.mxu0 %v1587_v55  ;;  %v2341_v55 = vor.u32 %v2340_v36, %v2337_v35  ;;  %v2358_v63 = vshll.u32 %v4130_v45, 16  ;;  %v4428_v45 = vld [vmem:[%s6187_s0 + $0x24] sm:$0xf0] }
  0xd2   :  { %2009 = vmatmul.bf16.gmra.mxu1 %v1909_v48 }
  0xd3   :  { %v2342_v7 = vrot.slane %v2341_v55, 4  ;;  %v2360_v10 = vrot.slane %v2358_v63, 5  ;;  %v4134_v55 = vld [vmem:[%s6187_s0 + $0x3c] sm:$0x1] }
  0xd4   :  { %1237 = vmatmul.bf16.gmra.mxu3 %v3818_v44  ;;  %v233_v14 = vpop.f32.mrf.mxu2  ;;  %v2354_v44 = vrot.slane %v2352_v25, 5  ;;  %v2363_v25 = vshrl.u32 %v4131_v12, 16 }
  0xd5   :  { %v2347_v23 = vsel %vm4599_vm2, %v2342_v7, %v2346_v8 }
  0xd6   :  { %v215_v26 = vpop.f32.mrf.mxu0  ;;  %v2355_v62 = vor.u32 %v2354_v44, %v2351_v43  ;;  %v2565_v38 = vunpack.c.l.b16 %v2347_v23  ;;  %v2365_v43 = vrot.slane %v2363_v25, 4  ;;  %v4135_v25 = vld [vmem:[%s6187_s0 + $0x40] sm:$0xf] }
  0xd7   :  { %v686_v15 = vpop.f32.mrf.mxu3  ;;  %v668_v21 = vpop.f32.mrf.mxu1 }
  0xd8   :  { %v5458_v20 = vadd.f32 %v686_v15, %v233_v14  ;;  %v5466_v29 = vadd.f32 %v668_v21, %v215_v26  ;;  %v2356_v9 = vrot.slane %v2355_v62, 4  ;;  %v2798_v14 = vrot.slane %v4208_v4, 5 }
  0xd9   :  { %v4238_v15 = vrot.slane %v4209_v5, 9  ;;  %v2366_v26 = vshll.u32 %v4131_v12, 16 }
  0xda   :  { %v2361_v28 = vsel %vm4599_vm2, %v2356_v9, %v2360_v10  ;;  %v2799_v36 = vsel %vm4916_vm5, %v4237_v13, %v2798_v14  ;;  %v2386_v10 = vshll.u32 %v4134_v55, 16  ;;  %v4213_v14 = vld [vmem:[%s6187_s0 + $0x38] sm:$0xe] }
  0xdb   :  { %v2566_v42 = vunpack.c.l.b16 %v2361_v28  ;;  %v2368_v44 = vrot.slane %v2366_v26, 5  ;;  %v4240_v28 = vrot.slane %v4213_v14, 9 }
  0xdc   :  { %v235_v46 = vpop.f32.mrf.mxu2 }
  0xdd   :  { %v2369_v4 = vor.u32 %v2368_v44, %v2365_v43  ;;  %v2580_v7 = vpack.c.b16 %v2566_v42, %v2565_v38 }
  0xde   :  { %v1653_v2 = vpop.f32.mrf.mxu0 }
  0xdf   :  { %v688_v48 = vpop.f32.mrf.mxu3  ;;  %v1975_v59 = vpop.f32.mrf.mxu1  ;;  %v2370_v18 = vrot.slane %v2369_v4, 4  ;;  %v4136_v4 = vld [vmem:[%s6187_s0 + $0x44] sm:$0x1] }
  0xe0   :  { %v5483_v57 = vadd.f32 %v688_v48, %v235_v46  ;;  %v2887_v46 = vunpack.c.l.b16 %v2799_v36 }
  0xe1   :  { %2201 = vmatmul.bf16.vlgmr.msra.gmra.mxu2 %v4062_v49  ;;  %2973 = vmatmul.bf16.vlgmr.msra.gmra.mxu0 %v2901_v60  ;;  %v4132_v49 = vld [vmem:[%s6187_s0 + $0x34] sm:$0x1] }
  0xe2   :  { %3182 = vmatmul.bf16.vlgmr.msra.gmra.mxu1 %v4459_v52  ;;  %v2382_v52 = vrot.slane %v2380_v32, 5  ;;  %v2372_v5 = vshll.u32 %v4132_v49, 16  ;;  %v4137_v32 = vld [vmem:[%s6187_s0 + $0x48] sm:$0xf] }
  0xe3   :  { %v2405_v44 = vshrl.u32 %v4137_v32, 16 }
  0xe4   :  { %2651 = vmatmul.bf16.vlgmr.msra.gmra.mxu3 %v2579_v50  ;;  %v976_v19 = vpop.f32.mrf.mxu2  ;;  %v2379_v50 = vrot.slane %v2377_v31, 4 }
  0xe5   :  { %v1016_v21 = vadd.f32 %v976_v19, %v5250_v33  ;;  %v2803_v33 = vsel %vm4916_vm5, %v4238_v15, %v2802_v17  ;;  %v4214_v15 = vld [vmem:[%s6187_s0 + $0x3c] sm:$0x1]  ;;  %v2374_v19 = vrot.slane %v2372_v5, 5  ;;  %v2407_v5 = vrot.slane %v2405_v44, 4 }
  0xe6   :  { %v1655_v35 = vpop.f32.mrf.mxu0  ;;  %v2888_v48 = vunpack.c.l.b16 %v2803_v33  ;;  %v2383_v9 = vor.u32 %v2382_v52, %v2379_v50  ;;  %v2810_v31 = vrot.slane %v4214_v15, 5  ;;  %v4069_v52 = vld [vmem:[%s6187_s0 + $0x30] sm:$0xf]  ;;  %v2400_v15 = vshll.u32 %v4136_v4, 16 }
  0xe7   :  { %v1203_v22 = vpop.f32.mrf.mxu3  ;;  %v1977_v27 = vpop.f32.mrf.mxu1  ;;  %v2375_v38 = vsel %vm4599_vm2, %v2370_v18, %v2374_v19 }
  0xe8   :  { %v1243_v34 = vadd.f32 %v1203_v22, %v1016_v21  ;;  %v2902_v8 = vpack.c.b16 %v2888_v48, %v2887_v46  ;;  %v2384_v21 = vrot.slane %v2383_v9, 4  ;;  %v2388_v22 = vrot.slane %v2386_v10, 5 }
  0xe9   :  { %v2567_v49 = vunpack.c.l.b16 %v2375_v38 }
  0xea   :  { %v1693_v39 = vadd.f32 %v1653_v2, %v1243_v34  ;;  %v4066_v2 = vor.u32 %v4428_v45, %v4065_v41  ;;  %v2394_v41 = vshll.u32 %v4135_v25, 16  ;;  %v2389_v43 = vsel %vm4599_vm2, %v2384_v21, %v2388_v22 }
  0xeb   :  { %v2408_v45 = vshll.u32 %v4137_v32, 16  ;;  %v2568_v55 = vunpack.c.l.b16 %v2389_v43 }
  0xec   :  { %v5524_v56 = vadd.f32 %v1975_v59, %v1693_v39  ;;  %v978_v60 = vpop.f32.mrf.mxu2  ;;  %v4211_v59 = vld [vmem:[%s6187_s0 + $0x30] sm:$0xe]  ;;  %v2391_v39 = vshrl.u32 %v4135_v25, 16 }
  0xed   :  { %v1017_v62 = vadd.f32 %v978_v60, %v5278_v1  ;;  %v4212_v1 = vld [vmem:[%s6187_s0 + $0x34] sm:$0x1]  ;;  %v4239_v23 = vrot.slane %v4211_v59, 9  ;;  %v2581_v18 = vpack.c.b16 %v2568_v55, %v2567_v49 }
  0xee   :  { %v1658_v13 = vpop.f32.mrf.mxu0  ;;  %v2806_v26 = vrot.slane %v4212_v1, 5  ;;  %v2393_v60 = vrot.slane %v2391_v39, 4  ;;  %v4461_v1 = vld [vmem:[%s6189_s1 + $0x10] sm:$0xff]  ;;  %v4139_v39 = vld [vmem:[%s6187_s0 + $0x60] sm:$0xf] }
  0xef   :  { %v1205_v63 = vpop.f32.mrf.mxu3  ;;  %v1980_v6 = vpop.f32.mrf.mxu1 }
  0xf0   :  { %v1244_v12 = vadd.f32 %v1205_v63, %v1017_v62  ;;  %v2396_v62 = vrot.slane %v2394_v41, 5  ;;  %v4429_v63 = vld [vmem:[%s6187_s0 + $0x34] sm:$0xf0] }
  0xf1   :  { %2206 = vmatmul.bf16.gmra.mxu2 %v4066_v2  ;;  %2978 = vmatmul.bf16.gmra.mxu0 %v2902_v8  ;;  %v4138_v8 = vld [vmem:[%s6187_s0 + $0x4c] sm:$0x1]  ;;  %v4070_v59 = vor.u32 %v4429_v63, %v4069_v52  ;;  %v2422_v52 = vshll.u32 %v4139_v39, 16 }
  0xf2   :  { %v1694_v17 = vadd.f32 %v1655_v35, %v1244_v12  ;;  %3187 = vmatmul.bf16.gmra.mxu1 %v4460_v3  ;;  %v2397_v14 = vor.u32 %v2396_v62, %v2393_v60  ;;  %v2414_v22 = vshll.u32 %v4138_v8, 16 }
  0xf4   :  { %2656 = vmatmul.bf16.gmra.mxu3 %v2580_v7  ;;  %v5548_v34 = vadd.f32 %v1977_v27, %v1694_v17  ;;  %v981_v35 = vpop.f32.mrf.mxu2  ;;  %v2807_v27 = vsel %vm4916_vm5, %v4239_v23, %v2806_v26  ;;  %v2410_v7 = vrot.slane %v2408_v45, 5  ;;  %v4217_v26 = vld [vmem:[%s6187_s0 + $0x48] sm:$0xe]  ;;  %v2398_v32 = vrot.slane %v2397_v14, 4  ;;  %v4140_v14 = vld [vmem:[%s6187_s0 + $0x64] sm:$0x1] }
  0xf5   :  { %v1018_v36 = vadd.f32 %v981_v35, %v5324_v40  ;;  %v2811_v40 = vsel %vm4916_vm5, %v4240_v28, %v2810_v31  ;;  %v2889_v2 = vunpack.c.l.b16 %v2807_v27  ;;  %v4218_v28 = vld [vmem:[%s6187_s0 + $0x4c] sm:$0x1]  ;;  %v2402_v35 = vrot.slane %v2400_v15, 5  ;;  %v4141_v45 = vld [vmem:[%s6187_s0 + $0x68] sm:$0xf] }
  0xf6   :  { %v1660_v48 = vpop.f32.mrf.mxu0  ;;  %v2890_v3 = vunpack.c.l.b16 %v2811_v40  ;;  %v2411_v21 = vor.u32 %v2410_v7, %v2407_v5  ;;  %v4242_v43 = vrot.slane %v4217_v26, 9  ;;  %v2818_v44 = vrot.slane %v4218_v28, 5  ;;  %v4073_v7 = vld [vmem:[%s6187_s0 + $0x40] sm:$0xf] }
  0xf7   :  { %v1208_v33 = vpop.f32.mrf.mxu3  ;;  %v1982_v42 = vpop.f32.mrf.mxu1  ;;  %v2403_v49 = vsel %vm4599_vm2, %v2398_v32, %v2402_v35  ;;  %v2433_v62 = vshrl.u32 %v4141_v45, 16  ;;  %v2436_v63 = vshll.u32 %v4141_v45, 16  ;;  %v2428_v28 = vshll.u32 %v4140_v14, 16 }
  0xf8   :  { %v1245_v46 = vadd.f32 %v1208_v33, %v1018_v36  ;;  %v2903_v19 = vpack.c.b16 %v2890_v3, %v2889_v2  ;;  %v2412_v36 = vrot.slane %v2411_v21, 4  ;;  %v2416_v33 = vrot.slane %v2414_v22, 5 }
  0xf9   :  { %v2569_v4 = vunpack.c.l.b16 %v2403_v49  ;;  %v2435_v15 = vrot.slane %v2433_v62, 4 }
  0xfa   :  { %v1695_v50 = vadd.f32 %v1658_v13, %v1245_v46  ;;  %v2417_v60 = vsel %vm4599_vm2, %v2412_v36, %v2416_v33 }
  0xfb   :  { %v2570_v8 = vunpack.c.l.b16 %v2417_v60 }
  0xfc   :  { %v5571_v9 = vadd.f32 %v1980_v6, %v1695_v50  ;;  %v983_v10 = vpop.f32.mrf.mxu2  ;;  %v4215_v6 = vld [vmem:[%s6187_s0 + $0x40] sm:$0xe]  ;;  %v2419_v50 = vshrl.u32 %v4139_v39, 16 }
  0xfd   :  { %v1019_v12 = vadd.f32 %v983_v10, %v5352_v11  ;;  %v4216_v11 = vld [vmem:[%s6187_s0 + $0x44] sm:$0x1]  ;;  %v4241_v38 = vrot.slane %v4215_v6, 9  ;;  %v2582_v32 = vpack.c.b16 %v2570_v8, %v2569_v4 }
  0xfe   :  { %v1663_v25 = vpop.f32.mrf.mxu0  ;;  %v2814_v41 = vrot.slane %v4216_v11, 5  ;;  %v2421_v10 = vrot.slane %v2419_v50, 4  ;;  %v4462_v11 = vld [vmem:[%s6189_s1 + $0x18] sm:$0xff]  ;;  %v4143_v50 = vld [vmem:[%s6187_s0 + $0x70] sm:$0xf] }
  0xff   :  { %v1210_v13 = vpop.f32.mrf.mxu3  ;;  %v1985_v17 = vpop.f32.mrf.mxu1 }
 0x100   :  { %v1246_v23 = vadd.f32 %v1210_v13, %v1019_v12  ;;  %v2424_v12 = vrot.slane %v2422_v52, 5  ;;  %v4430_v13 = vld [vmem:[%s6187_s0 + $0x44] sm:$0xf0] }
 0x101   :  { %2211 = vmatmul.bf16.gmra.mxu2 %v4070_v59  ;;  %2983 = vmatmul.bf16.gmra.mxu0 %v2903_v19  ;;  %v4142_v19 = vld [vmem:[%s6187_s0 + $0x6c] sm:$0x1]  ;;  %v4074_v6 = vor.u32 %v4430_v13, %v4073_v7  ;;  %v2450_v7 = vshll.u32 %v4143_v50, 16 }
 0x102   :  { %v1696_v31 = vadd.f32 %v1660_v48, %v1246_v23  ;;  %3192 = vmatmul.bf16.gmra.mxu1 %v4461_v1  ;;  %v2425_v26 = vor.u32 %v2424_v12, %v2421_v10  ;;  %v2442_v33 = vshll.u32 %v4142_v19, 16 }
 0x104   :  { %2661 = vmatmul.bf16.gmra.mxu3 %v2581_v18  ;;  %v5595_v46 = vadd.f32 %v1982_v42, %v1696_v31  ;;  %v986_v48 = vpop.f32.mrf.mxu2  ;;  %v2815_v42 = vsel %vm4916_vm5, %v4241_v38, %v2814_v41  ;;  %v2438_v18 = vrot.slane %v2436_v63, 5  ;;  %v4221_v41 = vld [vmem:[%s6187_s0 + $0x68] sm:$0xe]  ;;  %v2426_v45 = vrot.slane %v2425_v26, 4  ;;  %v4145_v63 = vld [vmem:[%s6187_s0 + $0x78] sm:$0xf] }
 0x105   :  { %v1020_v27 = vadd.f32 %v986_v48, %v5398_v53  ;;  %v2819_v53 = vsel %vm4916_vm5, %v4242_v43, %v2818_v44  ;;  %v2891_v59 = vunpack.c.l.b16 %v2815_v42  ;;  %v4222_v43 = vld [vmem:[%s6187_s0 + $0x6c] sm:$0x1]  ;;  %v2430_v48 = vrot.slane %v2428_v28, 5  ;;  %v4144_v26 = vld [vmem:[%s6187_s0 + $0x74] sm:$0x1] }
 0x106   :  { %v1665_v3 = vpop.f32.mrf.mxu0  ;;  %v2892_v1 = vunpack.c.l.b16 %v2819_v53  ;;  %v2439_v36 = vor.u32 %v2438_v18, %v2435_v15  ;;  %v4244_v60 = vrot.slane %v4221_v41, 9  ;;  %v2826_v62 = vrot.slane %v4222_v43, 5  ;;  %v4077_v18 = vld [vmem:[%s6187_s0 + $0x60] sm:$0xf] }
 0x107   :  { %v1213_v40 = vpop.f32.mrf.mxu3  ;;  %v1987_v55 = vpop.f32.mrf.mxu1  ;;  %v2431_v4 = vsel %vm4599_vm2, %v2426_v45, %v2430_v48  ;;  %v2461_v12 = vshrl.u32 %v4145_v63, 16  ;;  %v2464_v13 = vshll.u32 %v4145_v63, 16  ;;  %v2456_v43 = vshll.u32 %v4144_v26, 16 }
 0x108   :  { %v1247_v2 = vadd.f32 %v1213_v40, %v1020_v27  ;;  %v2904_v35 = vpack.c.b16 %v2892_v1, %v2891_v59  ;;  %v2440_v27 = vrot.slane %v2439_v36, 4  ;;  %v2444_v40 = vrot.slane %v2442_v33, 5 }
 0x109   :  { %v2571_v14 = vunpack.c.l.b16 %v2431_v4  ;;  %v2463_v28 = vrot.slane %v2461_v12, 4 }
 0x10a   :  { %v1697_v5 = vadd.f32 %v1663_v25, %v1247_v2  ;;  %v2445_v10 = vsel %vm4599_vm2, %v2440_v27, %v2444_v40 }
 0x10b   :  { %v2572_v19 = vunpack.c.l.b16 %v2445_v10 }
 0x10c   :  { %v5618_v21 = vadd.f32 %v1985_v17, %v1697_v5  ;;  %v988_v22 = vpop.f32.mrf.mxu2  ;;  %v4219_v17 = vld [vmem:[%s6187_s0 + $0x60] sm:$0xe]  ;;  %v2447_v5 = vshrl.u32 %v4143_v50, 16 }
 0x10d   :  { %v1021_v23 = vadd.f32 %v988_v22, %v5420_v24  ;;  %v4220_v24 = vld [vmem:[%s6187_s0 + $0x64] sm:$0x1]  ;;  %v4243_v49 = vrot.slane %v4219_v17, 9  ;;  %v2583_v45 = vpack.c.b16 %v2572_v19, %v2571_v14 }
 0x10e   :  { %v1668_v39 = vpop.f32.mrf.mxu0  ;;  %v2822_v52 = vrot.slane %v4220_v24, 5  ;;  %v2449_v22 = vrot.slane %v2447_v5, 4  ;;  %v4463_v24 = vld [vmem:[%s6189_s1 + $0x20] sm:$0xff] }
 0x10f   :  { %v1215_v25 = vpop.f32.mrf.mxu3  ;;  %v1990_v31 = vpop.f32.mrf.mxu1  ;;  %v4147_v5 = vld [vmem:[%s6187_s0 + $0x80] sm:$0xf] }
 0x110   :  { %v1248_v38 = vadd.f32 %v1215_v25, %v1021_v23  ;;  %v2452_v23 = vrot.slane %v2450_v7, 5  ;;  %v4431_v25 = vld [vmem:[%s6187_s0 + $0x64] sm:$0xf0] }
 0x111   :  { %2216 = vmatmul.bf16.gmra.mxu2 %v4074_v6  ;;  %2988 = vmatmul.bf16.gmra.mxu0 %v2904_v35  ;;  %v4146_v35 = vld [vmem:[%s6187_s0 + $0x7c] sm:$0x1]  ;;  %v4078_v17 = vor.u32 %v4431_v25, %v4077_v18  ;;  %v2478_v18 = vshll.u32 %v4147_v5, 16 }
 0x112   :  { %v1698_v44 = vadd.f32 %v1665_v3, %v1248_v38  ;;  %3197 = vmatmul.bf16.gmra.mxu1 %v4462_v11  ;;  %v2453_v41 = vor.u32 %v2452_v23, %v2449_v22  ;;  %v2470_v40 = vshll.u32 %v4146_v35, 16 }
 0x114   :  { %2666 = vmatmul.bf16.gmra.mxu3 %v2582_v32  ;;  %v5642_v2 = vadd.f32 %v1987_v55, %v1698_v44  ;;  %v991_v3 = vpop.f32.mrf.mxu2  ;;  %v2823_v55 = vsel %vm4916_vm5, %v4243_v49, %v2822_v52  ;;  %v2466_v32 = vrot.slane %v2464_v13, 5  ;;  %v4225_v52 = vld [vmem:[%s6187_s0 + $0x78] sm:$0xe]  ;;  %v2454_v63 = vrot.slane %v2453_v41, 4  ;;  %v4149_v13 = vld [vmem:[%s6187_s0 + $0x88] sm:$0xf] }
 0x115   :  { %v1022_v42 = vadd.f32 %v991_v3, %v5439_v61  ;;  %v2827_v61 = vsel %vm4916_vm5, %v4244_v60, %v2826_v62  ;;  %v2893_v6 = vunpack.c.l.b16 %v2823_v55  ;;  %v4226_v60 = vld [vmem:[%s6187_s0 + $0x7c] sm:$0x1]  ;;  %v2458_v3 = vrot.slane %v2456_v43, 5  ;;  %v4148_v41 = vld [vmem:[%s6187_s0 + $0x84] sm:$0x1] }
 0x116   :  { %v1670_v1 = vpop.f32.mrf.mxu0  ;;  %v2894_v11 = vunpack.c.l.b16 %v2827_v61  ;;  %v2467_v27 = vor.u32 %v2466_v32, %v2463_v28  ;;  %v4246_v10 = vrot.slane %v4225_v52, 9  ;;  %v2834_v12 = vrot.slane %v4226_v60, 5  ;;  %v4081_v32 = vld [vmem:[%s6187_s0 + $0x70] sm:$0xf] }
 0x117   :  { %v1218_v53 = vpop.f32.mrf.mxu3  ;;  %v1992_v8 = vpop.f32.mrf.mxu1  ;;  %v2459_v14 = vsel %vm4599_vm2, %v2454_v63, %v2458_v3  ;;  %v2489_v23 = vshrl.u32 %v4149_v13, 16  ;;  %v2492_v25 = vshll.u32 %v4149_v13, 16  ;;  %v2484_v60 = vshll.u32 %v4148_v41, 16 }
 0x118   :  { %v1249_v59 = vadd.f32 %v1218_v53, %v1022_v42  ;;  %v2905_v48 = vpack.c.b16 %v2894_v11, %v2893_v6  ;;  %v2468_v42 = vrot.slane %v2467_v27, 4  ;;  %v2472_v53 = vrot.slane %v2470_v40, 5 }
 0x119   :  { %v2573_v26 = vunpack.c.l.b16 %v2459_v14  ;;  %v2491_v43 = vrot.slane %v2489_v23, 4 }
 0x11a   :  { %v1699_v15 = vadd.f32 %v1668_v39, %v1249_v59  ;;  %v2473_v22 = vsel %vm4599_vm2, %v2468_v42, %v2472_v53 }
 0x11b   :  { %v2574_v35 = vunpack.c.l.b16 %v2473_v22 }
 0x11c   :  { %v5665_v36 = vadd.f32 %v1990_v31, %v1699_v15  ;;  %v993_v33 = vpop.f32.mrf.mxu2  ;;  %v4223_v31 = vld [vmem:[%s6187_s0 + $0x70] sm:$0xe]  ;;  %v2475_v15 = vshrl.u32 %v4147_v5, 16 }
 0x11d   :  { %v1023_v38 = vadd.f32 %v993_v33, %v5466_v29  ;;  %v4224_v29 = vld [vmem:[%s6187_s0 + $0x74] sm:$0x1]  ;;  %v4245_v4 = vrot.slane %v4223_v31, 9  ;;  %v2584_v63 = vpack.c.b16 %v2574_v35, %v2573_v26 }
 0x11e   :  { %v1673_v50 = vpop.f32.mrf.mxu0  ;;  %v2830_v7 = vrot.slane %v4224_v29, 5  ;;  %v2477_v33 = vrot.slane %v2475_v15, 4  ;;  %v4464_v29 = vld [vmem:[%s6189_s1 + $0x28] sm:$0xff]  ;;  %v4151_v15 = vld [vmem:[%s6187_s0 + $0x90] sm:$0xf] }
 0x11f   :  { %v1220_v39 = vpop.f32.mrf.mxu3  ;;  %v1995_v44 = vpop.f32.mrf.mxu1 }
 0x120   :  { %v1250_v49 = vadd.f32 %v1220_v39, %v1023_v38  ;;  %v2480_v38 = vrot.slane %v2478_v18, 5  ;;  %v4432_v39 = vld [vmem:[%s6187_s0 + $0x74] sm:$0xf0] }
 0x121   :  { %2221 = vmatmul.bf16.gmra.mxu2 %v4078_v17  ;;  %2993 = vmatmul.bf16.gmra.mxu0 %v2905_v48  ;;  %v4150_v48 = vld [vmem:[%s6187_s0 + $0x8c] sm:$0x1]  ;;  %v4082_v31 = vor.u32 %v4432_v39, %v4081_v32  ;;  %v2506_v32 = vshll.u32 %v4151_v15, 16 }
 0x122   :  { %v1700_v62 = vadd.f32 %v1670_v1, %v1250_v49  ;;  %3202 = vmatmul.bf16.gmra.mxu1 %v4463_v24  ;;  %v2481_v52 = vor.u32 %v2480_v38, %v2477_v33  ;;  %v2498_v53 = vshll.u32 %v4150_v48, 16 }
 0x124   :  { %2671 = vmatmul.bf16.gmra.mxu3 %v2583_v45  ;;  %v5689_v59 = vadd.f32 %v1992_v8, %v1700_v62  ;;  %v996_v1 = vpop.f32.mrf.mxu2  ;;  %v2831_v8 = vsel %vm4916_vm5, %v4245_v4, %v2830_v7  ;;  %v2494_v45 = vrot.slane %v2492_v25, 5  ;;  %v4229_v7 = vld [vmem:[%s6187_s0 + $0x88] sm:$0xe]  ;;  %v2482_v13 = vrot.slane %v2481_v52, 4  ;;  %v4153_v25 = vld [vmem:[%s6187_s0 + $0x98] sm:$0xf] }
 0x125   :  { %v1024_v55 = vadd.f32 %v996_v1, %v5274_v58  ;;  %v2835_v58 = vsel %vm4916_vm5, %v4246_v10, %v2834_v12  ;;  %v2895_v17 = vunpack.c.l.b16 %v2831_v8  ;;  %v4230_v10 = vld [vmem:[%s6187_s0 + $0x8c] sm:$0x1]  ;;  %v2486_v1 = vrot.slane %v2484_v60, 5 }
 0x126   :  { %v1675_v11 = vpop.f32.mrf.mxu0  ;;  %v2896_v24 = vunpack.c.l.b16 %v2835_v58  ;;  %v2495_v42 = vor.u32 %v2494_v45, %v2491_v43  ;;  %v4248_v22 = vrot.slane %v4229_v7, 9  ;;  %v2842_v23 = vrot.slane %v4230_v10, 5  ;;  %v4465_v7 = vld [vmem:[%s6189_s1 + $0x30] sm:$0xff] }
 0x127   :  { %v1223_v61 = vpop.f32.mrf.mxu3  ;;  %v1997_v19 = vpop.f32.mrf.mxu1  ;;  %v2487_v26 = vsel %vm4599_vm2, %v2482_v13, %v2486_v1  ;;  %v2517_v38 = vshrl.u32 %v4153_v25, 16  ;;  %v2520_v39 = vshll.u32 %v4153_v25, 16 }
 0x128   :  { %v1251_v6 = vadd.f32 %v1223_v61, %v1024_v55  ;;  %v2906_v3 = vpack.c.b16 %v2896_v24, %v2895_v17  ;;  %v2496_v55 = vrot.slane %v2495_v42, 4  ;;  %v2500_v61 = vrot.slane %v2498_v53, 5 }
 0x129   :  { %v2575_v41 = vunpack.c.l.b16 %v2487_v26  ;;  %v2519_v52 = vrot.slane %v2517_v38, 4  ;;  %v2522_v60 = vrot.slane %v2520_v39, 5 }
 0x12a   :  { %v1701_v28 = vadd.f32 %v1673_v50, %v1251_v6  ;;  %v2501_v33 = vsel %vm4599_vm2, %v2496_v55, %v2500_v61 }
 0x12b   :  { %v2576_v45 = vunpack.c.l.b16 %v2501_v33  ;;  %v2523_v55 = vor.u32 %v2522_v60, %v2519_v52 }
 0x12c   :  { %v5712_v27 = vadd.f32 %v1995_v44, %v1701_v28  ;;  %v998_v40 = vpop.f32.mrf.mxu2  ;;  %v4227_v44 = vld [vmem:[%s6187_s0 + $0x80] sm:$0xe]  ;;  %v2503_v28 = vshrl.u32 %v4151_v15, 16 }
 0x12d   :  { %v1025_v49 = vadd.f32 %v998_v40, %v5316_v30  ;;  %v4228_v30 = vld [vmem:[%s6187_s0 + $0x84] sm:$0x1]  ;;  %v4247_v14 = vrot.slane %v4227_v44, 9  ;;  %v2508_v40 = vrot.slane %v2506_v32, 5 }
 0x12e   :  { %v1678_v5 = vpop.f32.mrf.mxu0  ;;  %v2838_v18 = vrot.slane %v4228_v30, 5  ;;  %v2505_v48 = vrot.slane %v2503_v28, 4  ;;  %v2585_v30 = vpack.c.b16 %v2576_v45, %v2575_v41 }
 0x12f   :  { %v1225_v50 = vpop.f32.mrf.mxu3  ;;  %v2000_v62 = vpop.f32.mrf.mxu1 }
 0x130   :  { %v1252_v4 = vadd.f32 %v1225_v50, %v1025_v49  ;;  %v4085_v49 = vld [vmem:[%s6187_s0 + $0x80] sm:$0xf]  ;;  %v4433_v50 = vld [vmem:[%s6187_s0 + $0x84] sm:$0xf0]  ;;  %v2509_v10 = vor.u32 %v2508_v40, %v2505_v48 }
 0x131   :  { %2226 = vmatmul.bf16.gmra.mxu2 %v4082_v31  ;;  %2998 = vmatmul.bf16.gmra.mxu0 %v2906_v3  ;;  %v4154_v3 = vld [vmem:[%s6187_s0 + $0x9c] sm:$0x1]  ;;  %v4086_v44 = vor.u32 %v4433_v50, %v4085_v49  ;;  %v4434_v49 = vld [vmem:[%s6187_s0 + $0x94] sm:$0xf0] }
 0x132   :  { %v1702_v12 = vadd.f32 %v1675_v11, %v1252_v4  ;;  %3207 = vmatmul.bf16.gmra.mxu1 %v4464_v29  ;;  %v2526_v61 = vshll.u32 %v4154_v3, 16  ;;  %v2510_v25 = vrot.slane %v2509_v10, 4 }
 0x134   :  { %2676 = vmatmul.bf16.gmra.mxu3 %v2584_v63  ;;  %v5736_v6 = vadd.f32 %v1997_v19, %v1702_v12  ;;  %v1001_v11 = vpop.f32.mrf.mxu2  ;;  %v2839_v19 = vsel %vm4916_vm5, %v4247_v14, %v2838_v18  ;;  %v4152_v63 = vld [vmem:[%s6187_s0 + $0x94] sm:$0x1]  ;;  %v4233_v18 = vld [vmem:[%s6187_s0 + $0x98] sm:$0xe] }
 0x135   :  { %v1026_v8 = vadd.f32 %v1001_v11, %v5344_v0  ;;  %v2843_v0 = vsel %vm4916_vm5, %v4248_v22, %v2842_v23  ;;  %v2897_v31 = vunpack.c.l.b16 %v2839_v19  ;;  %v2512_v1 = vshll.u32 %v4152_v63, 16  ;;  %v4234_v22 = vld [vmem:[%s6187_s0 + $0x9c] sm:$0x1] }
 0x136   :  { %v1680_v24 = vpop.f32.mrf.mxu0  ;;  %v2898_v29 = vunpack.c.l.b16 %v2843_v0  ;;  %v4250_v32 = vrot.slane %v4233_v18, 9  ;;  %v2850_v33 = vrot.slane %v4234_v22, 5 }
 0x137   :  { %v1228_v58 = vpop.f32.mrf.mxu3  ;;  %v2002_v35 = vpop.f32.mrf.mxu1  ;;  %v2514_v11 = vrot.slane %v2512_v1, 5 }
 0x138   :  { %v1253_v17 = vadd.f32 %v1228_v58, %v1026_v8  ;;  %v2907_v13 = vpack.c.b16 %v2898_v29, %v2897_v31  ;;  %v2524_v8 = vrot.slane %v2523_v55, 4  ;;  %v2528_v58 = vrot.slane %v2526_v61, 5 }
 0x13a   :  { %v1703_v43 = vadd.f32 %v1678_v5, %v1253_v17  ;;  %v2529_v45 = vsel %vm4599_vm2, %v2524_v8, %v2528_v58 }
 0x13b   :  { %v2578_v31 = vunpack.c.l.b16 %v2529_v45 }
 0x13c   :  { %v5759_v42 = vadd.f32 %v2000_v62, %v1703_v43  ;;  %v1003_v53 = vpop.f32.mrf.mxu2  ;;  %v4231_v62 = vld [vmem:[%s6187_s0 + $0x90] sm:$0xe] }
 0x13d   :  { %v1027_v4 = vadd.f32 %v1003_v53, %v5381_v37  ;;  %v4232_v37 = vld [vmem:[%s6187_s0 + $0x94] sm:$0x1]  ;;  %v4249_v26 = vrot.slane %v4231_v62, 9  ;;  %v4466_v53 = vld [vmem:[%s6189_s1 + $0x38] sm:$0xff] }
 0x13e   :  { %v1683_v15 = vpop.f32.mrf.mxu0  ;;  %v2846_v28 = vrot.slane %v4232_v37, 5 }
 0x13f   :  { %v1230_v5 = vpop.f32.mrf.mxu3  ;;  %v2005_v12 = vpop.f32.mrf.mxu1 }
 0x140   :  { %v1254_v14 = vadd.f32 %v1230_v5, %v1027_v4  ;;  %v2847_v48 = vsel %vm4916_vm5, %v4249_v26, %v2846_v28 }
 0x141   :  { %2231 = vmatmul.bf16.gmra.mxu2 %v4086_v44  ;;  %3003 = vmatmul.bf16.gmra.mxu0 %v2907_v13  ;;  %v2899_v29 = vunpack.c.l.b16 %v2847_v48 }
 0x142   :  { %v1704_v23 = vadd.f32 %v1680_v24, %v1254_v14  ;;  %3212 = vmatmul.bf16.gmra.mxu1 %v4465_v7  ;;  %v2515_v24 = vsel %vm4599_vm2, %v2510_v25, %v2514_v11 }
 0x143   :  { %v2577_v50 = vunpack.c.l.b16 %v2515_v24 }
 0x144   :  { %2681 = vmatmul.bf16.gmra.mxu3 %v2585_v30  ;;  %v5777_v38 = vadd.f32 %v2002_v35, %v1704_v23  ;;  %v1006_v39 = vpop.f32.mrf.mxu2  ;;  %v2851_v35 = vsel %vm4916_vm5, %v4250_v32, %v2850_v33 }
 0x145   :  { %v1028_v17 = vadd.f32 %v1006_v39, %v5412_v16  ;;  %v4089_v16 = vld [vmem:[%s6187_s0 + $0x90] sm:$0xf]  ;;  %v2900_v47 = vunpack.c.l.b16 %v2851_v35  ;;  %v2586_v5 = vpack.c.b16 %v2578_v31, %v2577_v50 }
 0x146   :  { %v1685_v43 = vpop.f32.mrf.mxu0  ;;  %v4090_v3 = vor.u32 %v4434_v49, %v4089_v16 }
 0x147   :  { %v1233_v19 = vpop.f32.mrf.mxu3  ;;  %v2007_v0 = vpop.f32.mrf.mxu1  ;;  %v2908_v44 = vpack.c.b16 %v2900_v47, %v2899_v29 }
 0x148   :  { %v1255_v41 = vadd.f32 %v1233_v19, %v1028_v17 }
 0x14a   :  { %v1705_v40 = vadd.f32 %v1683_v15, %v1255_v41 }
 0x14c   :  { %v5794_v52 = vadd.f32 %v2005_v12, %v1705_v40  ;;  %v1008_v60 = vpop.f32.mrf.mxu2 }
 0x14d   :  { %v1029_v63 = vadd.f32 %v1008_v60, %v5434_v51 }
 0x14e   :  { %v1688_v7 = vpop.f32.mrf.mxu0 }
 0x14f   :  { %v1235_v54 = vpop.f32.mrf.mxu3  ;;  %v2010_v4 = vpop.f32.mrf.mxu1 }
 0x150   :  { %v1256_v30 = vadd.f32 %v1235_v54, %v1029_v63 }
 0x151   :  { %2236 = vmatmul.bf16.gmra.mxu2 %v4090_v3  ;;  %3008 = vmatmul.bf16.gmra.mxu0 %v2908_v44 }
 0x152   :  { %v1706_v10 = vadd.f32 %v1685_v43, %v1256_v30  ;;  %3217 = vmatmul.bf16.gmra.mxu1 %v4466_v53 }
 0x154   :  { %2686 = vmatmul.bf16.gmra.mxu3 %v2586_v5  ;;  %v5800_v12 = vadd.f32 %v2007_v0, %v1706_v10  ;;  %v1011_v13 = vpop.f32.mrf.mxu2 }
 0x155   :  { %v1030_v51 = vadd.f32 %v1011_v13, %v5458_v20 }
 0x156   :  { %v1690_v14 = vpop.f32.mrf.mxu0 }
 0x157   :  { %v1238_v1 = vpop.f32.mrf.mxu3  ;;  %v2012_v55 = vpop.f32.mrf.mxu1 }
 0x158   :  { %v1257_v61 = vadd.f32 %v1238_v1, %v1030_v51 }
 0x15a   :  { %v1707_v15 = vadd.f32 %v1688_v7, %v1257_v61 }
 0x15c   :  { %v5803_v62 = vadd.f32 %v2010_v4, %v1707_v15  ;;  %v1013_v37 = vpop.f32.mrf.mxu2 }
 0x15d   :  { %v1031_v18 = vadd.f32 %v1013_v37, %v5483_v57 }
 0x15e   :  { %v2974_v11 = vpop.f32.mrf.mxu0 }
 0x15f   :  { %v1240_v22 = vpop.f32.mrf.mxu3  ;;  %v5806_v23 = vpop.f32.mrf.mxu1 }
 0x160   :  { %v1258_v25 = vadd.f32 %v1240_v22, %v1031_v18 }
 0x162   :  { %v1708_v8 = vadd.f32 %v1690_v14, %v1258_v25 }
 0x164   :  { %v5808_v58 = vadd.f32 %v2012_v55, %v1708_v8  ;;  %v2202_v26 = vpop.f32.mrf.mxu2 }
 0x165   :  { %v2242_v20 = vadd.f32 %v2202_v26, %v5524_v56 }
 0x166   :  { %v2976_v39 = vpop.f32.mrf.mxu0 }
 0x167   :  { %v2652_v28 = vpop.f32.mrf.mxu3  ;;  %v5811_v32 = vpop.f32.mrf.mxu1 }
 0x168   :  { %v2692_v33 = vadd.f32 %v2652_v28, %v2242_v20 }
 0x16a   :  { %v5813_v17 = vadd.f32 %v2974_v11, %v2692_v33 }
 0x16c   :  { %v2204_v19 = vpop.f32.mrf.mxu2 }
 0x16d   :  { %v2243_v57 = vadd.f32 %v2204_v19, %v5548_v34 }
 0x16e   :  { %v2979_v43 = vpop.f32.mrf.mxu0 }
 0x16f   :  { %v2654_v0 = vpop.f32.mrf.mxu3  ;;  %v5816_v24 = vpop.f32.mrf.mxu1 }
 0x170   :  { %v2693_v41 = vadd.f32 %v2654_v0, %v2243_v57 }
 0x172   :  { %v5818_v45 = vadd.f32 %v2976_v39, %v2693_v41 }
 0x174   :  { %v3257_v56 = vadd.f32 %v5818_v45, %v5813_v17  ;;  %v2207_v48 = vpop.f32.mrf.mxu2 }
 0x175   :  { %v2244_v35 = vadd.f32 %v2207_v48, %v5571_v9 }
 0x176   :  { %v2981_v50 = vpop.f32.mrf.mxu0 }
 0x177   :  { %v2657_v40 = vpop.f32.mrf.mxu3  ;;  %v5823_v16 = vpop.f32.mrf.mxu1 }
 0x178   :  { %v2694_v49 = vadd.f32 %v2657_v40, %v2244_v35 }
 0x17a   :  { %v5825_v31 = vadd.f32 %v2979_v43, %v2694_v49 }
 0x17c   :  { %v3258_v34 = vadd.f32 %v3257_v56, %v5825_v31  ;;  %v2209_v29 = vpop.f32.mrf.mxu2 }
 0x17d   :  { %v2245_v47 = vadd.f32 %v2209_v29, %v5595_v46 }
 0x17e   :  { %v2984_v3 = vpop.f32.mrf.mxu0 }
 0x17f   :  { %v2659_v60 = vpop.f32.mrf.mxu3  ;;  %v5829_v63 = vpop.f32.mrf.mxu1 }
 0x180   :  { %v2695_v54 = vadd.f32 %v2659_v60, %v2245_v47 }
 0x182   :  { %v5831_v53 = vadd.f32 %v2981_v50, %v2695_v54 }
 0x184   :  { %v3259_v9 = vadd.f32 %v3258_v34, %v5831_v53  ;;  %v2212_v4 = vpop.f32.mrf.mxu2 }
 0x185   :  { %v2246_v5 = vadd.f32 %v2212_v4, %v5618_v21 }
 0x186   :  { %v2986_v10 = vpop.f32.mrf.mxu0 }
 0x187   :  { %v2662_v44 = vpop.f32.mrf.mxu3  ;;  %v5835_v30 = vpop.f32.mrf.mxu1 }
 0x188   :  { %v2696_v7 = vadd.f32 %v2662_v44, %v2246_v5 }
 0x18a   :  { %v5837_v13 = vadd.f32 %v2984_v3, %v2696_v7 }
 0x18c   :  { %v3260_v46 = vadd.f32 %v3259_v9, %v5837_v13  ;;  %v2214_v51 = vpop.f32.mrf.mxu2 }
 0x18d   :  { %v2247_v1 = vadd.f32 %v2214_v51, %v5642_v2 }
 0x18e   :  { %v2989_v15 = vpop.f32.mrf.mxu0 }
 0x18f   :  { %v2664_v55 = vpop.f32.mrf.mxu3  ;;  %v5841_v61 = vpop.f32.mrf.mxu1 }
 0x190   :  { %v2697_v14 = vadd.f32 %v2664_v55, %v2247_v1 }
 0x192   :  { %v5843_v37 = vadd.f32 %v2986_v10, %v2697_v14 }
 0x194   :  { %v3261_v21 = vadd.f32 %v3260_v46, %v5843_v37  ;;  %v2217_v18 = vpop.f32.mrf.mxu2 }
 0x195   :  { %v2248_v22 = vadd.f32 %v2217_v18, %v5665_v36 }
 0x196   :  { %v2991_v26 = vpop.f32.mrf.mxu0 }
 0x197   :  { %v2667_v25 = vpop.f32.mrf.mxu3  ;;  %v5847_v11 = vpop.f32.mrf.mxu1 }
 0x198   :  { %v2698_v8 = vadd.f32 %v2667_v25, %v2248_v22 }
 0x19a   :  { %v5849_v20 = vadd.f32 %v2989_v15, %v2698_v8 }
 0x19c   :  { %v3262_v2 = vadd.f32 %v3261_v21, %v5849_v20  ;;  %v2219_v28 = vpop.f32.mrf.mxu2 }
 0x19d   :  { %v2249_v33 = vadd.f32 %v2219_v28, %v5689_v59 }
 0x19e   :  { %v2994_v0 = vpop.f32.mrf.mxu0 }
 0x19f   :  { %v2669_v39 = vpop.f32.mrf.mxu3  ;;  %v5853_v19 = vpop.f32.mrf.mxu1 }
 0x1a0   :  { %v2699_v57 = vadd.f32 %v2669_v39, %v2249_v33 }
 0x1a2   :  { %v5855_v41 = vadd.f32 %v2991_v26, %v2699_v57 }
 0x1a4   :  { %v3263_v36 = vadd.f32 %v3262_v2, %v5855_v41  ;;  %v2222_v43 = vpop.f32.mrf.mxu2 }
 0x1a5   :  { %v2250_v56 = vadd.f32 %v2222_v43, %v5712_v27 }
 0x1a6   :  { %v2996_v49 = vpop.f32.mrf.mxu0 }
 0x1a7   :  { %v2672_v48 = vpop.f32.mrf.mxu3  ;;  %v5859_v35 = vpop.f32.mrf.mxu1 }
 0x1a8   :  { %v2700_v40 = vadd.f32 %v2672_v48, %v2250_v56 }
 0x1aa   :  { %v5861_v50 = vadd.f32 %v2994_v0, %v2700_v40 }
 0x1ac   :  { %v3264_v59 = vadd.f32 %v3263_v36, %v5861_v50  ;;  %v2224_v34 = vpop.f32.mrf.mxu2 }
 0x1ad   :  { %v2251_v29 = vadd.f32 %v2224_v34, %v5736_v6  ;;  %v3401_v6 = vadd.f32 %v5811_v32, %v5806_v23 }
 0x1ae   :  { %v2999_v3 = vpop.f32.mrf.mxu0 }
 0x1af   :  { %v2674_v47 = vpop.f32.mrf.mxu3  ;;  %v5865_v60 = vpop.f32.mrf.mxu1  ;;  %v3402_v14 = vadd.f32 %v3401_v6, %v5816_v24 }
 0x1b0   :  { %v2701_v54 = vadd.f32 %v2674_v47, %v2251_v29 }
 0x1b2   :  { %v5867_v9 = vadd.f32 %v2996_v49, %v2701_v54 }
 0x1b4   :  { %v3265_v27 = vadd.f32 %v3264_v59, %v5867_v9  ;;  %v2227_v4 = vpop.f32.mrf.mxu2 }
 0x1b5   :  { %v2252_v5 = vadd.f32 %v2227_v4, %v5759_v42  ;;  %v3403_v42 = vadd.f32 %v3402_v14, %v5823_v16 }
 0x1b6   :  { %v3001_v46 = vpop.f32.mrf.mxu0 }
 0x1b7   :  { %v2677_v44 = vpop.f32.mrf.mxu3  ;;  %v5871_v7 = vpop.f32.mrf.mxu1  ;;  %v3404_v25 = vadd.f32 %v3403_v42, %v5829_v63 }
 0x1b8   :  { %v2702_v10 = vadd.f32 %v2677_v44, %v2252_v5 }
 0x1b9   :  { %v3405_v2 = vadd.f32 %v3404_v25, %v5835_v30 }
 0x1ba   :  { %v5873_v51 = vadd.f32 %v2999_v3, %v2702_v10 }
 0x1bb   :  { %v3406_v39 = vadd.f32 %v3405_v2, %v5841_v61 }
 0x1bc   :  { %v3266_v1 = vadd.f32 %v3265_v27, %v5873_v51  ;;  %v2229_v55 = vpop.f32.mrf.mxu2 }
 0x1bd   :  { %v2253_v15 = vadd.f32 %v2229_v55, %v5777_v38  ;;  %v3407_v36 = vadd.f32 %v3406_v39, %v5847_v11 }
 0x1be   :  { %v3004_v26 = vpop.f32.mrf.mxu0 }
 0x1bf   :  { %v2679_v21 = vpop.f32.mrf.mxu3  ;;  %v5880_v18 = vpop.f32.mrf.mxu1  ;;  %v3408_v56 = vadd.f32 %v3407_v36, %v5853_v19 }
 0x1c0   :  { %v2703_v22 = vadd.f32 %v2679_v21, %v2253_v15 }
 0x1c1   :  { %v3409_v40 = vadd.f32 %v3408_v56, %v5859_v35 }
 0x1c2   :  { %v5884_v8 = vadd.f32 %v3001_v46, %v2703_v22 }
 0x1c3   :  { %v3410_v29 = vadd.f32 %v3409_v40, %v5865_v60 }
 0x1c4   :  { %v3267_v28 = vadd.f32 %v3266_v1, %v5884_v8  ;;  %v2232_v33 = vpop.f32.mrf.mxu2 }
 0x1c5   :  { %v2254_v38 = vadd.f32 %v2232_v33, %v5794_v52  ;;  %v3411_v3 = vadd.f32 %v3410_v29, %v5871_v7 }
 0x1c6   :  { %v3006_v59 = vpop.f32.mrf.mxu0 }
 0x1c7   :  { %v2682_v57 = vpop.f32.mrf.mxu3  ;;  %v5890_v0 = vpop.f32.mrf.mxu1  ;;  %v3412_v4 = vadd.f32 %v3411_v3, %v5880_v18 }
 0x1c8   :  { %v2704_v43 = vadd.f32 %v2682_v57, %v2254_v38 }
 0x1c9   :  { %v3413_v44 = vadd.f32 %v3412_v4, %v5890_v0 }
 0x1ca   :  { %v5894_v48 = vadd.f32 %v3004_v26, %v2704_v43 }
 0x1cc   :  { %v3268_v49 = vadd.f32 %v3267_v28, %v5894_v48  ;;  %v2234_v34 = vpop.f32.mrf.mxu2 }
 0x1cd   :  { %v2255_v52 = vadd.f32 %v2234_v34, %v5800_v12 }
 0x1ce   :  { %v3009_v55 = vpop.f32.mrf.mxu0 }
 0x1cf   :  { %v2684_v47 = vpop.f32.mrf.mxu3  ;;  %v5900_v54 = vpop.f32.mrf.mxu1 }
 0x1d0   :  { %v2705_v27 = vadd.f32 %v2684_v47, %v2255_v52  ;;  %v3414_v6 = vadd.f32 %v3413_v44, %v5900_v54 }
 0x1d2   :  { %v5904_v5 = vadd.f32 %v3006_v59, %v2705_v27 }
 0x1d4   :  { %v3269_v10 = vadd.f32 %v3268_v49, %v5904_v5  ;;  %v2237_v46 = vpop.f32.mrf.mxu2 }
 0x1d5   :  { %v2256_v1 = vadd.f32 %v2237_v46, %v5803_v62 }
 0x1d6   :  { %v3011_v57 = vpop.f32.mrf.mxu0 }
 0x1d7   :  { %v2687_v12 = vpop.f32.mrf.mxu3  ;;  %v5910_v14 = vpop.f32.mrf.mxu1 }
 0x1d8   :  { %v2706_v15 = vadd.f32 %v2687_v12, %v2256_v1  ;;  %v3415_v21 = vadd.f32 %v3414_v6, %v5910_v14 }
 0x1da   :  { %v5913_v42 = vadd.f32 %v3009_v55, %v2706_v15  ;;  %v3416_v22 = vrot.slane %v3415_v21, 4 }
 0x1dc   :  { %v3270_v25 = vadd.f32 %v3269_v10, %v5913_v42  ;;  %v3417_v26 = vadd.f32 %v3416_v22, %v3415_v21  ;;  %v2239_v2 = vpop.f32.mrf.mxu2 }
 0x1dd   :  { %v2257_v33 = vadd.f32 %v2239_v2, %v5808_v58 }
 0x1de   :  { %v3418_v28 = vrot.slane %v3417_v26, 2 }
 0x1df   :  { %v2689_v39 = vpop.f32.mrf.mxu3 }
 0x1e0   :  { %v3419_v38 = vadd.f32 %v3418_v28, %v3417_v26  ;;  %v2707_v62 = vadd.f32 %v2689_v39, %v2257_v33 }
 0x1e2   :  { %v3420_v36 = vrot.slane %v3419_v38, 1  ;;  %v3029_v43 = vadd.f32 %v3011_v57, %v2707_v62 }
 0x1e4   :  { %v3421_v56 = vadd.f32 %v3420_v36, %v3419_v38  ;;  %v3271_v40 = vadd.f32 %v3270_v25, %v3029_v43 }
 0x1e6   :  { %v5917_v49 = vmul.f32 0.0078125, %v3421_v56  ;;  %v3272_v47 = vrot.slane %v3271_v40, 4 }
 0x1e8   :  { %v5921_v59 = vsub.f32 %v5806_v23, %v5917_v49  ;;  %v5925_v34 = vsub.f32 %v5811_v32, %v5917_v49  ;;  %v5929_v58 = vsub.f32 %v5816_v24, %v5917_v49  ;;  %v5937_v3 = vsub.f32 %v5823_v16, %v5917_v49 }
 0x1e9   :  { %v5941_v23 = vsub.f32 %v5829_v63, %v5917_v49  ;;  %v3273_v27 = vadd.f32 %v3272_v47, %v3271_v40  ;;  %v5947_v4 = vsub.f32 %v5835_v30, %v5917_v49  ;;  %v5953_v16 = vsub.f32 %v5841_v61, %v5917_v49 }
 0x1ea   :  { %v3439_v29 = vmul.f32 %v5921_v59, %v5921_v59  ;;  %v3440_v52 = vmul.f32 %v5925_v34, %v5925_v34  ;;  %v3441_v32 = vmul.f32 %v5929_v58, %v5929_v58  ;;  %v3442_v44 = vmul.f32 %v5937_v3, %v5937_v3 }
 0x1eb   :  { %v3274_v46 = vrot.slane %v3273_v27, 2  ;;  %v3443_v63 = vmul.f32 %v5941_v23, %v5941_v23  ;;  %v5959_v12 = vsub.f32 %v5847_v11, %v5917_v49  ;;  %v3444_v30 = vmul.f32 %v5947_v4, %v5947_v4 }
 0x1ec   :  { %v3455_v24 = vadd.f32 %v3440_v52, %v3439_v29  ;;  %v5965_v21 = vsub.f32 %v5853_v19, %v5917_v49  ;;  %v5969_v61 = vsub.f32 %v5859_v35, %v5917_v49  ;;  %v3445_v22 = vmul.f32 %v5953_v16, %v5953_v16 }
 0x1ed   :  { %v3275_v1 = vadd.f32 %v3274_v46, %v3273_v27  ;;  %v5975_v11 = vsub.f32 %v5865_v60, %v5917_v49  ;;  %v3446_v2 = vmul.f32 %v5959_v12, %v5959_v12  ;;  %v5981_v19 = vsub.f32 %v5871_v7, %v5917_v49 }
 0x1ee   :  { %v3456_v10 = vadd.f32 %v3455_v24, %v3441_v32  ;;  %v5985_v35 = vsub.f32 %v5880_v18, %v5917_v49  ;;  %v3447_v39 = vmul.f32 %v5965_v21, %v5965_v21  ;;  %v3448_v60 = vmul.f32 %v5969_v61, %v5969_v61 }
 0x1ef   :  { %v3276_v15 = vrot.slane %v3275_v1, 1 }
 0x1f0   :  { %v3457_v6 = vadd.f32 %v3456_v10, %v3442_v44 }
 0x1f1   :  { %v3277_v26 = vadd.f32 %v3276_v15, %v3275_v1 }
 0x1f2   :  { %v3458_v55 = vadd.f32 %v3457_v6, %v3443_v63 }
 0x1f3   :  { %v3278_v33 = vmul.f32 0.0078125, %v3277_v26 }
 0x1f4   :  { %v3459_v25 = vadd.f32 %v3458_v55, %v3444_v30 }
 0x1f5   :  { %v5992_v62 = vsub.f32 %v5813_v17, %v3278_v33  ;;  %v5995_v57 = vsub.f32 %v5818_v45, %v3278_v33  ;;  %v5998_v7 = vsub.f32 %v5825_v31, %v3278_v33  ;;  %v6001_v36 = vsub.f32 %v5831_v53, %v3278_v33 }
 0x1f6   :  { %v3460_v28 = vadd.f32 %v3459_v25, %v3445_v22  ;;  %v6004_v18 = vsub.f32 %v5837_v13, %v3278_v33  ;;  %v6007_v56 = vsub.f32 %v5843_v37, %v3278_v33  ;;  %v6010_v40 = vsub.f32 %v5849_v20, %v3278_v33 }
 0x1f7   :  { %v6013_v29 = vsub.f32 %v5855_v41, %v3278_v33  ;;  %v6016_v45 = vsub.f32 %v5861_v50, %v3278_v33  ;;  %v6019_v31 = vsub.f32 %v5867_v9, %v3278_v33  ;;  %v6022_v53 = vsub.f32 %v5873_v51, %v3278_v33 }
 0x1f8   :  { %v3461_v38 = vadd.f32 %v3460_v28, %v3446_v2  ;;  %v6025_v13 = vsub.f32 %v5884_v8, %v3278_v33  ;;  %v6028_v37 = vsub.f32 %v5894_v48, %v3278_v33  ;;  %v6031_v20 = vsub.f32 %v5904_v5, %v3278_v33 }
 0x1f9   :  { %v3449_v41 = vmul.f32 %v5975_v11, %v5975_v11  ;;  %v6036_v52 = vsub.f32 %v5913_v42, %v3278_v33  ;;  %v6038_v9 = vsub.f32 %v3029_v43, %v3278_v33  ;;  %v3295_v51 = vmul.f32 %v5992_v62, %v5992_v62 }
 0x1fa   :  { %v3462_v17 = vadd.f32 %v3461_v38, %v3447_v39  ;;  %v3296_v8 = vmul.f32 %v5995_v57, %v5995_v57  ;;  %v6046_v48 = vsub.f32 %v5890_v0, %v5917_v49  ;;  %v3450_v5 = vmul.f32 %v5981_v19, %v5981_v19 }
 0x1fb   :  { %v6052_v42 = vsub.f32 %v5900_v54, %v5917_v49  ;;  %v3451_v43 = vmul.f32 %v5985_v35, %v5985_v35  ;;  %v3297_v24 = vmul.f32 %v5998_v7, %v5998_v7  ;;  %v6060_v0 = vsub.f32 %v5910_v14, %v5917_v49 }
 0x1fc   :  { %v3463_v50 = vadd.f32 %v3462_v17, %v3448_v60  ;;  %v3311_v27 = vadd.f32 %v3296_v8, %v3295_v51  ;;  %v3452_v44 = vmul.f32 %v6046_v48, %v6046_v48  ;;  %v3298_v54 = vmul.f32 %v6001_v36, %v6001_v36 }
 0x1fd   :  { %v3453_v63 = vmul.f32 %v6052_v42, %v6052_v42  ;;  %v3299_v1 = vmul.f32 %v6004_v18, %v6004_v18  ;;  %v3454_v14 = vmul.f32 %v6060_v0, %v6060_v0  ;;  %v3300_v55 = vmul.f32 %v6007_v56, %v6007_v56 }
 0x1fe   :  { %v3464_v47 = vadd.f32 %v3463_v50, %v3449_v41  ;;  %v3312_v46 = vadd.f32 %v3311_v27, %v3297_v24  ;;  %v3301_v25 = vmul.f32 %v6010_v40, %v6010_v40  ;;  %v3302_v28 = vmul.f32 %v6013_v29, %v6013_v29 }
 0x1ff   :  { %v3303_v60 = vmul.f32 %v6016_v45, %v6016_v45  ;;  %v3304_v41 = vmul.f32 %v6019_v31, %v6019_v31  ;;  %v3305_v8 = vmul.f32 %v6022_v53, %v6022_v53  ;;  %v3307_v27 = vmul.f32 %v6028_v37, %v6028_v37 }
 0x200   :  { %v3465_v32 = vadd.f32 %v3464_v47, %v3450_v5  ;;  %v3313_v30 = vadd.f32 %v3312_v46, %v3298_v54  ;;  %v3308_v54 = vmul.f32 %v6031_v20, %v6031_v20 }
 0x202   :  { %v3466_v10 = vadd.f32 %v3465_v32, %v3451_v43  ;;  %v3314_v15 = vadd.f32 %v3313_v30, %v3299_v1  ;;  %v3306_v43 = vmul.f32 %v6025_v13, %v6025_v13  ;;  %v3310_v30 = vmul.f32 %v6038_v9, %v6038_v9 }
 0x204   :  { %v3467_v6 = vadd.f32 %v3466_v10, %v3452_v44  ;;  %v3315_v26 = vadd.f32 %v3314_v15, %v3300_v55 }
 0x206   :  { %v3468_v49 = vadd.f32 %v3467_v6, %v3453_v63  ;;  %v3316_v33 = vadd.f32 %v3315_v26, %v3301_v25  ;;  %v3309_v6 = vmul.f32 %v6036_v52, %v6036_v52 }
 0x208   :  { %v3469_v22 = vadd.f32 %v3468_v49, %v3454_v14  ;;  %v3317_v38 = vadd.f32 %v3316_v33, %v3302_v28 }
 0x20a   :  { %v3470_v2 = vrot.slane %v3469_v22, 4  ;;  %v3318_v50 = vadd.f32 %v3317_v38, %v3303_v60  ;;  %v3399_v38 = vld [vmem:[%s6192_s6] sm:$0x1] }
 0x20c   :  { %v3471_v39 = vadd.f32 %v3470_v2, %v3469_v22  ;;  %v3319_v5 = vadd.f32 %v3318_v50, %v3304_v41 }
 0x20e   :  { %v3472_v17 = vrot.slane %v3471_v39, 2  ;;  %v3320_v32 = vadd.f32 %v3319_v5, %v3305_v8 }
 0x210   :  { %v3473_v51 = vadd.f32 %v3472_v17, %v3471_v39  ;;  %v3321_v44 = vadd.f32 %v3320_v32, %v3306_v43 }
 0x212   :  { %v3474_v47 = vrot.slane %v3473_v51, 1  ;;  %v3322_v46 = vadd.f32 %v3321_v44, %v3307_v27 }
 0x214   :  { %v3475_v24 = vadd.f32 %v3474_v47, %v3473_v51  ;;  %v3323_v1 = vadd.f32 %v3322_v46, %v3308_v54 }
 0x216   :  { %v3476_v10 = vmul.f32 0.0078125, %v3475_v24  ;;  %v3324_v14 = vadd.f32 %v3323_v1, %v3309_v6  ;;  %v4491_v1 = vld [vmem:[%s6190_s7] ss:$0 sm:$0xff] }
 0x218   :  { %v3477_v63 = vadd.f32 1e-05, %v3476_v10  ;;  %v3325_v49 = vadd.f32 %v3324_v14, %v3310_v30 }
 0x21a   :  { %4493 = vrsqrt.f32 %v3477_v63  ;;  %v3326_v55 = vrot.slane %v3325_v49, 4  ;;  %vm3484_vm7 = vweird.f32 %v3477_v63 }
 0x21c   :  { %v3327_v25 = vadd.f32 %v3326_v55, %v3325_v49 }
 0x21e   :  { %v3328_v2 = vrot.slane %v3327_v25, 2 }
 0x220   :  { %v4494_v15 = vpop.eup %4493  ;;  %v3329_v33 = vadd.f32 %v3328_v2, %v3327_v25 }
 0x221   :  { %v3479_v22 = vmul.f32 %v4494_v15, %v3477_v63  ;;  %vm3485_vm6 = vweird.f32 %v4494_v15 }
 0x222   :  { %v3330_v60 = vrot.slane %v3329_v33, 1  ;;  %vm3486_vm8 = vmor %vm3484_vm7, %vm3485_vm6 }
 0x223   :  { %v3480_v26 = vmul.f32 %v4494_v15, %v3479_v22 }
 0x224   :  { %v3331_v41 = vadd.f32 %v3330_v60, %v3329_v33 }
 0x225   :  { %v3481_v28 = vmul.f32 0.5, %v3480_v26 }
 0x226   :  { %v3332_v51 = vmul.f32 0.0078125, %v3331_v41 }
 0x227   :  { %v3482_v39 = vsub.f32 1.5, %v3481_v28 }
 0x228   :  { %v3333_v5 = vadd.f32 1e-05, %v3332_v51 }
 0x229   :  { %v3483_v17 = vmul.f32 %v4494_v15, %v3482_v39 }
 0x22a   :  { %4495 = vrsqrt.f32 %v3333_v5  ;;  %vm3340_vm10 = vweird.f32 %v3333_v5 }
 0x22b   :  { %v3487_v50 = vsel %vm3486_vm8, %v4494_v15, %v3483_v17 }
 0x22c   :  { %v3488_v8 = vmul.f32 %v3487_v50, %v3399_v38 }
 0x22e   :  { %v3490_v47 = vperm.slane %v3488_v8, 0 }
 0x230   :  { %v3500_v43 = vmul.f32 %v3490_v47, %v5965_v21  ;;  %v3501_v32 = vmul.f32 %v3490_v47, %v5969_v61  ;;  %v3502_v24 = vmul.f32 %v3490_v47, %v5975_v11  ;;  %v3503_v27 = vmul.f32 %v3490_v47, %v5981_v19  ;;  %v4496_v44 = vpop.eup %4495 }
 0x231   :  { %v3335_v10 = vmul.f32 %v4496_v44, %v3333_v5  ;;  %v3492_v63 = vmul.f32 %v3490_v47, %v5921_v59  ;;  %v3493_v6 = vmul.f32 %v3490_v47, %v5925_v34  ;;  %vm3341_vm9 = vweird.f32 %v4496_v44  ;;  %v3255_v34 = vld [vmem:[%s6193_s3] sm:$0x1] }
 0x232   :  { %v3494_v21 = vmul.f32 %v3490_v47, %v5929_v58  ;;  %v3495_v61 = vmul.f32 %v3490_v47, %v5937_v3  ;;  %v3496_v11 = vmul.f32 %v3490_v47, %v5941_v23  ;;  %v3497_v19 = vmul.f32 %v3490_v47, %v5947_v4  ;;  %vm3342_vm11 = vmor %vm3340_vm10, %vm3341_vm9 }
 0x233   :  { %v3336_v54 = vmul.f32 %v4496_v44, %v3335_v10  ;;  %v3498_v14 = vmul.f32 %v3490_v47, %v5953_v16  ;;  %v3499_v59 = vmul.f32 %v3490_v47, %v5959_v12  ;;  %v3504_v55 = vmul.f32 %v3490_v47, %v5985_v35 }
 0x234   :  { %v3505_v58 = vmul.f32 %v3490_v47, %v6046_v48  ;;  %v3506_v3 = vmul.f32 %v3490_v47, %v6052_v42  ;;  %v3507_v23 = vmul.f32 %v3490_v47, %v6060_v0  ;;  %v3511_v15 = vadd.f32 %v4491_v1, %v3492_v63  ;;  %v4492_v47 = vld [vmem:[%s6191_s4] ss:$0 sm:$0xff] }
 0x235   :  { %v3337_v46 = vmul.f32 0.5, %v3336_v54  ;;  %v3512_v4 = vadd.f32 %v4491_v1, %v3493_v6  ;;  %v3513_v16 = vadd.f32 %v4491_v1, %v3494_v21  ;;  %v3514_v25 = vadd.f32 %v4491_v1, %v3495_v61 }
 0x236   :  { %v3515_v12 = vadd.f32 %v4491_v1, %v3496_v11  ;;  %v3516_v2 = vadd.f32 %v4491_v1, %v3497_v19  ;;  %v3517_v28 = vadd.f32 %v4491_v1, %v3498_v14  ;;  %v3518_v33 = vadd.f32 %v4491_v1, %v3499_v59 }
 0x237   :  { %v3338_v30 = vsub.f32 1.5, %v3337_v46  ;;  %v3519_v39 = vadd.f32 %v4491_v1, %v3500_v43  ;;  %v3520_v60 = vadd.f32 %v4491_v1, %v3501_v32  ;;  %v3521_v35 = vadd.f32 %v4491_v1, %v3502_v24 }
 0x238   :  { %v3522_v38 = vadd.f32 %v4491_v1, %v3503_v27  ;;  %v3523_v17 = vadd.f32 %v4491_v1, %v3504_v55  ;;  %v3524_v42 = vadd.f32 %v4491_v1, %v3505_v58  ;;  %v3525_v41 = vadd.f32 %v4491_v1, %v3506_v3 }
 0x239   :  { %v3339_v49 = vmul.f32 %v4496_v44, %v3338_v30  ;;  %v3526_v50 = vadd.f32 %v4491_v1, %v3507_v23 }
 0x23b   :  { %v3343_v22 = vsel %vm3342_vm11, %v4496_v44, %v3339_v49 }
 0x23c   :  { %v3344_v26 = vmul.f32 %v3343_v22, %v3255_v34 }
 0x23e   :  { %v3346_v48 = vperm.slane %v3344_v26, 0 }
 0x240   :  { %v3348_v0 = vmul.f32 %v3346_v48, %v5992_v62  ;;  %v3349_v51 = vmul.f32 %v3346_v48, %v5995_v57  ;;  %v3350_v8 = vmul.f32 %v3346_v48, %v5998_v7  ;;  %v3351_v5 = vmul.f32 %v3346_v48, %v6001_v36 }
 0x241   :  { %v3352_v43 = vmul.f32 %v3346_v48, %v6004_v18  ;;  %v3353_v32 = vmul.f32 %v3346_v48, %v6007_v56  ;;  %v3354_v24 = vmul.f32 %v3346_v48, %v6010_v40  ;;  %v3355_v27 = vmul.f32 %v3346_v48, %v6013_v29 }
 0x242   :  { %v3356_v62 = vmul.f32 %v3346_v48, %v6016_v45  ;;  %v3357_v57 = vmul.f32 %v3346_v48, %v6019_v31  ;;  %v3358_v7 = vmul.f32 %v3346_v48, %v6022_v53  ;;  %v3359_v36 = vmul.f32 %v3346_v48, %v6025_v13 }
 0x243   :  { %v3360_v44 = vmul.f32 %v3346_v48, %v6028_v37  ;;  %v3361_v10 = vmul.f32 %v3346_v48, %v6031_v20  ;;  %v3362_v18 = vmul.f32 %v3346_v48, %v6036_v52  ;;  %v3363_v56 = vmul.f32 %v3346_v48, %v6038_v9 }
 0x244   :  { %v3367_v54 = vadd.f32 %v4492_v47, %v3348_v0  ;;  %v3368_v40 = vadd.f32 %v4492_v47, %v3349_v51  ;;  %v3369_v46 = vadd.f32 %v4492_v47, %v3350_v8  ;;  %v3370_v29 = vadd.f32 %v4492_v47, %v3351_v5 }
 0x245   :  { %v3371_v63 = vadd.f32 %v4492_v47, %v3352_v43  ;;  %v3372_v45 = vadd.f32 %v4492_v47, %v3353_v32  ;;  %v3373_v6 = vadd.f32 %v4492_v47, %v3354_v24  ;;  %v3374_v31 = vadd.f32 %v4492_v47, %v3355_v27 }
 0x246   :  { %v3375_v1 = vadd.f32 %v4492_v47, %v3356_v62  ;;  %v3376_v53 = vadd.f32 %v4492_v47, %v3357_v57  ;;  %v3377_v30 = vadd.f32 %v4492_v47, %v3358_v7  ;;  %v3378_v13 = vadd.f32 %v4492_v47, %v3359_v36 }
 0x247   :  { %v3379_v21 = vadd.f32 %v4492_v47, %v3360_v44  ;;  %v3380_v37 = vadd.f32 %v4492_v47, %v3361_v10  ;;  %v3381_v61 = vadd.f32 %v4492_v47, %v3362_v18  ;;  %v3382_v20 = vadd.f32 %v4492_v47, %v3363_v56 }
 0x248   :  { %v3527_v11 = vadd.f32 %v3511_v15, %v3367_v54  ;;  %v3528_v52 = vadd.f32 %v3512_v4, %v3368_v40  ;;  %v3529_v19 = vadd.f32 %v3513_v16, %v3369_v46  ;;  %v3530_v9 = vadd.f32 %v3514_v25, %v3370_v29 }
 0x249   :  { %v3531_v14 = vadd.f32 %v3515_v12, %v3371_v63  ;;  %v3532_v59 = vadd.f32 %v3516_v2, %v3372_v45  ;;  %v3533_v34 = vadd.f32 %v3517_v28, %v3373_v6  ;;  %v3534_v49 = vadd.f32 %v3518_v33, %v3374_v31 }
 0x24a   :  { %v3535_v55 = vadd.f32 %v3519_v39, %v3375_v1  ;;  %v3536_v58 = vadd.f32 %v3520_v60, %v3376_v53  ;;  %v3537_v3 = vadd.f32 %v3521_v35, %v3377_v30  ;;  %v3538_v23 = vadd.f32 %v3522_v38, %v3378_v13 }
 0x24b   :  { %v3539_v22 = vadd.f32 %v3523_v17, %v3379_v21  ;;  %v3540_v26 = vadd.f32 %v3524_v42, %v3380_v37  ;;  %v3541_v48 = vadd.f32 %v3525_v41, %v3381_v61  ;;  %v3542_v0 = vadd.f32 %v3526_v50, %v3382_v20 }
 0x24c   :  { %v3543_v51 = vmax.f32 %v3527_v11, 0.0  ;;  %v3544_v8 = vmax.f32 %v3528_v52, 0.0  ;;  %v3545_v5 = vmax.f32 %v3529_v19, 0.0  ;;  %v3546_v47 = vmax.f32 %v3530_v9, 0.0 }
 0x24d   :  { %v3547_v15 = vmax.f32 %v3531_v14, 0.0  ;;  %v3548_v4 = vmax.f32 %v3532_v59, 0.0  ;;  %v3549_v16 = vmax.f32 %v3533_v34, 0.0  ;;  %v3550_v25 = vmax.f32 %v3534_v49, 0.0 }
 0x24e   :  { %3559 = vst [vmem:[%s6194_s8] sm:$0xff] %v3543_v51  ;;  %v3551_v12 = vmax.f32 %v3535_v55, 0.0  ;;  %v3552_v2 = vmax.f32 %v3536_v58, 0.0  ;;  %v3553_v28 = vmax.f32 %v3537_v3, 0.0  ;;  %v3554_v33 = vmax.f32 %v3538_v23, 0.0 }
 0x24f   :  { %3560 = vst [vmem:[%s6194_s8 + $0x8] sm:$0xff] %v3544_v8  ;;  %v3555_v39 = vmax.f32 %v3539_v22, 0.0  ;;  %v3556_v60 = vmax.f32 %v3540_v26, 0.0  ;;  %v3557_v35 = vmax.f32 %v3541_v48, 0.0  ;;  %v3558_v38 = vmax.f32 %v3542_v0, 0.0 }
 0x250   :  { %3561 = vst [vmem:[%s6194_s8 + $0x10] sm:$0xff] %v3545_v5 }
 0x251   :  { %3562 = vst [vmem:[%s6194_s8 + $0x18] sm:$0xff] %v3546_v47 }
 0x252   :  { %3563 = vst [vmem:[%s6194_s8 + $0x20] sm:$0xff] %v3547_v15 }
 0x253   :  { %3564 = vst [vmem:[%s6194_s8 + $0x28] sm:$0xff] %v3548_v4 }
 0x254   :  { %3565 = vst [vmem:[%s6194_s8 + $0x30] sm:$0xff] %v3549_v16 }
 0x255   :  { %3566 = vst [vmem:[%s6194_s8 + $0x38] sm:$0xff] %v3550_v25 }
 0x256   :  { %3567 = vst [vmem:[%s6194_s8 + $0x40] sm:$0xff] %v3551_v12 }
 0x257   :  { %3568 = vst [vmem:[%s6194_s8 + $0x48] sm:$0xff] %v3552_v2 }
 0x258   :  { %3569 = vst [vmem:[%s6194_s8 + $0x50] sm:$0xff] %v3553_v28 }
 0x259   :  { %3570 = vst [vmem:[%s6194_s8 + $0x58] sm:$0xff] %v3554_v33 }
 0x25a   :  { %3571 = vst [vmem:[%s6194_s8 + $0x60] sm:$0xff] %v3555_v39 }
 0x25b   :  { %3572 = vst [vmem:[%s6194_s8 + $0x68] sm:$0xff] %v3556_v60 }
 0x25c   :  { %3573 = vst [vmem:[%s6194_s8 + $0x70] sm:$0xff] %v3557_v35 }
 0x25d   :  { %3574 = vst [vmem:[%s6194_s8 + $0x78] sm:$0xff] %v3558_v38 }

</bundles_post_ra>
